<compile_context>
chip_gen: v7x
topology: tpu7x:2x2x1
jax: 0.10.0
libtpu: 0.0.40
codegen_flags: <defaults>
</compile_context>

<pallas_src>
import functools

import jax
import jax.numpy as jnp
from jax import lax
from jax.experimental import pallas as pl
from jax.experimental.pallas import tpu as pltpu


def _round_up(x, m):
    return ((x + m - 1) // m) * m


def _bf16_valu_available():
    """bf16 VALU exists on TPU v6e / v7x; v5e and earlier do elementwise math in f32."""
    try:
        kind = jax.devices()[0].device_kind.lower()
    except Exception:
        return False
    return any(tag in kind for tag in ("v6", "v7", "7x"))


# ----------------------------- Pallas kernel ---------------------------------
def seg_head_kernel(x_ref, w1_ref, b1_ref, w2_ref, b2_ref, o_ref, *,
                    compute_dtype, chunk_rows):
    """Fused 1x1-conv MLP head; lane axis = spatial, register-blocked over rows.

    x_ref : [C, S, 128]      (VMEM)  activation tile (spatial on sublane x lane)
    w1_ref: [C, HIDDEN]      (SMEM)  scalar weights
    b1_ref: [HIDDEN]         (SMEM)
    w2_ref: [HIDDEN, N_CLS]  (SMEM)
    b2_ref: [N_CLS]          (SMEM)
    o_ref : [N_CLS, S, 128]  (VMEM)  per-class logit planes
    """
    c_in, s_tile, _ = x_ref.shape
    hidden = w1_ref.shape[1]
    n_cls = w2_ref.shape[1]
    cdt = compute_dtype
    out_dt = o_ref.dtype

    # Tiny weights: scalar SMEM loads, cast once per grid step and hoisted out of
    # the chunk loop so the loop body is pure lane-dense VALU work.
    w1 = [[w1_ref[c, h].astype(cdt) for h in range(hidden)] for c in range(c_in)]
    b1 = [b1_ref[h].astype(cdt) for h in range(hidden)]
    w2 = [[w2_ref[h, k].astype(cdt) for k in range(n_cls)] for h in range(hidden)]
    b2 = [b2_ref[k].astype(cdt) for k in range(n_cls)]

    def chunk_body(r0):
        # One register block: C_in input planes + N_CLS accumulators + (acc, hplane)
        # stay live -> ~10-20 vregs, no spills.
        xc = [x_ref[c, pl.ds(r0, chunk_rows), :].astype(cdt) for c in range(c_in)]
        out = [None] * n_cls
        for h in range(hidden):                  # fully unrolled: HIDDEN is tiny
            # hidden[h] = relu(sum_c w1[c,h] * x[c] + b1[h])   (VPU broadcast-MAC)
            acc = xc[0] * w1[0][h]
            for c in range(1, c_in):
                acc = acc + xc[c] * w1[c][h]
            hplane = jnp.maximum(acc + b1[h], 0)
            # fused second 1x1 conv: logits[k] += w2[h,k] * hidden[h]
            for k in range(n_cls):
                t = hplane * w2[h][k]
                out[k] = t if out[k] is None else out[k] + t
        for k in range(n_cls):                   # lane-dense stores per class plane
            o_ref[k, pl.ds(r0, chunk_rows), :] = (out[k] + b2[k]).astype(out_dt)

    n_chunks = s_tile // chunk_rows
    if n_chunks == 1:
        chunk_body(0)
    else:
        def loop_body(i, carry):
            chunk_body(pl.multiple_of(i * chunk_rows, chunk_rows))
            return carry
        lax.fori_loop(0, n_chunks, loop_body, 0)


def seg_head_pallas(x4, w1, b1, w2, b2, *, target_rows=256, compute_dtype=None):
    """x4: [B, C, R, 128] float32 (R*128 spatial positions per image).
    Returns [B, N_CLS, R_pad, 128] float32 logits (rows possibly padded up to a
    multiple of the spatial tile; caller slices the tail off)."""
    if compute_dtype is None:
        compute_dtype = jnp.bfloat16 if _bf16_valu_available() else jnp.float32
    compute_dtype = jnp.dtype(compute_dtype)

    bsz, c_in, rows, lanes = x4.shape
    assert lanes == 128
    hidden = w1.shape[1]
    n_cls = w2.shape[1]

    # Register-block chunk: 1 bf16 vreg ([32,128] bf16) or 2 f32 vregs ([16,128] f32)
    # per plane.  bf16 also needs the bigger chunk so scalar-weight traffic per chunk
    # stays off the critical path.
    chunk_rows = 32 if compute_dtype == jnp.bfloat16 else 16
    target_rows = max(chunk_rows, (target_rows // chunk_rows) * chunk_rows)

    if rows <= chunk_rows:
        # Tiny spatial extent: one full-extent block (legal per the (8,128) rule),
        # single static chunk, no padding.
        s_tile = rows
        chunk_rows = rows
    elif rows <= target_rows:
        s_tile = _round_up(rows, chunk_rows)
    else:
        s_tile = target_rows

    rows_pad = _round_up(rows, s_tile)
    if rows_pad != rows:
        # TODO(synk): a masked last tile (pl.BoundedSlice / masked store) would avoid
        # this wrapper-side pad for awkward H*W; padding is correct and cheap here.
        x4 = jnp.pad(x4, ((0, 0), (0, 0), (0, rows_pad - rows), (0, 0)))

    # Grid: (batch, spatial tiles), both "parallel" (megacore-friendly on v7x).
    grid = (bsz, rows_pad // s_tile)

    n_pix = bsz * rows_pad * 128
    cost = pl.CostEstimate(
        flops=2 * n_pix * (c_in * hidden + hidden * n_cls),
        transcendentals=0,
        bytes_accessed=n_pix * (c_in + n_cls) * 4
        + 4 * (w1.size + b1.size + w2.size + b2.size),
    )

    kernel = functools.partial(
        seg_head_kernel, compute_dtype=compute_dtype, chunk_rows=chunk_rows)

    return pl.pallas_call(
        kernel,
        out_shape=jax.ShapeDtypeStruct((bsz, n_cls, rows_pad, 128), jnp.float32),
        grid=grid,
        in_specs=[
            # Activations: lane-dense spatial tiles, batch dim squeezed out.
            pl.BlockSpec((None, c_in, s_tile, 128), lambda b, s: (b, 0, s, 0)),
            # Tiny weights live in SMEM as scalars (resident, no per-step tiling,
            # no (8,128) lane padding of (4,32)/(32,4) weight blocks).
            pl.BlockSpec(memory_space=pltpu.MemorySpace.SMEM),  # w1
            pl.BlockSpec(memory_space=pltpu.MemorySpace.SMEM),  # b1
            pl.BlockSpec(memory_space=pltpu.MemorySpace.SMEM),  # w2
            pl.BlockSpec(memory_space=pltpu.MemorySpace.SMEM),  # b2
        ],
        out_specs=pl.BlockSpec((None, n_cls, s_tile, 128), lambda b, s: (b, 0, s, 0)),
        compiler_params=pltpu.CompilerParams(
            dimension_semantics=("parallel", "parallel"),
        ),
        cost_estimate=cost,
    )(x4, w1, b1, w2, b2)


# --------------------------- Model / wrapper glue -----------------------------
def init_params(key, c_in, hidden, num_classes):
    k1, k2, k3, k4 = jax.random.split(key, 4)
    w1 = jax.random.normal(k1, (c_in, hidden), jnp.float32) * 0.1
    b1 = jax.random.normal(k2, (hidden,), jnp.float32) * 0.01
    w2 = jax.random.normal(k3, (hidden, num_classes), jnp.float32) * 0.1
    b2 = jax.random.normal(k4, (num_classes,), jnp.float32) * 0.01
    return dict(w1=w1, b1=b1, w2=w2, b2=b2)


def inner_model(params, batch, compute_dtype=None):
    """Synthetic segmentation model: takes dict(x=x) NCHW, returns {'logits': NCHW}.
    No transposes: NCHW -> [B, C, HW/128, 128] is a free, layout-preserving reshape."""
    x = batch["x"]                                  # [B, C, H, W]
    bsz, c_in, h, w = x.shape
    n_cls = params["w2"].shape[1]

    hw = h * w
    hw_lane = _round_up(hw, 128)
    x3 = x.reshape(bsz, c_in, hw)
    if hw_lane != hw:                               # pad spatial to a lane multiple
        x3 = jnp.pad(x3, ((0, 0), (0, 0), (0, hw_lane - hw)))
    x4 = x3.reshape(bsz, c_in, hw_lane // 128, 128)

    out4 = seg_head_pallas(x4, params["w1"], params["b1"],
                           params["w2"], params["b2"],
                           compute_dtype=compute_dtype)
    hw_out = out4.shape[2] * 128
    logits3 = out4.reshape(bsz, n_cls, hw_out)
    if hw_out != hw:                                # drop padded tail (garbage logits)
        logits3 = logits3[:, :, :hw]
    return {"logits": logits3.reshape(bsz, n_cls, h, w)}


class ModelWrapper:
    """JAX/Pallas equivalent of the PyTorch ModelWrapper: forward delegates to
    self.model(dict(x=x))['logits']."""

    def __init__(self, model):
        self.model = model

    def __call__(self, x):
        return self.model(dict(x=x))["logits"]


def build_forward(params, compute_dtype):
    wrapper = ModelWrapper(
        lambda batch: inner_model(params, batch, compute_dtype=compute_dtype))
    return jax.jit(lambda xx: wrapper(xx))


# ------------------------------ reference check -------------------------------
def reference_forward(params, x):
    b, c, h, w = x.shape
    x2d = jnp.transpose(x, (0, 2, 3, 1)).reshape(-1, c)
    hdn = jnp.maximum(x2d @ params["w1"] + params["b1"], 0.0)
    out = hdn @ params["w2"] + params["b2"]
    n_cls = params["w2"].shape[1]
    return out.reshape(b, h, w, n_cls).transpose(0, 3, 1, 2)


if __name__ == "__main__":
    # TODO(synk): the wrapped `model` is unspecified in the PyTorch ModelWrapper;
    # a synthetic 1x1-conv segmentation head stands in for it here.
    B, C, H, W = 2, 4, 16, 16        # H*W = 256 -> 2 sublane-rows of 128 lanes
    HIDDEN, NUM_CLASSES = 32, 4

    key = jax.random.PRNGKey(0)
    kx, kp = jax.random.split(key)
    x = jax.random.normal(kx, (B, C, H, W), jnp.float32)
    params = init_params(kp, C, HIDDEN, NUM_CLASSES)

    use_bf16 = _bf16_valu_available()
    try:
        forward = build_forward(params, jnp.bfloat16 if use_bf16 else jnp.float32)
        logits = jax.block_until_ready(forward(x))
    except Exception:
        if not use_bf16:
            raise
        # bf16 compute path failed to lower on this TPU / jax version: fall back to f32.
        use_bf16 = False
        forward = build_forward(params, jnp.float32)
        logits = jax.block_until_ready(forward(x))

    assert logits.shape == (B, NUM_CLASSES, H, W), logits.shape

    ref = reference_forward(params, x)
    err = float(jnp.max(jnp.abs(logits - ref)))
    tol = 3e-2 if use_bf16 else 1e-4
    assert err < tol, f"max abs err {err} (bf16={use_bf16})"

    print("KERNEL_OK")
</pallas_src>

<mosaic_0001>
module attributes {stable_mosaic.version = 11 : i64} {
  func.func @seg_head_kernel(%arg0: i32, %arg1: i32, %arg2: memref<1x4x2x128xf32, #tpu.memory_space<vmem>>, %arg3: memref<4x32xf32, #tpu.memory_space<smem>>, %arg4: memref<32xf32, #tpu.memory_space<smem>>, %arg5: memref<32x4xf32, #tpu.memory_space<smem>>, %arg6: memref<4xf32, #tpu.memory_space<smem>>, %arg7: memref<1x4x2x128xf32, #tpu.memory_space<vmem>>) attributes {dimension_semantics = [#tpu.dimension_semantics<parallel>, #tpu.dimension_semantics<parallel>], iteration_bounds = array<i64: 2, 1>, scalar_prefetch = 0 : i64, scratch_operands = 0 : i64, tpu.core_type = #tpu.core_type<tc>, window_params = [{transform_indices = @transform_0, window_bounds = array<i64: 1, 4, 2, 128>}, {transform_indices = @transform_1, window_bounds = array<i64: 4, 32>}, {transform_indices = @transform_2, window_bounds = array<i64: 32>}, {transform_indices = @transform_3, window_bounds = array<i64: 32, 4>}, {transform_indices = @transform_4, window_bounds = array<i64: 4>}, {transform_indices = @transform_5, window_bounds = array<i64: 1, 4, 2, 128>}]} {
    %c0 = arith.constant 0 : index
    %c0_0 = arith.constant 0 : index
    %0 = memref.load %arg3[%c0, %c0_0] : memref<4x32xf32, #tpu.memory_space<smem>>
    %c0_1 = arith.constant 0 : index
    %c1 = arith.constant 1 : index
    %1 = memref.load %arg3[%c0_1, %c1] : memref<4x32xf32, #tpu.memory_space<smem>>
    %c0_2 = arith.constant 0 : index
    %c2 = arith.constant 2 : index
    %2 = memref.load %arg3[%c0_2, %c2] : memref<4x32xf32, #tpu.memory_space<smem>>
    %c0_3 = arith.constant 0 : index
    %c3 = arith.constant 3 : index
    %3 = memref.load %arg3[%c0_3, %c3] : memref<4x32xf32, #tpu.memory_space<smem>>
    %c0_4 = arith.constant 0 : index
    %c4 = arith.constant 4 : index
    %4 = memref.load %arg3[%c0_4, %c4] : memref<4x32xf32, #tpu.memory_space<smem>>
    %c0_5 = arith.constant 0 : index
    %c5 = arith.constant 5 : index
    %5 = memref.load %arg3[%c0_5, %c5] : memref<4x32xf32, #tpu.memory_space<smem>>
    %c0_6 = arith.constant 0 : index
    %c6 = arith.constant 6 : index
    %6 = memref.load %arg3[%c0_6, %c6] : memref<4x32xf32, #tpu.memory_space<smem>>
    %c0_7 = arith.constant 0 : index
    %c7 = arith.constant 7 : index
    %7 = memref.load %arg3[%c0_7, %c7] : memref<4x32xf32, #tpu.memory_space<smem>>
    %c0_8 = arith.constant 0 : index
    %c8 = arith.constant 8 : index
    %8 = memref.load %arg3[%c0_8, %c8] : memref<4x32xf32, #tpu.memory_space<smem>>
    %c0_9 = arith.constant 0 : index
    %c9 = arith.constant 9 : index
    %9 = memref.load %arg3[%c0_9, %c9] : memref<4x32xf32, #tpu.memory_space<smem>>
    %c0_10 = arith.constant 0 : index
    %c10 = arith.constant 10 : index
    %10 = memref.load %arg3[%c0_10, %c10] : memref<4x32xf32, #tpu.memory_space<smem>>
    %c0_11 = arith.constant 0 : index
    %c11 = arith.constant 11 : index
    %11 = memref.load %arg3[%c0_11, %c11] : memref<4x32xf32, #tpu.memory_space<smem>>
    %c0_12 = arith.constant 0 : index
    %c12 = arith.constant 12 : index
    %12 = memref.load %arg3[%c0_12, %c12] : memref<4x32xf32, #tpu.memory_space<smem>>
    %c0_13 = arith.constant 0 : index
    %c13 = arith.constant 13 : index
    %13 = memref.load %arg3[%c0_13, %c13] : memref<4x32xf32, #tpu.memory_space<smem>>
    %c0_14 = arith.constant 0 : index
    %c14 = arith.constant 14 : index
    %14 = memref.load %arg3[%c0_14, %c14] : memref<4x32xf32, #tpu.memory_space<smem>>
    %c0_15 = arith.constant 0 : index
    %c15 = arith.constant 15 : index
    %15 = memref.load %arg3[%c0_15, %c15] : memref<4x32xf32, #tpu.memory_space<smem>>
    %c0_16 = arith.constant 0 : index
    %c16 = arith.constant 16 : index
    %16 = memref.load %arg3[%c0_16, %c16] : memref<4x32xf32, #tpu.memory_space<smem>>
    %c0_17 = arith.constant 0 : index
    %c17 = arith.constant 17 : index
    %17 = memref.load %arg3[%c0_17, %c17] : memref<4x32xf32, #tpu.memory_space<smem>>
    %c0_18 = arith.constant 0 : index
    %c18 = arith.constant 18 : index
    %18 = memref.load %arg3[%c0_18, %c18] : memref<4x32xf32, #tpu.memory_space<smem>>
    %c0_19 = arith.constant 0 : index
    %c19 = arith.constant 19 : index
    %19 = memref.load %arg3[%c0_19, %c19] : memref<4x32xf32, #tpu.memory_space<smem>>
    %c0_20 = arith.constant 0 : index
    %c20 = arith.constant 20 : index
    %20 = memref.load %arg3[%c0_20, %c20] : memref<4x32xf32, #tpu.memory_space<smem>>
    %c0_21 = arith.constant 0 : index
    %c21 = arith.constant 21 : index
    %21 = memref.load %arg3[%c0_21, %c21] : memref<4x32xf32, #tpu.memory_space<smem>>
    %c0_22 = arith.constant 0 : index
    %c22 = arith.constant 22 : index
    %22 = memref.load %arg3[%c0_22, %c22] : memref<4x32xf32, #tpu.memory_space<smem>>
    %c0_23 = arith.constant 0 : index
    %c23 = arith.constant 23 : index
    %23 = memref.load %arg3[%c0_23, %c23] : memref<4x32xf32, #tpu.memory_space<smem>>
    %c0_24 = arith.constant 0 : index
    %c24 = arith.constant 24 : index
    %24 = memref.load %arg3[%c0_24, %c24] : memref<4x32xf32, #tpu.memory_space<smem>>
    %c0_25 = arith.constant 0 : index
    %c25 = arith.constant 25 : index
    %25 = memref.load %arg3[%c0_25, %c25] : memref<4x32xf32, #tpu.memory_space<smem>>
    %c0_26 = arith.constant 0 : index
    %c26 = arith.constant 26 : index
    %26 = memref.load %arg3[%c0_26, %c26] : memref<4x32xf32, #tpu.memory_space<smem>>
    %c0_27 = arith.constant 0 : index
    %c27 = arith.constant 27 : index
    %27 = memref.load %arg3[%c0_27, %c27] : memref<4x32xf32, #tpu.memory_space<smem>>
    %c0_28 = arith.constant 0 : index
    %c28 = arith.constant 28 : index
    %28 = memref.load %arg3[%c0_28, %c28] : memref<4x32xf32, #tpu.memory_space<smem>>
    %c0_29 = arith.constant 0 : index
    %c29 = arith.constant 29 : index
    %29 = memref.load %arg3[%c0_29, %c29] : memref<4x32xf32, #tpu.memory_space<smem>>
    %c0_30 = arith.constant 0 : index
    %c30 = arith.constant 30 : index
    %30 = memref.load %arg3[%c0_30, %c30] : memref<4x32xf32, #tpu.memory_space<smem>>
    %c0_31 = arith.constant 0 : index
    %c31 = arith.constant 31 : index
    %31 = memref.load %arg3[%c0_31, %c31] : memref<4x32xf32, #tpu.memory_space<smem>>
    %c1_32 = arith.constant 1 : index
    %c0_33 = arith.constant 0 : index
    %32 = memref.load %arg3[%c1_32, %c0_33] : memref<4x32xf32, #tpu.memory_space<smem>>
    %c1_34 = arith.constant 1 : index
    %c1_35 = arith.constant 1 : index
    %33 = memref.load %arg3[%c1_34, %c1_35] : memref<4x32xf32, #tpu.memory_space<smem>>
    %c1_36 = arith.constant 1 : index
    %c2_37 = arith.constant 2 : index
    %34 = memref.load %arg3[%c1_36, %c2_37] : memref<4x32xf32, #tpu.memory_space<smem>>
    %c1_38 = arith.constant 1 : index
    %c3_39 = arith.constant 3 : index
    %35 = memref.load %arg3[%c1_38, %c3_39] : memref<4x32xf32, #tpu.memory_space<smem>>
    %c1_40 = arith.constant 1 : index
    %c4_41 = arith.constant 4 : index
    %36 = memref.load %arg3[%c1_40, %c4_41] : memref<4x32xf32, #tpu.memory_space<smem>>
    %c1_42 = arith.constant 1 : index
    %c5_43 = arith.constant 5 : index
    %37 = memref.load %arg3[%c1_42, %c5_43] : memref<4x32xf32, #tpu.memory_space<smem>>
    %c1_44 = arith.constant 1 : index
    %c6_45 = arith.constant 6 : index
    %38 = memref.load %arg3[%c1_44, %c6_45] : memref<4x32xf32, #tpu.memory_space<smem>>
    %c1_46 = arith.constant 1 : index
    %c7_47 = arith.constant 7 : index
    %39 = memref.load %arg3[%c1_46, %c7_47] : memref<4x32xf32, #tpu.memory_space<smem>>
    %c1_48 = arith.constant 1 : index
    %c8_49 = arith.constant 8 : index
    %40 = memref.load %arg3[%c1_48, %c8_49] : memref<4x32xf32, #tpu.memory_space<smem>>
    %c1_50 = arith.constant 1 : index
    %c9_51 = arith.constant 9 : index
    %41 = memref.load %arg3[%c1_50, %c9_51] : memref<4x32xf32, #tpu.memory_space<smem>>
    %c1_52 = arith.constant 1 : index
    %c10_53 = arith.constant 10 : index
    %42 = memref.load %arg3[%c1_52, %c10_53] : memref<4x32xf32, #tpu.memory_space<smem>>
    %c1_54 = arith.constant 1 : index
    %c11_55 = arith.constant 11 : index
    %43 = memref.load %arg3[%c1_54, %c11_55] : memref<4x32xf32, #tpu.memory_space<smem>>
    %c1_56 = arith.constant 1 : index
    %c12_57 = arith.constant 12 : index
    %44 = memref.load %arg3[%c1_56, %c12_57] : memref<4x32xf32, #tpu.memory_space<smem>>
    %c1_58 = arith.constant 1 : index
    %c13_59 = arith.constant 13 : index
    %45 = memref.load %arg3[%c1_58, %c13_59] : memref<4x32xf32, #tpu.memory_space<smem>>
    %c1_60 = arith.constant 1 : index
    %c14_61 = arith.constant 14 : index
    %46 = memref.load %arg3[%c1_60, %c14_61] : memref<4x32xf32, #tpu.memory_space<smem>>
    %c1_62 = arith.constant 1 : index
    %c15_63 = arith.constant 15 : index
    %47 = memref.load %arg3[%c1_62, %c15_63] : memref<4x32xf32, #tpu.memory_space<smem>>
    %c1_64 = arith.constant 1 : index
    %c16_65 = arith.constant 16 : index
    %48 = memref.load %arg3[%c1_64, %c16_65] : memref<4x32xf32, #tpu.memory_space<smem>>
    %c1_66 = arith.constant 1 : index
    %c17_67 = arith.constant 17 : index
    %49 = memref.load %arg3[%c1_66, %c17_67] : memref<4x32xf32, #tpu.memory_space<smem>>
    %c1_68 = arith.constant 1 : index
    %c18_69 = arith.constant 18 : index
    %50 = memref.load %arg3[%c1_68, %c18_69] : memref<4x32xf32, #tpu.memory_space<smem>>
    %c1_70 = arith.constant 1 : index
    %c19_71 = arith.constant 19 : index
    %51 = memref.load %arg3[%c1_70, %c19_71] : memref<4x32xf32, #tpu.memory_space<smem>>
    %c1_72 = arith.constant 1 : index
    %c20_73 = arith.constant 20 : index
    %52 = memref.load %arg3[%c1_72, %c20_73] : memref<4x32xf32, #tpu.memory_space<smem>>
    %c1_74 = arith.constant 1 : index
    %c21_75 = arith.constant 21 : index
    %53 = memref.load %arg3[%c1_74, %c21_75] : memref<4x32xf32, #tpu.memory_space<smem>>
    %c1_76 = arith.constant 1 : index
    %c22_77 = arith.constant 22 : index
    %54 = memref.load %arg3[%c1_76, %c22_77] : memref<4x32xf32, #tpu.memory_space<smem>>
    %c1_78 = arith.constant 1 : index
    %c23_79 = arith.constant 23 : index
    %55 = memref.load %arg3[%c1_78, %c23_79] : memref<4x32xf32, #tpu.memory_space<smem>>
    %c1_80 = arith.constant 1 : index
    %c24_81 = arith.constant 24 : index
    %56 = memref.load %arg3[%c1_80, %c24_81] : memref<4x32xf32, #tpu.memory_space<smem>>
    %c1_82 = arith.constant 1 : index
    %c25_83 = arith.constant 25 : index
    %57 = memref.load %arg3[%c1_82, %c25_83] : memref<4x32xf32, #tpu.memory_space<smem>>
    %c1_84 = arith.constant 1 : index
    %c26_85 = arith.constant 26 : index
    %58 = memref.load %arg3[%c1_84, %c26_85] : memref<4x32xf32, #tpu.memory_space<smem>>
    %c1_86 = arith.constant 1 : index
    %c27_87 = arith.constant 27 : index
    %59 = memref.load %arg3[%c1_86, %c27_87] : memref<4x32xf32, #tpu.memory_space<smem>>
    %c1_88 = arith.constant 1 : index
    %c28_89 = arith.constant 28 : index
    %60 = memref.load %arg3[%c1_88, %c28_89] : memref<4x32xf32, #tpu.memory_space<smem>>
    %c1_90 = arith.constant 1 : index
    %c29_91 = arith.constant 29 : index
    %61 = memref.load %arg3[%c1_90, %c29_91] : memref<4x32xf32, #tpu.memory_space<smem>>
    %c1_92 = arith.constant 1 : index
    %c30_93 = arith.constant 30 : index
    %62 = memref.load %arg3[%c1_92, %c30_93] : memref<4x32xf32, #tpu.memory_space<smem>>
    %c1_94 = arith.constant 1 : index
    %c31_95 = arith.constant 31 : index
    %63 = memref.load %arg3[%c1_94, %c31_95] : memref<4x32xf32, #tpu.memory_space<smem>>
    %c2_96 = arith.constant 2 : index
    %c0_97 = arith.constant 0 : index
    %64 = memref.load %arg3[%c2_96, %c0_97] : memref<4x32xf32, #tpu.memory_space<smem>>
    %c2_98 = arith.constant 2 : index
    %c1_99 = arith.constant 1 : index
    %65 = memref.load %arg3[%c2_98, %c1_99] : memref<4x32xf32, #tpu.memory_space<smem>>
    %c2_100 = arith.constant 2 : index
    %c2_101 = arith.constant 2 : index
    %66 = memref.load %arg3[%c2_100, %c2_101] : memref<4x32xf32, #tpu.memory_space<smem>>
    %c2_102 = arith.constant 2 : index
    %c3_103 = arith.constant 3 : index
    %67 = memref.load %arg3[%c2_102, %c3_103] : memref<4x32xf32, #tpu.memory_space<smem>>
    %c2_104 = arith.constant 2 : index
    %c4_105 = arith.constant 4 : index
    %68 = memref.load %arg3[%c2_104, %c4_105] : memref<4x32xf32, #tpu.memory_space<smem>>
    %c2_106 = arith.constant 2 : index
    %c5_107 = arith.constant 5 : index
    %69 = memref.load %arg3[%c2_106, %c5_107] : memref<4x32xf32, #tpu.memory_space<smem>>
    %c2_108 = arith.constant 2 : index
    %c6_109 = arith.constant 6 : index
    %70 = memref.load %arg3[%c2_108, %c6_109] : memref<4x32xf32, #tpu.memory_space<smem>>
    %c2_110 = arith.constant 2 : index
    %c7_111 = arith.constant 7 : index
    %71 = memref.load %arg3[%c2_110, %c7_111] : memref<4x32xf32, #tpu.memory_space<smem>>
    %c2_112 = arith.constant 2 : index
    %c8_113 = arith.constant 8 : index
    %72 = memref.load %arg3[%c2_112, %c8_113] : memref<4x32xf32, #tpu.memory_space<smem>>
    %c2_114 = arith.constant 2 : index
    %c9_115 = arith.constant 9 : index
    %73 = memref.load %arg3[%c2_114, %c9_115] : memref<4x32xf32, #tpu.memory_space<smem>>
    %c2_116 = arith.constant 2 : index
    %c10_117 = arith.constant 10 : index
    %74 = memref.load %arg3[%c2_116, %c10_117] : memref<4x32xf32, #tpu.memory_space<smem>>
    %c2_118 = arith.constant 2 : index
    %c11_119 = arith.constant 11 : index
    %75 = memref.load %arg3[%c2_118, %c11_119] : memref<4x32xf32, #tpu.memory_space<smem>>
    %c2_120 = arith.constant 2 : index
    %c12_121 = arith.constant 12 : index
    %76 = memref.load %arg3[%c2_120, %c12_121] : memref<4x32xf32, #tpu.memory_space<smem>>
    %c2_122 = arith.constant 2 : index
    %c13_123 = arith.constant 13 : index
    %77 = memref.load %arg3[%c2_122, %c13_123] : memref<4x32xf32, #tpu.memory_space<smem>>
    %c2_124 = arith.constant 2 : index
    %c14_125 = arith.constant 14 : index
    %78 = memref.load %arg3[%c2_124, %c14_125] : memref<4x32xf32, #tpu.memory_space<smem>>
    %c2_126 = arith.constant 2 : index
    %c15_127 = arith.constant 15 : index
    %79 = memref.load %arg3[%c2_126, %c15_127] : memref<4x32xf32, #tpu.memory_space<smem>>
    %c2_128 = arith.constant 2 : index
    %c16_129 = arith.constant 16 : index
    %80 = memref.load %arg3[%c2_128, %c16_129] : memref<4x32xf32, #tpu.memory_space<smem>>
    %c2_130 = arith.constant 2 : index
    %c17_131 = arith.constant 17 : index
    %81 = memref.load %arg3[%c2_130, %c17_131] : memref<4x32xf32, #tpu.memory_space<smem>>
    %c2_132 = arith.constant 2 : index
    %c18_133 = arith.constant 18 : index
    %82 = memref.load %arg3[%c2_132, %c18_133] : memref<4x32xf32, #tpu.memory_space<smem>>
    %c2_134 = arith.constant 2 : index
    %c19_135 = arith.constant 19 : index
    %83 = memref.load %arg3[%c2_134, %c19_135] : memref<4x32xf32, #tpu.memory_space<smem>>
    %c2_136 = arith.constant 2 : index
    %c20_137 = arith.constant 20 : index
    %84 = memref.load %arg3[%c2_136, %c20_137] : memref<4x32xf32, #tpu.memory_space<smem>>
    %c2_138 = arith.constant 2 : index
    %c21_139 = arith.constant 21 : index
    %85 = memref.load %arg3[%c2_138, %c21_139] : memref<4x32xf32, #tpu.memory_space<smem>>
    %c2_140 = arith.constant 2 : index
    %c22_141 = arith.constant 22 : index
    %86 = memref.load %arg3[%c2_140, %c22_141] : memref<4x32xf32, #tpu.memory_space<smem>>
    %c2_142 = arith.constant 2 : index
    %c23_143 = arith.constant 23 : index
    %87 = memref.load %arg3[%c2_142, %c23_143] : memref<4x32xf32, #tpu.memory_space<smem>>
    %c2_144 = arith.constant 2 : index
    %c24_145 = arith.constant 24 : index
    %88 = memref.load %arg3[%c2_144, %c24_145] : memref<4x32xf32, #tpu.memory_space<smem>>
    %c2_146 = arith.constant 2 : index
    %c25_147 = arith.constant 25 : index
    %89 = memref.load %arg3[%c2_146, %c25_147] : memref<4x32xf32, #tpu.memory_space<smem>>
    %c2_148 = arith.constant 2 : index
    %c26_149 = arith.constant 26 : index
    %90 = memref.load %arg3[%c2_148, %c26_149] : memref<4x32xf32, #tpu.memory_space<smem>>
    %c2_150 = arith.constant 2 : index
    %c27_151 = arith.constant 27 : index
    %91 = memref.load %arg3[%c2_150, %c27_151] : memref<4x32xf32, #tpu.memory_space<smem>>
    %c2_152 = arith.constant 2 : index
    %c28_153 = arith.constant 28 : index
    %92 = memref.load %arg3[%c2_152, %c28_153] : memref<4x32xf32, #tpu.memory_space<smem>>
    %c2_154 = arith.constant 2 : index
    %c29_155 = arith.constant 29 : index
    %93 = memref.load %arg3[%c2_154, %c29_155] : memref<4x32xf32, #tpu.memory_space<smem>>
    %c2_156 = arith.constant 2 : index
    %c30_157 = arith.constant 30 : index
    %94 = memref.load %arg3[%c2_156, %c30_157] : memref<4x32xf32, #tpu.memory_space<smem>>
    %c2_158 = arith.constant 2 : index
    %c31_159 = arith.constant 31 : index
    %95 = memref.load %arg3[%c2_158, %c31_159] : memref<4x32xf32, #tpu.memory_space<smem>>
    %c3_160 = arith.constant 3 : index
    %c0_161 = arith.constant 0 : index
    %96 = memref.load %arg3[%c3_160, %c0_161] : memref<4x32xf32, #tpu.memory_space<smem>>
    %c3_162 = arith.constant 3 : index
    %c1_163 = arith.constant 1 : index
    %97 = memref.load %arg3[%c3_162, %c1_163] : memref<4x32xf32, #tpu.memory_space<smem>>
    %c3_164 = arith.constant 3 : index
    %c2_165 = arith.constant 2 : index
    %98 = memref.load %arg3[%c3_164, %c2_165] : memref<4x32xf32, #tpu.memory_space<smem>>
    %c3_166 = arith.constant 3 : index
    %c3_167 = arith.constant 3 : index
    %99 = memref.load %arg3[%c3_166, %c3_167] : memref<4x32xf32, #tpu.memory_space<smem>>
    %c3_168 = arith.constant 3 : index
    %c4_169 = arith.constant 4 : index
    %100 = memref.load %arg3[%c3_168, %c4_169] : memref<4x32xf32, #tpu.memory_space<smem>>
    %c3_170 = arith.constant 3 : index
    %c5_171 = arith.constant 5 : index
    %101 = memref.load %arg3[%c3_170, %c5_171] : memref<4x32xf32, #tpu.memory_space<smem>>
    %c3_172 = arith.constant 3 : index
    %c6_173 = arith.constant 6 : index
    %102 = memref.load %arg3[%c3_172, %c6_173] : memref<4x32xf32, #tpu.memory_space<smem>>
    %c3_174 = arith.constant 3 : index
    %c7_175 = arith.constant 7 : index
    %103 = memref.load %arg3[%c3_174, %c7_175] : memref<4x32xf32, #tpu.memory_space<smem>>
    %c3_176 = arith.constant 3 : index
    %c8_177 = arith.constant 8 : index
    %104 = memref.load %arg3[%c3_176, %c8_177] : memref<4x32xf32, #tpu.memory_space<smem>>
    %c3_178 = arith.constant 3 : index
    %c9_179 = arith.constant 9 : index
    %105 = memref.load %arg3[%c3_178, %c9_179] : memref<4x32xf32, #tpu.memory_space<smem>>
    %c3_180 = arith.constant 3 : index
    %c10_181 = arith.constant 10 : index
    %106 = memref.load %arg3[%c3_180, %c10_181] : memref<4x32xf32, #tpu.memory_space<smem>>
    %c3_182 = arith.constant 3 : index
    %c11_183 = arith.constant 11 : index
    %107 = memref.load %arg3[%c3_182, %c11_183] : memref<4x32xf32, #tpu.memory_space<smem>>
    %c3_184 = arith.constant 3 : index
    %c12_185 = arith.constant 12 : index
    %108 = memref.load %arg3[%c3_184, %c12_185] : memref<4x32xf32, #tpu.memory_space<smem>>
    %c3_186 = arith.constant 3 : index
    %c13_187 = arith.constant 13 : index
    %109 = memref.load %arg3[%c3_186, %c13_187] : memref<4x32xf32, #tpu.memory_space<smem>>
    %c3_188 = arith.constant 3 : index
    %c14_189 = arith.constant 14 : index
    %110 = memref.load %arg3[%c3_188, %c14_189] : memref<4x32xf32, #tpu.memory_space<smem>>
    %c3_190 = arith.constant 3 : index
    %c15_191 = arith.constant 15 : index
    %111 = memref.load %arg3[%c3_190, %c15_191] : memref<4x32xf32, #tpu.memory_space<smem>>
    %c3_192 = arith.constant 3 : index
    %c16_193 = arith.constant 16 : index
    %112 = memref.load %arg3[%c3_192, %c16_193] : memref<4x32xf32, #tpu.memory_space<smem>>
    %c3_194 = arith.constant 3 : index
    %c17_195 = arith.constant 17 : index
    %113 = memref.load %arg3[%c3_194, %c17_195] : memref<4x32xf32, #tpu.memory_space<smem>>
    %c3_196 = arith.constant 3 : index
    %c18_197 = arith.constant 18 : index
    %114 = memref.load %arg3[%c3_196, %c18_197] : memref<4x32xf32, #tpu.memory_space<smem>>
    %c3_198 = arith.constant 3 : index
    %c19_199 = arith.constant 19 : index
    %115 = memref.load %arg3[%c3_198, %c19_199] : memref<4x32xf32, #tpu.memory_space<smem>>
    %c3_200 = arith.constant 3 : index
    %c20_201 = arith.constant 20 : index
    %116 = memref.load %arg3[%c3_200, %c20_201] : memref<4x32xf32, #tpu.memory_space<smem>>
    %c3_202 = arith.constant 3 : index
    %c21_203 = arith.constant 21 : index
    %117 = memref.load %arg3[%c3_202, %c21_203] : memref<4x32xf32, #tpu.memory_space<smem>>
    %c3_204 = arith.constant 3 : index
    %c22_205 = arith.constant 22 : index
    %118 = memref.load %arg3[%c3_204, %c22_205] : memref<4x32xf32, #tpu.memory_space<smem>>
    %c3_206 = arith.constant 3 : index
    %c23_207 = arith.constant 23 : index
    %119 = memref.load %arg3[%c3_206, %c23_207] : memref<4x32xf32, #tpu.memory_space<smem>>
    %c3_208 = arith.constant 3 : index
    %c24_209 = arith.constant 24 : index
    %120 = memref.load %arg3[%c3_208, %c24_209] : memref<4x32xf32, #tpu.memory_space<smem>>
    %c3_210 = arith.constant 3 : index
    %c25_211 = arith.constant 25 : index
    %121 = memref.load %arg3[%c3_210, %c25_211] : memref<4x32xf32, #tpu.memory_space<smem>>
    %c3_212 = arith.constant 3 : index
    %c26_213 = arith.constant 26 : index
    %122 = memref.load %arg3[%c3_212, %c26_213] : memref<4x32xf32, #tpu.memory_space<smem>>
    %c3_214 = arith.constant 3 : index
    %c27_215 = arith.constant 27 : index
    %123 = memref.load %arg3[%c3_214, %c27_215] : memref<4x32xf32, #tpu.memory_space<smem>>
    %c3_216 = arith.constant 3 : index
    %c28_217 = arith.constant 28 : index
    %124 = memref.load %arg3[%c3_216, %c28_217] : memref<4x32xf32, #tpu.memory_space<smem>>
    %c3_218 = arith.constant 3 : index
    %c29_219 = arith.constant 29 : index
    %125 = memref.load %arg3[%c3_218, %c29_219] : memref<4x32xf32, #tpu.memory_space<smem>>
    %c3_220 = arith.constant 3 : index
    %c30_221 = arith.constant 30 : index
    %126 = memref.load %arg3[%c3_220, %c30_221] : memref<4x32xf32, #tpu.memory_space<smem>>
    %c3_222 = arith.constant 3 : index
    %c31_223 = arith.constant 31 : index
    %127 = memref.load %arg3[%c3_222, %c31_223] : memref<4x32xf32, #tpu.memory_space<smem>>
    %c0_224 = arith.constant 0 : index
    %128 = memref.load %arg4[%c0_224] : memref<32xf32, #tpu.memory_space<smem>>
    %c1_225 = arith.constant 1 : index
    %129 = memref.load %arg4[%c1_225] : memref<32xf32, #tpu.memory_space<smem>>
    %c2_226 = arith.constant 2 : index
    %130 = memref.load %arg4[%c2_226] : memref<32xf32, #tpu.memory_space<smem>>
    %c3_227 = arith.constant 3 : index
    %131 = memref.load %arg4[%c3_227] : memref<32xf32, #tpu.memory_space<smem>>
    %c4_228 = arith.constant 4 : index
    %132 = memref.load %arg4[%c4_228] : memref<32xf32, #tpu.memory_space<smem>>
    %c5_229 = arith.constant 5 : index
    %133 = memref.load %arg4[%c5_229] : memref<32xf32, #tpu.memory_space<smem>>
    %c6_230 = arith.constant 6 : index
    %134 = memref.load %arg4[%c6_230] : memref<32xf32, #tpu.memory_space<smem>>
    %c7_231 = arith.constant 7 : index
    %135 = memref.load %arg4[%c7_231] : memref<32xf32, #tpu.memory_space<smem>>
    %c8_232 = arith.constant 8 : index
    %136 = memref.load %arg4[%c8_232] : memref<32xf32, #tpu.memory_space<smem>>
    %c9_233 = arith.constant 9 : index
    %137 = memref.load %arg4[%c9_233] : memref<32xf32, #tpu.memory_space<smem>>
    %c10_234 = arith.constant 10 : index
    %138 = memref.load %arg4[%c10_234] : memref<32xf32, #tpu.memory_space<smem>>
    %c11_235 = arith.constant 11 : index
    %139 = memref.load %arg4[%c11_235] : memref<32xf32, #tpu.memory_space<smem>>
    %c12_236 = arith.constant 12 : index
    %140 = memref.load %arg4[%c12_236] : memref<32xf32, #tpu.memory_space<smem>>
    %c13_237 = arith.constant 13 : index
    %141 = memref.load %arg4[%c13_237] : memref<32xf32, #tpu.memory_space<smem>>
    %c14_238 = arith.constant 14 : index
    %142 = memref.load %arg4[%c14_238] : memref<32xf32, #tpu.memory_space<smem>>
    %c15_239 = arith.constant 15 : index
    %143 = memref.load %arg4[%c15_239] : memref<32xf32, #tpu.memory_space<smem>>
    %c16_240 = arith.constant 16 : index
    %144 = memref.load %arg4[%c16_240] : memref<32xf32, #tpu.memory_space<smem>>
    %c17_241 = arith.constant 17 : index
    %145 = memref.load %arg4[%c17_241] : memref<32xf32, #tpu.memory_space<smem>>
    %c18_242 = arith.constant 18 : index
    %146 = memref.load %arg4[%c18_242] : memref<32xf32, #tpu.memory_space<smem>>
    %c19_243 = arith.constant 19 : index
    %147 = memref.load %arg4[%c19_243] : memref<32xf32, #tpu.memory_space<smem>>
    %c20_244 = arith.constant 20 : index
    %148 = memref.load %arg4[%c20_244] : memref<32xf32, #tpu.memory_space<smem>>
    %c21_245 = arith.constant 21 : index
    %149 = memref.load %arg4[%c21_245] : memref<32xf32, #tpu.memory_space<smem>>
    %c22_246 = arith.constant 22 : index
    %150 = memref.load %arg4[%c22_246] : memref<32xf32, #tpu.memory_space<smem>>
    %c23_247 = arith.constant 23 : index
    %151 = memref.load %arg4[%c23_247] : memref<32xf32, #tpu.memory_space<smem>>
    %c24_248 = arith.constant 24 : index
    %152 = memref.load %arg4[%c24_248] : memref<32xf32, #tpu.memory_space<smem>>
    %c25_249 = arith.constant 25 : index
    %153 = memref.load %arg4[%c25_249] : memref<32xf32, #tpu.memory_space<smem>>
    %c26_250 = arith.constant 26 : index
    %154 = memref.load %arg4[%c26_250] : memref<32xf32, #tpu.memory_space<smem>>
    %c27_251 = arith.constant 27 : index
    %155 = memref.load %arg4[%c27_251] : memref<32xf32, #tpu.memory_space<smem>>
    %c28_252 = arith.constant 28 : index
    %156 = memref.load %arg4[%c28_252] : memref<32xf32, #tpu.memory_space<smem>>
    %c29_253 = arith.constant 29 : index
    %157 = memref.load %arg4[%c29_253] : memref<32xf32, #tpu.memory_space<smem>>
    %c30_254 = arith.constant 30 : index
    %158 = memref.load %arg4[%c30_254] : memref<32xf32, #tpu.memory_space<smem>>
    %c31_255 = arith.constant 31 : index
    %159 = memref.load %arg4[%c31_255] : memref<32xf32, #tpu.memory_space<smem>>
    %c0_256 = arith.constant 0 : index
    %c0_257 = arith.constant 0 : index
    %160 = memref.load %arg5[%c0_256, %c0_257] : memref<32x4xf32, #tpu.memory_space<smem>>
    %c0_258 = arith.constant 0 : index
    %c1_259 = arith.constant 1 : index
    %161 = memref.load %arg5[%c0_258, %c1_259] : memref<32x4xf32, #tpu.memory_space<smem>>
    %c0_260 = arith.constant 0 : index
    %c2_261 = arith.constant 2 : index
    %162 = memref.load %arg5[%c0_260, %c2_261] : memref<32x4xf32, #tpu.memory_space<smem>>
    %c0_262 = arith.constant 0 : index
    %c3_263 = arith.constant 3 : index
    %163 = memref.load %arg5[%c0_262, %c3_263] : memref<32x4xf32, #tpu.memory_space<smem>>
    %c1_264 = arith.constant 1 : index
    %c0_265 = arith.constant 0 : index
    %164 = memref.load %arg5[%c1_264, %c0_265] : memref<32x4xf32, #tpu.memory_space<smem>>
    %c1_266 = arith.constant 1 : index
    %c1_267 = arith.constant 1 : index
    %165 = memref.load %arg5[%c1_266, %c1_267] : memref<32x4xf32, #tpu.memory_space<smem>>
    %c1_268 = arith.constant 1 : index
    %c2_269 = arith.constant 2 : index
    %166 = memref.load %arg5[%c1_268, %c2_269] : memref<32x4xf32, #tpu.memory_space<smem>>
    %c1_270 = arith.constant 1 : index
    %c3_271 = arith.constant 3 : index
    %167 = memref.load %arg5[%c1_270, %c3_271] : memref<32x4xf32, #tpu.memory_space<smem>>
    %c2_272 = arith.constant 2 : index
    %c0_273 = arith.constant 0 : index
    %168 = memref.load %arg5[%c2_272, %c0_273] : memref<32x4xf32, #tpu.memory_space<smem>>
    %c2_274 = arith.constant 2 : index
    %c1_275 = arith.constant 1 : index
    %169 = memref.load %arg5[%c2_274, %c1_275] : memref<32x4xf32, #tpu.memory_space<smem>>
    %c2_276 = arith.constant 2 : index
    %c2_277 = arith.constant 2 : index
    %170 = memref.load %arg5[%c2_276, %c2_277] : memref<32x4xf32, #tpu.memory_space<smem>>
    %c2_278 = arith.constant 2 : index
    %c3_279 = arith.constant 3 : index
    %171 = memref.load %arg5[%c2_278, %c3_279] : memref<32x4xf32, #tpu.memory_space<smem>>
    %c3_280 = arith.constant 3 : index
    %c0_281 = arith.constant 0 : index
    %172 = memref.load %arg5[%c3_280, %c0_281] : memref<32x4xf32, #tpu.memory_space<smem>>
    %c3_282 = arith.constant 3 : index
    %c1_283 = arith.constant 1 : index
    %173 = memref.load %arg5[%c3_282, %c1_283] : memref<32x4xf32, #tpu.memory_space<smem>>
    %c3_284 = arith.constant 3 : index
    %c2_285 = arith.constant 2 : index
    %174 = memref.load %arg5[%c3_284, %c2_285] : memref<32x4xf32, #tpu.memory_space<smem>>
    %c3_286 = arith.constant 3 : index
    %c3_287 = arith.constant 3 : index
    %175 = memref.load %arg5[%c3_286, %c3_287] : memref<32x4xf32, #tpu.memory_space<smem>>
    %c4_288 = arith.constant 4 : index
    %c0_289 = arith.constant 0 : index
    %176 = memref.load %arg5[%c4_288, %c0_289] : memref<32x4xf32, #tpu.memory_space<smem>>
    %c4_290 = arith.constant 4 : index
    %c1_291 = arith.constant 1 : index
    %177 = memref.load %arg5[%c4_290, %c1_291] : memref<32x4xf32, #tpu.memory_space<smem>>
    %c4_292 = arith.constant 4 : index
    %c2_293 = arith.constant 2 : index
    %178 = memref.load %arg5[%c4_292, %c2_293] : memref<32x4xf32, #tpu.memory_space<smem>>
    %c4_294 = arith.constant 4 : index
    %c3_295 = arith.constant 3 : index
    %179 = memref.load %arg5[%c4_294, %c3_295] : memref<32x4xf32, #tpu.memory_space<smem>>
    %c5_296 = arith.constant 5 : index
    %c0_297 = arith.constant 0 : index
    %180 = memref.load %arg5[%c5_296, %c0_297] : memref<32x4xf32, #tpu.memory_space<smem>>
    %c5_298 = arith.constant 5 : index
    %c1_299 = arith.constant 1 : index
    %181 = memref.load %arg5[%c5_298, %c1_299] : memref<32x4xf32, #tpu.memory_space<smem>>
    %c5_300 = arith.constant 5 : index
    %c2_301 = arith.constant 2 : index
    %182 = memref.load %arg5[%c5_300, %c2_301] : memref<32x4xf32, #tpu.memory_space<smem>>
    %c5_302 = arith.constant 5 : index
    %c3_303 = arith.constant 3 : index
    %183 = memref.load %arg5[%c5_302, %c3_303] : memref<32x4xf32, #tpu.memory_space<smem>>
    %c6_304 = arith.constant 6 : index
    %c0_305 = arith.constant 0 : index
    %184 = memref.load %arg5[%c6_304, %c0_305] : memref<32x4xf32, #tpu.memory_space<smem>>
    %c6_306 = arith.constant 6 : index
    %c1_307 = arith.constant 1 : index
    %185 = memref.load %arg5[%c6_306, %c1_307] : memref<32x4xf32, #tpu.memory_space<smem>>
    %c6_308 = arith.constant 6 : index
    %c2_309 = arith.constant 2 : index
    %186 = memref.load %arg5[%c6_308, %c2_309] : memref<32x4xf32, #tpu.memory_space<smem>>
    %c6_310 = arith.constant 6 : index
    %c3_311 = arith.constant 3 : index
    %187 = memref.load %arg5[%c6_310, %c3_311] : memref<32x4xf32, #tpu.memory_space<smem>>
    %c7_312 = arith.constant 7 : index
    %c0_313 = arith.constant 0 : index
    %188 = memref.load %arg5[%c7_312, %c0_313] : memref<32x4xf32, #tpu.memory_space<smem>>
    %c7_314 = arith.constant 7 : index
    %c1_315 = arith.constant 1 : index
    %189 = memref.load %arg5[%c7_314, %c1_315] : memref<32x4xf32, #tpu.memory_space<smem>>
    %c7_316 = arith.constant 7 : index
    %c2_317 = arith.constant 2 : index
    %190 = memref.load %arg5[%c7_316, %c2_317] : memref<32x4xf32, #tpu.memory_space<smem>>
    %c7_318 = arith.constant 7 : index
    %c3_319 = arith.constant 3 : index
    %191 = memref.load %arg5[%c7_318, %c3_319] : memref<32x4xf32, #tpu.memory_space<smem>>
    %c8_320 = arith.constant 8 : index
    %c0_321 = arith.constant 0 : index
    %192 = memref.load %arg5[%c8_320, %c0_321] : memref<32x4xf32, #tpu.memory_space<smem>>
    %c8_322 = arith.constant 8 : index
    %c1_323 = arith.constant 1 : index
    %193 = memref.load %arg5[%c8_322, %c1_323] : memref<32x4xf32, #tpu.memory_space<smem>>
    %c8_324 = arith.constant 8 : index
    %c2_325 = arith.constant 2 : index
    %194 = memref.load %arg5[%c8_324, %c2_325] : memref<32x4xf32, #tpu.memory_space<smem>>
    %c8_326 = arith.constant 8 : index
    %c3_327 = arith.constant 3 : index
    %195 = memref.load %arg5[%c8_326, %c3_327] : memref<32x4xf32, #tpu.memory_space<smem>>
    %c9_328 = arith.constant 9 : index
    %c0_329 = arith.constant 0 : index
    %196 = memref.load %arg5[%c9_328, %c0_329] : memref<32x4xf32, #tpu.memory_space<smem>>
    %c9_330 = arith.constant 9 : index
    %c1_331 = arith.constant 1 : index
    %197 = memref.load %arg5[%c9_330, %c1_331] : memref<32x4xf32, #tpu.memory_space<smem>>
    %c9_332 = arith.constant 9 : index
    %c2_333 = arith.constant 2 : index
    %198 = memref.load %arg5[%c9_332, %c2_333] : memref<32x4xf32, #tpu.memory_space<smem>>
    %c9_334 = arith.constant 9 : index
    %c3_335 = arith.constant 3 : index
    %199 = memref.load %arg5[%c9_334, %c3_335] : memref<32x4xf32, #tpu.memory_space<smem>>
    %c10_336 = arith.constant 10 : index
    %c0_337 = arith.constant 0 : index
    %200 = memref.load %arg5[%c10_336, %c0_337] : memref<32x4xf32, #tpu.memory_space<smem>>
    %c10_338 = arith.constant 10 : index
    %c1_339 = arith.constant 1 : index
    %201 = memref.load %arg5[%c10_338, %c1_339] : memref<32x4xf32, #tpu.memory_space<smem>>
    %c10_340 = arith.constant 10 : index
    %c2_341 = arith.constant 2 : index
    %202 = memref.load %arg5[%c10_340, %c2_341] : memref<32x4xf32, #tpu.memory_space<smem>>
    %c10_342 = arith.constant 10 : index
    %c3_343 = arith.constant 3 : index
    %203 = memref.load %arg5[%c10_342, %c3_343] : memref<32x4xf32, #tpu.memory_space<smem>>
    %c11_344 = arith.constant 11 : index
    %c0_345 = arith.constant 0 : index
    %204 = memref.load %arg5[%c11_344, %c0_345] : memref<32x4xf32, #tpu.memory_space<smem>>
    %c11_346 = arith.constant 11 : index
    %c1_347 = arith.constant 1 : index
    %205 = memref.load %arg5[%c11_346, %c1_347] : memref<32x4xf32, #tpu.memory_space<smem>>
    %c11_348 = arith.constant 11 : index
    %c2_349 = arith.constant 2 : index
    %206 = memref.load %arg5[%c11_348, %c2_349] : memref<32x4xf32, #tpu.memory_space<smem>>
    %c11_350 = arith.constant 11 : index
    %c3_351 = arith.constant 3 : index
    %207 = memref.load %arg5[%c11_350, %c3_351] : memref<32x4xf32, #tpu.memory_space<smem>>
    %c12_352 = arith.constant 12 : index
    %c0_353 = arith.constant 0 : index
    %208 = memref.load %arg5[%c12_352, %c0_353] : memref<32x4xf32, #tpu.memory_space<smem>>
    %c12_354 = arith.constant 12 : index
    %c1_355 = arith.constant 1 : index
    %209 = memref.load %arg5[%c12_354, %c1_355] : memref<32x4xf32, #tpu.memory_space<smem>>
    %c12_356 = arith.constant 12 : index
    %c2_357 = arith.constant 2 : index
    %210 = memref.load %arg5[%c12_356, %c2_357] : memref<32x4xf32, #tpu.memory_space<smem>>
    %c12_358 = arith.constant 12 : index
    %c3_359 = arith.constant 3 : index
    %211 = memref.load %arg5[%c12_358, %c3_359] : memref<32x4xf32, #tpu.memory_space<smem>>
    %c13_360 = arith.constant 13 : index
    %c0_361 = arith.constant 0 : index
    %212 = memref.load %arg5[%c13_360, %c0_361] : memref<32x4xf32, #tpu.memory_space<smem>>
    %c13_362 = arith.constant 13 : index
    %c1_363 = arith.constant 1 : index
    %213 = memref.load %arg5[%c13_362, %c1_363] : memref<32x4xf32, #tpu.memory_space<smem>>
    %c13_364 = arith.constant 13 : index
    %c2_365 = arith.constant 2 : index
    %214 = memref.load %arg5[%c13_364, %c2_365] : memref<32x4xf32, #tpu.memory_space<smem>>
    %c13_366 = arith.constant 13 : index
    %c3_367 = arith.constant 3 : index
    %215 = memref.load %arg5[%c13_366, %c3_367] : memref<32x4xf32, #tpu.memory_space<smem>>
    %c14_368 = arith.constant 14 : index
    %c0_369 = arith.constant 0 : index
    %216 = memref.load %arg5[%c14_368, %c0_369] : memref<32x4xf32, #tpu.memory_space<smem>>
    %c14_370 = arith.constant 14 : index
    %c1_371 = arith.constant 1 : index
    %217 = memref.load %arg5[%c14_370, %c1_371] : memref<32x4xf32, #tpu.memory_space<smem>>
    %c14_372 = arith.constant 14 : index
    %c2_373 = arith.constant 2 : index
    %218 = memref.load %arg5[%c14_372, %c2_373] : memref<32x4xf32, #tpu.memory_space<smem>>
    %c14_374 = arith.constant 14 : index
    %c3_375 = arith.constant 3 : index
    %219 = memref.load %arg5[%c14_374, %c3_375] : memref<32x4xf32, #tpu.memory_space<smem>>
    %c15_376 = arith.constant 15 : index
    %c0_377 = arith.constant 0 : index
    %220 = memref.load %arg5[%c15_376, %c0_377] : memref<32x4xf32, #tpu.memory_space<smem>>
    %c15_378 = arith.constant 15 : index
    %c1_379 = arith.constant 1 : index
    %221 = memref.load %arg5[%c15_378, %c1_379] : memref<32x4xf32, #tpu.memory_space<smem>>
    %c15_380 = arith.constant 15 : index
    %c2_381 = arith.constant 2 : index
    %222 = memref.load %arg5[%c15_380, %c2_381] : memref<32x4xf32, #tpu.memory_space<smem>>
    %c15_382 = arith.constant 15 : index
    %c3_383 = arith.constant 3 : index
    %223 = memref.load %arg5[%c15_382, %c3_383] : memref<32x4xf32, #tpu.memory_space<smem>>
    %c16_384 = arith.constant 16 : index
    %c0_385 = arith.constant 0 : index
    %224 = memref.load %arg5[%c16_384, %c0_385] : memref<32x4xf32, #tpu.memory_space<smem>>
    %c16_386 = arith.constant 16 : index
    %c1_387 = arith.constant 1 : index
    %225 = memref.load %arg5[%c16_386, %c1_387] : memref<32x4xf32, #tpu.memory_space<smem>>
    %c16_388 = arith.constant 16 : index
    %c2_389 = arith.constant 2 : index
    %226 = memref.load %arg5[%c16_388, %c2_389] : memref<32x4xf32, #tpu.memory_space<smem>>
    %c16_390 = arith.constant 16 : index
    %c3_391 = arith.constant 3 : index
    %227 = memref.load %arg5[%c16_390, %c3_391] : memref<32x4xf32, #tpu.memory_space<smem>>
    %c17_392 = arith.constant 17 : index
    %c0_393 = arith.constant 0 : index
    %228 = memref.load %arg5[%c17_392, %c0_393] : memref<32x4xf32, #tpu.memory_space<smem>>
    %c17_394 = arith.constant 17 : index
    %c1_395 = arith.constant 1 : index
    %229 = memref.load %arg5[%c17_394, %c1_395] : memref<32x4xf32, #tpu.memory_space<smem>>
    %c17_396 = arith.constant 17 : index
    %c2_397 = arith.constant 2 : index
    %230 = memref.load %arg5[%c17_396, %c2_397] : memref<32x4xf32, #tpu.memory_space<smem>>
    %c17_398 = arith.constant 17 : index
    %c3_399 = arith.constant 3 : index
    %231 = memref.load %arg5[%c17_398, %c3_399] : memref<32x4xf32, #tpu.memory_space<smem>>
    %c18_400 = arith.constant 18 : index
    %c0_401 = arith.constant 0 : index
    %232 = memref.load %arg5[%c18_400, %c0_401] : memref<32x4xf32, #tpu.memory_space<smem>>
    %c18_402 = arith.constant 18 : index
    %c1_403 = arith.constant 1 : index
    %233 = memref.load %arg5[%c18_402, %c1_403] : memref<32x4xf32, #tpu.memory_space<smem>>
    %c18_404 = arith.constant 18 : index
    %c2_405 = arith.constant 2 : index
    %234 = memref.load %arg5[%c18_404, %c2_405] : memref<32x4xf32, #tpu.memory_space<smem>>
    %c18_406 = arith.constant 18 : index
    %c3_407 = arith.constant 3 : index
    %235 = memref.load %arg5[%c18_406, %c3_407] : memref<32x4xf32, #tpu.memory_space<smem>>
    %c19_408 = arith.constant 19 : index
    %c0_409 = arith.constant 0 : index
    %236 = memref.load %arg5[%c19_408, %c0_409] : memref<32x4xf32, #tpu.memory_space<smem>>
    %c19_410 = arith.constant 19 : index
    %c1_411 = arith.constant 1 : index
    %237 = memref.load %arg5[%c19_410, %c1_411] : memref<32x4xf32, #tpu.memory_space<smem>>
    %c19_412 = arith.constant 19 : index
    %c2_413 = arith.constant 2 : index
    %238 = memref.load %arg5[%c19_412, %c2_413] : memref<32x4xf32, #tpu.memory_space<smem>>
    %c19_414 = arith.constant 19 : index
    %c3_415 = arith.constant 3 : index
    %239 = memref.load %arg5[%c19_414, %c3_415] : memref<32x4xf32, #tpu.memory_space<smem>>
    %c20_416 = arith.constant 20 : index
    %c0_417 = arith.constant 0 : index
    %240 = memref.load %arg5[%c20_416, %c0_417] : memref<32x4xf32, #tpu.memory_space<smem>>
    %c20_418 = arith.constant 20 : index
    %c1_419 = arith.constant 1 : index
    %241 = memref.load %arg5[%c20_418, %c1_419] : memref<32x4xf32, #tpu.memory_space<smem>>
    %c20_420 = arith.constant 20 : index
    %c2_421 = arith.constant 2 : index
    %242 = memref.load %arg5[%c20_420, %c2_421] : memref<32x4xf32, #tpu.memory_space<smem>>
    %c20_422 = arith.constant 20 : index
    %c3_423 = arith.constant 3 : index
    %243 = memref.load %arg5[%c20_422, %c3_423] : memref<32x4xf32, #tpu.memory_space<smem>>
    %c21_424 = arith.constant 21 : index
    %c0_425 = arith.constant 0 : index
    %244 = memref.load %arg5[%c21_424, %c0_425] : memref<32x4xf32, #tpu.memory_space<smem>>
    %c21_426 = arith.constant 21 : index
    %c1_427 = arith.constant 1 : index
    %245 = memref.load %arg5[%c21_426, %c1_427] : memref<32x4xf32, #tpu.memory_space<smem>>
    %c21_428 = arith.constant 21 : index
    %c2_429 = arith.constant 2 : index
    %246 = memref.load %arg5[%c21_428, %c2_429] : memref<32x4xf32, #tpu.memory_space<smem>>
    %c21_430 = arith.constant 21 : index
    %c3_431 = arith.constant 3 : index
    %247 = memref.load %arg5[%c21_430, %c3_431] : memref<32x4xf32, #tpu.memory_space<smem>>
    %c22_432 = arith.constant 22 : index
    %c0_433 = arith.constant 0 : index
    %248 = memref.load %arg5[%c22_432, %c0_433] : memref<32x4xf32, #tpu.memory_space<smem>>
    %c22_434 = arith.constant 22 : index
    %c1_435 = arith.constant 1 : index
    %249 = memref.load %arg5[%c22_434, %c1_435] : memref<32x4xf32, #tpu.memory_space<smem>>
    %c22_436 = arith.constant 22 : index
    %c2_437 = arith.constant 2 : index
    %250 = memref.load %arg5[%c22_436, %c2_437] : memref<32x4xf32, #tpu.memory_space<smem>>
    %c22_438 = arith.constant 22 : index
    %c3_439 = arith.constant 3 : index
    %251 = memref.load %arg5[%c22_438, %c3_439] : memref<32x4xf32, #tpu.memory_space<smem>>
    %c23_440 = arith.constant 23 : index
    %c0_441 = arith.constant 0 : index
    %252 = memref.load %arg5[%c23_440, %c0_441] : memref<32x4xf32, #tpu.memory_space<smem>>
    %c23_442 = arith.constant 23 : index
    %c1_443 = arith.constant 1 : index
    %253 = memref.load %arg5[%c23_442, %c1_443] : memref<32x4xf32, #tpu.memory_space<smem>>
    %c23_444 = arith.constant 23 : index
    %c2_445 = arith.constant 2 : index
    %254 = memref.load %arg5[%c23_444, %c2_445] : memref<32x4xf32, #tpu.memory_space<smem>>
    %c23_446 = arith.constant 23 : index
    %c3_447 = arith.constant 3 : index
    %255 = memref.load %arg5[%c23_446, %c3_447] : memref<32x4xf32, #tpu.memory_space<smem>>
    %c24_448 = arith.constant 24 : index
    %c0_449 = arith.constant 0 : index
    %256 = memref.load %arg5[%c24_448, %c0_449] : memref<32x4xf32, #tpu.memory_space<smem>>
    %c24_450 = arith.constant 24 : index
    %c1_451 = arith.constant 1 : index
    %257 = memref.load %arg5[%c24_450, %c1_451] : memref<32x4xf32, #tpu.memory_space<smem>>
    %c24_452 = arith.constant 24 : index
    %c2_453 = arith.constant 2 : index
    %258 = memref.load %arg5[%c24_452, %c2_453] : memref<32x4xf32, #tpu.memory_space<smem>>
    %c24_454 = arith.constant 24 : index
    %c3_455 = arith.constant 3 : index
    %259 = memref.load %arg5[%c24_454, %c3_455] : memref<32x4xf32, #tpu.memory_space<smem>>
    %c25_456 = arith.constant 25 : index
    %c0_457 = arith.constant 0 : index
    %260 = memref.load %arg5[%c25_456, %c0_457] : memref<32x4xf32, #tpu.memory_space<smem>>
    %c25_458 = arith.constant 25 : index
    %c1_459 = arith.constant 1 : index
    %261 = memref.load %arg5[%c25_458, %c1_459] : memref<32x4xf32, #tpu.memory_space<smem>>
    %c25_460 = arith.constant 25 : index
    %c2_461 = arith.constant 2 : index
    %262 = memref.load %arg5[%c25_460, %c2_461] : memref<32x4xf32, #tpu.memory_space<smem>>
    %c25_462 = arith.constant 25 : index
    %c3_463 = arith.constant 3 : index
    %263 = memref.load %arg5[%c25_462, %c3_463] : memref<32x4xf32, #tpu.memory_space<smem>>
    %c26_464 = arith.constant 26 : index
    %c0_465 = arith.constant 0 : index
    %264 = memref.load %arg5[%c26_464, %c0_465] : memref<32x4xf32, #tpu.memory_space<smem>>
    %c26_466 = arith.constant 26 : index
    %c1_467 = arith.constant 1 : index
    %265 = memref.load %arg5[%c26_466, %c1_467] : memref<32x4xf32, #tpu.memory_space<smem>>
    %c26_468 = arith.constant 26 : index
    %c2_469 = arith.constant 2 : index
    %266 = memref.load %arg5[%c26_468, %c2_469] : memref<32x4xf32, #tpu.memory_space<smem>>
    %c26_470 = arith.constant 26 : index
    %c3_471 = arith.constant 3 : index
    %267 = memref.load %arg5[%c26_470, %c3_471] : memref<32x4xf32, #tpu.memory_space<smem>>
    %c27_472 = arith.constant 27 : index
    %c0_473 = arith.constant 0 : index
    %268 = memref.load %arg5[%c27_472, %c0_473] : memref<32x4xf32, #tpu.memory_space<smem>>
    %c27_474 = arith.constant 27 : index
    %c1_475 = arith.constant 1 : index
    %269 = memref.load %arg5[%c27_474, %c1_475] : memref<32x4xf32, #tpu.memory_space<smem>>
    %c27_476 = arith.constant 27 : index
    %c2_477 = arith.constant 2 : index
    %270 = memref.load %arg5[%c27_476, %c2_477] : memref<32x4xf32, #tpu.memory_space<smem>>
    %c27_478 = arith.constant 27 : index
    %c3_479 = arith.constant 3 : index
    %271 = memref.load %arg5[%c27_478, %c3_479] : memref<32x4xf32, #tpu.memory_space<smem>>
    %c28_480 = arith.constant 28 : index
    %c0_481 = arith.constant 0 : index
    %272 = memref.load %arg5[%c28_480, %c0_481] : memref<32x4xf32, #tpu.memory_space<smem>>
    %c28_482 = arith.constant 28 : index
    %c1_483 = arith.constant 1 : index
    %273 = memref.load %arg5[%c28_482, %c1_483] : memref<32x4xf32, #tpu.memory_space<smem>>
    %c28_484 = arith.constant 28 : index
    %c2_485 = arith.constant 2 : index
    %274 = memref.load %arg5[%c28_484, %c2_485] : memref<32x4xf32, #tpu.memory_space<smem>>
    %c28_486 = arith.constant 28 : index
    %c3_487 = arith.constant 3 : index
    %275 = memref.load %arg5[%c28_486, %c3_487] : memref<32x4xf32, #tpu.memory_space<smem>>
    %c29_488 = arith.constant 29 : index
    %c0_489 = arith.constant 0 : index
    %276 = memref.load %arg5[%c29_488, %c0_489] : memref<32x4xf32, #tpu.memory_space<smem>>
    %c29_490 = arith.constant 29 : index
    %c1_491 = arith.constant 1 : index
    %277 = memref.load %arg5[%c29_490, %c1_491] : memref<32x4xf32, #tpu.memory_space<smem>>
    %c29_492 = arith.constant 29 : index
    %c2_493 = arith.constant 2 : index
    %278 = memref.load %arg5[%c29_492, %c2_493] : memref<32x4xf32, #tpu.memory_space<smem>>
    %c29_494 = arith.constant 29 : index
    %c3_495 = arith.constant 3 : index
    %279 = memref.load %arg5[%c29_494, %c3_495] : memref<32x4xf32, #tpu.memory_space<smem>>
    %c30_496 = arith.constant 30 : index
    %c0_497 = arith.constant 0 : index
    %280 = memref.load %arg5[%c30_496, %c0_497] : memref<32x4xf32, #tpu.memory_space<smem>>
    %c30_498 = arith.constant 30 : index
    %c1_499 = arith.constant 1 : index
    %281 = memref.load %arg5[%c30_498, %c1_499] : memref<32x4xf32, #tpu.memory_space<smem>>
    %c30_500 = arith.constant 30 : index
    %c2_501 = arith.constant 2 : index
    %282 = memref.load %arg5[%c30_500, %c2_501] : memref<32x4xf32, #tpu.memory_space<smem>>
    %c30_502 = arith.constant 30 : index
    %c3_503 = arith.constant 3 : index
    %283 = memref.load %arg5[%c30_502, %c3_503] : memref<32x4xf32, #tpu.memory_space<smem>>
    %c31_504 = arith.constant 31 : index
    %c0_505 = arith.constant 0 : index
    %284 = memref.load %arg5[%c31_504, %c0_505] : memref<32x4xf32, #tpu.memory_space<smem>>
    %c31_506 = arith.constant 31 : index
    %c1_507 = arith.constant 1 : index
    %285 = memref.load %arg5[%c31_506, %c1_507] : memref<32x4xf32, #tpu.memory_space<smem>>
    %c31_508 = arith.constant 31 : index
    %c2_509 = arith.constant 2 : index
    %286 = memref.load %arg5[%c31_508, %c2_509] : memref<32x4xf32, #tpu.memory_space<smem>>
    %c31_510 = arith.constant 31 : index
    %c3_511 = arith.constant 3 : index
    %287 = memref.load %arg5[%c31_510, %c3_511] : memref<32x4xf32, #tpu.memory_space<smem>>
    %c0_512 = arith.constant 0 : index
    %288 = memref.load %arg6[%c0_512] : memref<4xf32, #tpu.memory_space<smem>>
    %c1_513 = arith.constant 1 : index
    %289 = memref.load %arg6[%c1_513] : memref<4xf32, #tpu.memory_space<smem>>
    %c2_514 = arith.constant 2 : index
    %290 = memref.load %arg6[%c2_514] : memref<4xf32, #tpu.memory_space<smem>>
    %c3_515 = arith.constant 3 : index
    %291 = memref.load %arg6[%c3_515] : memref<4xf32, #tpu.memory_space<smem>>
    %c0_516 = arith.constant 0 : index
    %c0_517 = arith.constant 0 : index
    %c0_518 = arith.constant 0 : index
    %c0_519 = arith.constant 0 : index
    %292 = vector.load %arg2[%c0_516, %c0_517, %c0_518, %c0_519] : memref<1x4x2x128xf32, #tpu.memory_space<vmem>>, vector<1x1x2x128xf32>
    %293 = vector.shape_cast %292 : vector<1x1x2x128xf32> to vector<2x128xf32>
    %c0_520 = arith.constant 0 : index
    %c1_521 = arith.constant 1 : index
    %c0_522 = arith.constant 0 : index
    %c0_523 = arith.constant 0 : index
    %294 = vector.load %arg2[%c0_520, %c1_521, %c0_522, %c0_523] : memref<1x4x2x128xf32, #tpu.memory_space<vmem>>, vector<1x1x2x128xf32>
    %295 = vector.shape_cast %294 : vector<1x1x2x128xf32> to vector<2x128xf32>
    %c0_524 = arith.constant 0 : index
    %c2_525 = arith.constant 2 : index
    %c0_526 = arith.constant 0 : index
    %c0_527 = arith.constant 0 : index
    %296 = vector.load %arg2[%c0_524, %c2_525, %c0_526, %c0_527] : memref<1x4x2x128xf32, #tpu.memory_space<vmem>>, vector<1x1x2x128xf32>
    %297 = vector.shape_cast %296 : vector<1x1x2x128xf32> to vector<2x128xf32>
    %c0_528 = arith.constant 0 : index
    %c3_529 = arith.constant 3 : index
    %c0_530 = arith.constant 0 : index
    %c0_531 = arith.constant 0 : index
    %298 = vector.load %arg2[%c0_528, %c3_529, %c0_530, %c0_531] : memref<1x4x2x128xf32, #tpu.memory_space<vmem>>, vector<1x1x2x128xf32>
    %299 = vector.shape_cast %298 : vector<1x1x2x128xf32> to vector<2x128xf32>
    %300 = vector.broadcast %0 : f32 to vector<2x128xf32>
    %301 = arith.mulf %293, %300 : vector<2x128xf32>
    %302 = vector.broadcast %32 : f32 to vector<2x128xf32>
    %303 = arith.mulf %295, %302 : vector<2x128xf32>
    %304 = arith.addf %301, %303 : vector<2x128xf32>
    %305 = vector.broadcast %64 : f32 to vector<2x128xf32>
    %306 = arith.mulf %297, %305 : vector<2x128xf32>
    %307 = arith.addf %304, %306 : vector<2x128xf32>
    %308 = vector.broadcast %96 : f32 to vector<2x128xf32>
    %309 = arith.mulf %299, %308 : vector<2x128xf32>
    %310 = arith.addf %307, %309 : vector<2x128xf32>
    %311 = vector.broadcast %128 : f32 to vector<2x128xf32>
    %312 = arith.addf %310, %311 : vector<2x128xf32>
    %cst = arith.constant 0.000000e+00 : f32
    %313 = vector.broadcast %cst : f32 to vector<2x128xf32>
    %314 = arith.maximumf %312, %313 : vector<2x128xf32>
    %315 = vector.broadcast %160 : f32 to vector<2x128xf32>
    %316 = arith.mulf %314, %315 : vector<2x128xf32>
    %317 = vector.broadcast %161 : f32 to vector<2x128xf32>
    %318 = arith.mulf %314, %317 : vector<2x128xf32>
    %319 = vector.broadcast %162 : f32 to vector<2x128xf32>
    %320 = arith.mulf %314, %319 : vector<2x128xf32>
    %321 = vector.broadcast %163 : f32 to vector<2x128xf32>
    %322 = arith.mulf %314, %321 : vector<2x128xf32>
    %323 = vector.broadcast %1 : f32 to vector<2x128xf32>
    %324 = arith.mulf %293, %323 : vector<2x128xf32>
    %325 = vector.broadcast %33 : f32 to vector<2x128xf32>
    %326 = arith.mulf %295, %325 : vector<2x128xf32>
    %327 = arith.addf %324, %326 : vector<2x128xf32>
    %328 = vector.broadcast %65 : f32 to vector<2x128xf32>
    %329 = arith.mulf %297, %328 : vector<2x128xf32>
    %330 = arith.addf %327, %329 : vector<2x128xf32>
    %331 = vector.broadcast %97 : f32 to vector<2x128xf32>
    %332 = arith.mulf %299, %331 : vector<2x128xf32>
    %333 = arith.addf %330, %332 : vector<2x128xf32>
    %334 = vector.broadcast %129 : f32 to vector<2x128xf32>
    %335 = arith.addf %333, %334 : vector<2x128xf32>
    %cst_532 = arith.constant 0.000000e+00 : f32
    %336 = vector.broadcast %cst_532 : f32 to vector<2x128xf32>
    %337 = arith.maximumf %335, %336 : vector<2x128xf32>
    %338 = vector.broadcast %164 : f32 to vector<2x128xf32>
    %339 = arith.mulf %337, %338 : vector<2x128xf32>
    %340 = arith.addf %316, %339 : vector<2x128xf32>
    %341 = vector.broadcast %165 : f32 to vector<2x128xf32>
    %342 = arith.mulf %337, %341 : vector<2x128xf32>
    %343 = arith.addf %318, %342 : vector<2x128xf32>
    %344 = vector.broadcast %166 : f32 to vector<2x128xf32>
    %345 = arith.mulf %337, %344 : vector<2x128xf32>
    %346 = arith.addf %320, %345 : vector<2x128xf32>
    %347 = vector.broadcast %167 : f32 to vector<2x128xf32>
    %348 = arith.mulf %337, %347 : vector<2x128xf32>
    %349 = arith.addf %322, %348 : vector<2x128xf32>
    %350 = vector.broadcast %2 : f32 to vector<2x128xf32>
    %351 = arith.mulf %293, %350 : vector<2x128xf32>
    %352 = vector.broadcast %34 : f32 to vector<2x128xf32>
    %353 = arith.mulf %295, %352 : vector<2x128xf32>
    %354 = arith.addf %351, %353 : vector<2x128xf32>
    %355 = vector.broadcast %66 : f32 to vector<2x128xf32>
    %356 = arith.mulf %297, %355 : vector<2x128xf32>
    %357 = arith.addf %354, %356 : vector<2x128xf32>
    %358 = vector.broadcast %98 : f32 to vector<2x128xf32>
    %359 = arith.mulf %299, %358 : vector<2x128xf32>
    %360 = arith.addf %357, %359 : vector<2x128xf32>
    %361 = vector.broadcast %130 : f32 to vector<2x128xf32>
    %362 = arith.addf %360, %361 : vector<2x128xf32>
    %cst_533 = arith.constant 0.000000e+00 : f32
    %363 = vector.broadcast %cst_533 : f32 to vector<2x128xf32>
    %364 = arith.maximumf %362, %363 : vector<2x128xf32>
    %365 = vector.broadcast %168 : f32 to vector<2x128xf32>
    %366 = arith.mulf %364, %365 : vector<2x128xf32>
    %367 = arith.addf %340, %366 : vector<2x128xf32>
    %368 = vector.broadcast %169 : f32 to vector<2x128xf32>
    %369 = arith.mulf %364, %368 : vector<2x128xf32>
    %370 = arith.addf %343, %369 : vector<2x128xf32>
    %371 = vector.broadcast %170 : f32 to vector<2x128xf32>
    %372 = arith.mulf %364, %371 : vector<2x128xf32>
    %373 = arith.addf %346, %372 : vector<2x128xf32>
    %374 = vector.broadcast %171 : f32 to vector<2x128xf32>
    %375 = arith.mulf %364, %374 : vector<2x128xf32>
    %376 = arith.addf %349, %375 : vector<2x128xf32>
    %377 = vector.broadcast %3 : f32 to vector<2x128xf32>
    %378 = arith.mulf %293, %377 : vector<2x128xf32>
    %379 = vector.broadcast %35 : f32 to vector<2x128xf32>
    %380 = arith.mulf %295, %379 : vector<2x128xf32>
    %381 = arith.addf %378, %380 : vector<2x128xf32>
    %382 = vector.broadcast %67 : f32 to vector<2x128xf32>
    %383 = arith.mulf %297, %382 : vector<2x128xf32>
    %384 = arith.addf %381, %383 : vector<2x128xf32>
    %385 = vector.broadcast %99 : f32 to vector<2x128xf32>
    %386 = arith.mulf %299, %385 : vector<2x128xf32>
    %387 = arith.addf %384, %386 : vector<2x128xf32>
    %388 = vector.broadcast %131 : f32 to vector<2x128xf32>
    %389 = arith.addf %387, %388 : vector<2x128xf32>
    %cst_534 = arith.constant 0.000000e+00 : f32
    %390 = vector.broadcast %cst_534 : f32 to vector<2x128xf32>
    %391 = arith.maximumf %389, %390 : vector<2x128xf32>
    %392 = vector.broadcast %172 : f32 to vector<2x128xf32>
    %393 = arith.mulf %391, %392 : vector<2x128xf32>
    %394 = arith.addf %367, %393 : vector<2x128xf32>
    %395 = vector.broadcast %173 : f32 to vector<2x128xf32>
    %396 = arith.mulf %391, %395 : vector<2x128xf32>
    %397 = arith.addf %370, %396 : vector<2x128xf32>
    %398 = vector.broadcast %174 : f32 to vector<2x128xf32>
    %399 = arith.mulf %391, %398 : vector<2x128xf32>
    %400 = arith.addf %373, %399 : vector<2x128xf32>
    %401 = vector.broadcast %175 : f32 to vector<2x128xf32>
    %402 = arith.mulf %391, %401 : vector<2x128xf32>
    %403 = arith.addf %376, %402 : vector<2x128xf32>
    %404 = vector.broadcast %4 : f32 to vector<2x128xf32>
    %405 = arith.mulf %293, %404 : vector<2x128xf32>
    %406 = vector.broadcast %36 : f32 to vector<2x128xf32>
    %407 = arith.mulf %295, %406 : vector<2x128xf32>
    %408 = arith.addf %405, %407 : vector<2x128xf32>
    %409 = vector.broadcast %68 : f32 to vector<2x128xf32>
    %410 = arith.mulf %297, %409 : vector<2x128xf32>
    %411 = arith.addf %408, %410 : vector<2x128xf32>
    %412 = vector.broadcast %100 : f32 to vector<2x128xf32>
    %413 = arith.mulf %299, %412 : vector<2x128xf32>
    %414 = arith.addf %411, %413 : vector<2x128xf32>
    %415 = vector.broadcast %132 : f32 to vector<2x128xf32>
    %416 = arith.addf %414, %415 : vector<2x128xf32>
    %cst_535 = arith.constant 0.000000e+00 : f32
    %417 = vector.broadcast %cst_535 : f32 to vector<2x128xf32>
    %418 = arith.maximumf %416, %417 : vector<2x128xf32>
    %419 = vector.broadcast %176 : f32 to vector<2x128xf32>
    %420 = arith.mulf %418, %419 : vector<2x128xf32>
    %421 = arith.addf %394, %420 : vector<2x128xf32>
    %422 = vector.broadcast %177 : f32 to vector<2x128xf32>
    %423 = arith.mulf %418, %422 : vector<2x128xf32>
    %424 = arith.addf %397, %423 : vector<2x128xf32>
    %425 = vector.broadcast %178 : f32 to vector<2x128xf32>
    %426 = arith.mulf %418, %425 : vector<2x128xf32>
    %427 = arith.addf %400, %426 : vector<2x128xf32>
    %428 = vector.broadcast %179 : f32 to vector<2x128xf32>
    %429 = arith.mulf %418, %428 : vector<2x128xf32>
    %430 = arith.addf %403, %429 : vector<2x128xf32>
    %431 = vector.broadcast %5 : f32 to vector<2x128xf32>
    %432 = arith.mulf %293, %431 : vector<2x128xf32>
    %433 = vector.broadcast %37 : f32 to vector<2x128xf32>
    %434 = arith.mulf %295, %433 : vector<2x128xf32>
    %435 = arith.addf %432, %434 : vector<2x128xf32>
    %436 = vector.broadcast %69 : f32 to vector<2x128xf32>
    %437 = arith.mulf %297, %436 : vector<2x128xf32>
    %438 = arith.addf %435, %437 : vector<2x128xf32>
    %439 = vector.broadcast %101 : f32 to vector<2x128xf32>
    %440 = arith.mulf %299, %439 : vector<2x128xf32>
    %441 = arith.addf %438, %440 : vector<2x128xf32>
    %442 = vector.broadcast %133 : f32 to vector<2x128xf32>
    %443 = arith.addf %441, %442 : vector<2x128xf32>
    %cst_536 = arith.constant 0.000000e+00 : f32
    %444 = vector.broadcast %cst_536 : f32 to vector<2x128xf32>
    %445 = arith.maximumf %443, %444 : vector<2x128xf32>
    %446 = vector.broadcast %180 : f32 to vector<2x128xf32>
    %447 = arith.mulf %445, %446 : vector<2x128xf32>
    %448 = arith.addf %421, %447 : vector<2x128xf32>
    %449 = vector.broadcast %181 : f32 to vector<2x128xf32>
    %450 = arith.mulf %445, %449 : vector<2x128xf32>
    %451 = arith.addf %424, %450 : vector<2x128xf32>
    %452 = vector.broadcast %182 : f32 to vector<2x128xf32>
    %453 = arith.mulf %445, %452 : vector<2x128xf32>
    %454 = arith.addf %427, %453 : vector<2x128xf32>
    %455 = vector.broadcast %183 : f32 to vector<2x128xf32>
    %456 = arith.mulf %445, %455 : vector<2x128xf32>
    %457 = arith.addf %430, %456 : vector<2x128xf32>
    %458 = vector.broadcast %6 : f32 to vector<2x128xf32>
    %459 = arith.mulf %293, %458 : vector<2x128xf32>
    %460 = vector.broadcast %38 : f32 to vector<2x128xf32>
    %461 = arith.mulf %295, %460 : vector<2x128xf32>
    %462 = arith.addf %459, %461 : vector<2x128xf32>
    %463 = vector.broadcast %70 : f32 to vector<2x128xf32>
    %464 = arith.mulf %297, %463 : vector<2x128xf32>
    %465 = arith.addf %462, %464 : vector<2x128xf32>
    %466 = vector.broadcast %102 : f32 to vector<2x128xf32>
    %467 = arith.mulf %299, %466 : vector<2x128xf32>
    %468 = arith.addf %465, %467 : vector<2x128xf32>
    %469 = vector.broadcast %134 : f32 to vector<2x128xf32>
    %470 = arith.addf %468, %469 : vector<2x128xf32>
    %cst_537 = arith.constant 0.000000e+00 : f32
    %471 = vector.broadcast %cst_537 : f32 to vector<2x128xf32>
    %472 = arith.maximumf %470, %471 : vector<2x128xf32>
    %473 = vector.broadcast %184 : f32 to vector<2x128xf32>
    %474 = arith.mulf %472, %473 : vector<2x128xf32>
    %475 = arith.addf %448, %474 : vector<2x128xf32>
    %476 = vector.broadcast %185 : f32 to vector<2x128xf32>
    %477 = arith.mulf %472, %476 : vector<2x128xf32>
    %478 = arith.addf %451, %477 : vector<2x128xf32>
    %479 = vector.broadcast %186 : f32 to vector<2x128xf32>
    %480 = arith.mulf %472, %479 : vector<2x128xf32>
    %481 = arith.addf %454, %480 : vector<2x128xf32>
    %482 = vector.broadcast %187 : f32 to vector<2x128xf32>
    %483 = arith.mulf %472, %482 : vector<2x128xf32>
    %484 = arith.addf %457, %483 : vector<2x128xf32>
    %485 = vector.broadcast %7 : f32 to vector<2x128xf32>
    %486 = arith.mulf %293, %485 : vector<2x128xf32>
    %487 = vector.broadcast %39 : f32 to vector<2x128xf32>
    %488 = arith.mulf %295, %487 : vector<2x128xf32>
    %489 = arith.addf %486, %488 : vector<2x128xf32>
    %490 = vector.broadcast %71 : f32 to vector<2x128xf32>
    %491 = arith.mulf %297, %490 : vector<2x128xf32>
    %492 = arith.addf %489, %491 : vector<2x128xf32>
    %493 = vector.broadcast %103 : f32 to vector<2x128xf32>
    %494 = arith.mulf %299, %493 : vector<2x128xf32>
    %495 = arith.addf %492, %494 : vector<2x128xf32>
    %496 = vector.broadcast %135 : f32 to vector<2x128xf32>
    %497 = arith.addf %495, %496 : vector<2x128xf32>
    %cst_538 = arith.constant 0.000000e+00 : f32
    %498 = vector.broadcast %cst_538 : f32 to vector<2x128xf32>
    %499 = arith.maximumf %497, %498 : vector<2x128xf32>
    %500 = vector.broadcast %188 : f32 to vector<2x128xf32>
    %501 = arith.mulf %499, %500 : vector<2x128xf32>
    %502 = arith.addf %475, %501 : vector<2x128xf32>
    %503 = vector.broadcast %189 : f32 to vector<2x128xf32>
    %504 = arith.mulf %499, %503 : vector<2x128xf32>
    %505 = arith.addf %478, %504 : vector<2x128xf32>
    %506 = vector.broadcast %190 : f32 to vector<2x128xf32>
    %507 = arith.mulf %499, %506 : vector<2x128xf32>
    %508 = arith.addf %481, %507 : vector<2x128xf32>
    %509 = vector.broadcast %191 : f32 to vector<2x128xf32>
    %510 = arith.mulf %499, %509 : vector<2x128xf32>
    %511 = arith.addf %484, %510 : vector<2x128xf32>
    %512 = vector.broadcast %8 : f32 to vector<2x128xf32>
    %513 = arith.mulf %293, %512 : vector<2x128xf32>
    %514 = vector.broadcast %40 : f32 to vector<2x128xf32>
    %515 = arith.mulf %295, %514 : vector<2x128xf32>
    %516 = arith.addf %513, %515 : vector<2x128xf32>
    %517 = vector.broadcast %72 : f32 to vector<2x128xf32>
    %518 = arith.mulf %297, %517 : vector<2x128xf32>
    %519 = arith.addf %516, %518 : vector<2x128xf32>
    %520 = vector.broadcast %104 : f32 to vector<2x128xf32>
    %521 = arith.mulf %299, %520 : vector<2x128xf32>
    %522 = arith.addf %519, %521 : vector<2x128xf32>
    %523 = vector.broadcast %136 : f32 to vector<2x128xf32>
    %524 = arith.addf %522, %523 : vector<2x128xf32>
    %cst_539 = arith.constant 0.000000e+00 : f32
    %525 = vector.broadcast %cst_539 : f32 to vector<2x128xf32>
    %526 = arith.maximumf %524, %525 : vector<2x128xf32>
    %527 = vector.broadcast %192 : f32 to vector<2x128xf32>
    %528 = arith.mulf %526, %527 : vector<2x128xf32>
    %529 = arith.addf %502, %528 : vector<2x128xf32>
    %530 = vector.broadcast %193 : f32 to vector<2x128xf32>
    %531 = arith.mulf %526, %530 : vector<2x128xf32>
    %532 = arith.addf %505, %531 : vector<2x128xf32>
    %533 = vector.broadcast %194 : f32 to vector<2x128xf32>
    %534 = arith.mulf %526, %533 : vector<2x128xf32>
    %535 = arith.addf %508, %534 : vector<2x128xf32>
    %536 = vector.broadcast %195 : f32 to vector<2x128xf32>
    %537 = arith.mulf %526, %536 : vector<2x128xf32>
    %538 = arith.addf %511, %537 : vector<2x128xf32>
    %539 = vector.broadcast %9 : f32 to vector<2x128xf32>
    %540 = arith.mulf %293, %539 : vector<2x128xf32>
    %541 = vector.broadcast %41 : f32 to vector<2x128xf32>
    %542 = arith.mulf %295, %541 : vector<2x128xf32>
    %543 = arith.addf %540, %542 : vector<2x128xf32>
    %544 = vector.broadcast %73 : f32 to vector<2x128xf32>
    %545 = arith.mulf %297, %544 : vector<2x128xf32>
    %546 = arith.addf %543, %545 : vector<2x128xf32>
    %547 = vector.broadcast %105 : f32 to vector<2x128xf32>
    %548 = arith.mulf %299, %547 : vector<2x128xf32>
    %549 = arith.addf %546, %548 : vector<2x128xf32>
    %550 = vector.broadcast %137 : f32 to vector<2x128xf32>
    %551 = arith.addf %549, %550 : vector<2x128xf32>
    %cst_540 = arith.constant 0.000000e+00 : f32
    %552 = vector.broadcast %cst_540 : f32 to vector<2x128xf32>
    %553 = arith.maximumf %551, %552 : vector<2x128xf32>
    %554 = vector.broadcast %196 : f32 to vector<2x128xf32>
    %555 = arith.mulf %553, %554 : vector<2x128xf32>
    %556 = arith.addf %529, %555 : vector<2x128xf32>
    %557 = vector.broadcast %197 : f32 to vector<2x128xf32>
    %558 = arith.mulf %553, %557 : vector<2x128xf32>
    %559 = arith.addf %532, %558 : vector<2x128xf32>
    %560 = vector.broadcast %198 : f32 to vector<2x128xf32>
    %561 = arith.mulf %553, %560 : vector<2x128xf32>
    %562 = arith.addf %535, %561 : vector<2x128xf32>
    %563 = vector.broadcast %199 : f32 to vector<2x128xf32>
    %564 = arith.mulf %553, %563 : vector<2x128xf32>
    %565 = arith.addf %538, %564 : vector<2x128xf32>
    %566 = vector.broadcast %10 : f32 to vector<2x128xf32>
    %567 = arith.mulf %293, %566 : vector<2x128xf32>
    %568 = vector.broadcast %42 : f32 to vector<2x128xf32>
    %569 = arith.mulf %295, %568 : vector<2x128xf32>
    %570 = arith.addf %567, %569 : vector<2x128xf32>
    %571 = vector.broadcast %74 : f32 to vector<2x128xf32>
    %572 = arith.mulf %297, %571 : vector<2x128xf32>
    %573 = arith.addf %570, %572 : vector<2x128xf32>
    %574 = vector.broadcast %106 : f32 to vector<2x128xf32>
    %575 = arith.mulf %299, %574 : vector<2x128xf32>
    %576 = arith.addf %573, %575 : vector<2x128xf32>
    %577 = vector.broadcast %138 : f32 to vector<2x128xf32>
    %578 = arith.addf %576, %577 : vector<2x128xf32>
    %cst_541 = arith.constant 0.000000e+00 : f32
    %579 = vector.broadcast %cst_541 : f32 to vector<2x128xf32>
    %580 = arith.maximumf %578, %579 : vector<2x128xf32>
    %581 = vector.broadcast %200 : f32 to vector<2x128xf32>
    %582 = arith.mulf %580, %581 : vector<2x128xf32>
    %583 = arith.addf %556, %582 : vector<2x128xf32>
    %584 = vector.broadcast %201 : f32 to vector<2x128xf32>
    %585 = arith.mulf %580, %584 : vector<2x128xf32>
    %586 = arith.addf %559, %585 : vector<2x128xf32>
    %587 = vector.broadcast %202 : f32 to vector<2x128xf32>
    %588 = arith.mulf %580, %587 : vector<2x128xf32>
    %589 = arith.addf %562, %588 : vector<2x128xf32>
    %590 = vector.broadcast %203 : f32 to vector<2x128xf32>
    %591 = arith.mulf %580, %590 : vector<2x128xf32>
    %592 = arith.addf %565, %591 : vector<2x128xf32>
    %593 = vector.broadcast %11 : f32 to vector<2x128xf32>
    %594 = arith.mulf %293, %593 : vector<2x128xf32>
    %595 = vector.broadcast %43 : f32 to vector<2x128xf32>
    %596 = arith.mulf %295, %595 : vector<2x128xf32>
    %597 = arith.addf %594, %596 : vector<2x128xf32>
    %598 = vector.broadcast %75 : f32 to vector<2x128xf32>
    %599 = arith.mulf %297, %598 : vector<2x128xf32>
    %600 = arith.addf %597, %599 : vector<2x128xf32>
    %601 = vector.broadcast %107 : f32 to vector<2x128xf32>
    %602 = arith.mulf %299, %601 : vector<2x128xf32>
    %603 = arith.addf %600, %602 : vector<2x128xf32>
    %604 = vector.broadcast %139 : f32 to vector<2x128xf32>
    %605 = arith.addf %603, %604 : vector<2x128xf32>
    %cst_542 = arith.constant 0.000000e+00 : f32
    %606 = vector.broadcast %cst_542 : f32 to vector<2x128xf32>
    %607 = arith.maximumf %605, %606 : vector<2x128xf32>
    %608 = vector.broadcast %204 : f32 to vector<2x128xf32>
    %609 = arith.mulf %607, %608 : vector<2x128xf32>
    %610 = arith.addf %583, %609 : vector<2x128xf32>
    %611 = vector.broadcast %205 : f32 to vector<2x128xf32>
    %612 = arith.mulf %607, %611 : vector<2x128xf32>
    %613 = arith.addf %586, %612 : vector<2x128xf32>
    %614 = vector.broadcast %206 : f32 to vector<2x128xf32>
    %615 = arith.mulf %607, %614 : vector<2x128xf32>
    %616 = arith.addf %589, %615 : vector<2x128xf32>
    %617 = vector.broadcast %207 : f32 to vector<2x128xf32>
    %618 = arith.mulf %607, %617 : vector<2x128xf32>
    %619 = arith.addf %592, %618 : vector<2x128xf32>
    %620 = vector.broadcast %12 : f32 to vector<2x128xf32>
    %621 = arith.mulf %293, %620 : vector<2x128xf32>
    %622 = vector.broadcast %44 : f32 to vector<2x128xf32>
    %623 = arith.mulf %295, %622 : vector<2x128xf32>
    %624 = arith.addf %621, %623 : vector<2x128xf32>
    %625 = vector.broadcast %76 : f32 to vector<2x128xf32>
    %626 = arith.mulf %297, %625 : vector<2x128xf32>
    %627 = arith.addf %624, %626 : vector<2x128xf32>
    %628 = vector.broadcast %108 : f32 to vector<2x128xf32>
    %629 = arith.mulf %299, %628 : vector<2x128xf32>
    %630 = arith.addf %627, %629 : vector<2x128xf32>
    %631 = vector.broadcast %140 : f32 to vector<2x128xf32>
    %632 = arith.addf %630, %631 : vector<2x128xf32>
    %cst_543 = arith.constant 0.000000e+00 : f32
    %633 = vector.broadcast %cst_543 : f32 to vector<2x128xf32>
    %634 = arith.maximumf %632, %633 : vector<2x128xf32>
    %635 = vector.broadcast %208 : f32 to vector<2x128xf32>
    %636 = arith.mulf %634, %635 : vector<2x128xf32>
    %637 = arith.addf %610, %636 : vector<2x128xf32>
    %638 = vector.broadcast %209 : f32 to vector<2x128xf32>
    %639 = arith.mulf %634, %638 : vector<2x128xf32>
    %640 = arith.addf %613, %639 : vector<2x128xf32>
    %641 = vector.broadcast %210 : f32 to vector<2x128xf32>
    %642 = arith.mulf %634, %641 : vector<2x128xf32>
    %643 = arith.addf %616, %642 : vector<2x128xf32>
    %644 = vector.broadcast %211 : f32 to vector<2x128xf32>
    %645 = arith.mulf %634, %644 : vector<2x128xf32>
    %646 = arith.addf %619, %645 : vector<2x128xf32>
    %647 = vector.broadcast %13 : f32 to vector<2x128xf32>
    %648 = arith.mulf %293, %647 : vector<2x128xf32>
    %649 = vector.broadcast %45 : f32 to vector<2x128xf32>
    %650 = arith.mulf %295, %649 : vector<2x128xf32>
    %651 = arith.addf %648, %650 : vector<2x128xf32>
    %652 = vector.broadcast %77 : f32 to vector<2x128xf32>
    %653 = arith.mulf %297, %652 : vector<2x128xf32>
    %654 = arith.addf %651, %653 : vector<2x128xf32>
    %655 = vector.broadcast %109 : f32 to vector<2x128xf32>
    %656 = arith.mulf %299, %655 : vector<2x128xf32>
    %657 = arith.addf %654, %656 : vector<2x128xf32>
    %658 = vector.broadcast %141 : f32 to vector<2x128xf32>
    %659 = arith.addf %657, %658 : vector<2x128xf32>
    %cst_544 = arith.constant 0.000000e+00 : f32
    %660 = vector.broadcast %cst_544 : f32 to vector<2x128xf32>
    %661 = arith.maximumf %659, %660 : vector<2x128xf32>
    %662 = vector.broadcast %212 : f32 to vector<2x128xf32>
    %663 = arith.mulf %661, %662 : vector<2x128xf32>
    %664 = arith.addf %637, %663 : vector<2x128xf32>
    %665 = vector.broadcast %213 : f32 to vector<2x128xf32>
    %666 = arith.mulf %661, %665 : vector<2x128xf32>
    %667 = arith.addf %640, %666 : vector<2x128xf32>
    %668 = vector.broadcast %214 : f32 to vector<2x128xf32>
    %669 = arith.mulf %661, %668 : vector<2x128xf32>
    %670 = arith.addf %643, %669 : vector<2x128xf32>
    %671 = vector.broadcast %215 : f32 to vector<2x128xf32>
    %672 = arith.mulf %661, %671 : vector<2x128xf32>
    %673 = arith.addf %646, %672 : vector<2x128xf32>
    %674 = vector.broadcast %14 : f32 to vector<2x128xf32>
    %675 = arith.mulf %293, %674 : vector<2x128xf32>
    %676 = vector.broadcast %46 : f32 to vector<2x128xf32>
    %677 = arith.mulf %295, %676 : vector<2x128xf32>
    %678 = arith.addf %675, %677 : vector<2x128xf32>
    %679 = vector.broadcast %78 : f32 to vector<2x128xf32>
    %680 = arith.mulf %297, %679 : vector<2x128xf32>
    %681 = arith.addf %678, %680 : vector<2x128xf32>
    %682 = vector.broadcast %110 : f32 to vector<2x128xf32>
    %683 = arith.mulf %299, %682 : vector<2x128xf32>
    %684 = arith.addf %681, %683 : vector<2x128xf32>
    %685 = vector.broadcast %142 : f32 to vector<2x128xf32>
    %686 = arith.addf %684, %685 : vector<2x128xf32>
    %cst_545 = arith.constant 0.000000e+00 : f32
    %687 = vector.broadcast %cst_545 : f32 to vector<2x128xf32>
    %688 = arith.maximumf %686, %687 : vector<2x128xf32>
    %689 = vector.broadcast %216 : f32 to vector<2x128xf32>
    %690 = arith.mulf %688, %689 : vector<2x128xf32>
    %691 = arith.addf %664, %690 : vector<2x128xf32>
    %692 = vector.broadcast %217 : f32 to vector<2x128xf32>
    %693 = arith.mulf %688, %692 : vector<2x128xf32>
    %694 = arith.addf %667, %693 : vector<2x128xf32>
    %695 = vector.broadcast %218 : f32 to vector<2x128xf32>
    %696 = arith.mulf %688, %695 : vector<2x128xf32>
    %697 = arith.addf %670, %696 : vector<2x128xf32>
    %698 = vector.broadcast %219 : f32 to vector<2x128xf32>
    %699 = arith.mulf %688, %698 : vector<2x128xf32>
    %700 = arith.addf %673, %699 : vector<2x128xf32>
    %701 = vector.broadcast %15 : f32 to vector<2x128xf32>
    %702 = arith.mulf %293, %701 : vector<2x128xf32>
    %703 = vector.broadcast %47 : f32 to vector<2x128xf32>
    %704 = arith.mulf %295, %703 : vector<2x128xf32>
    %705 = arith.addf %702, %704 : vector<2x128xf32>
    %706 = vector.broadcast %79 : f32 to vector<2x128xf32>
    %707 = arith.mulf %297, %706 : vector<2x128xf32>
    %708 = arith.addf %705, %707 : vector<2x128xf32>
    %709 = vector.broadcast %111 : f32 to vector<2x128xf32>
    %710 = arith.mulf %299, %709 : vector<2x128xf32>
    %711 = arith.addf %708, %710 : vector<2x128xf32>
    %712 = vector.broadcast %143 : f32 to vector<2x128xf32>
    %713 = arith.addf %711, %712 : vector<2x128xf32>
    %cst_546 = arith.constant 0.000000e+00 : f32
    %714 = vector.broadcast %cst_546 : f32 to vector<2x128xf32>
    %715 = arith.maximumf %713, %714 : vector<2x128xf32>
    %716 = vector.broadcast %220 : f32 to vector<2x128xf32>
    %717 = arith.mulf %715, %716 : vector<2x128xf32>
    %718 = arith.addf %691, %717 : vector<2x128xf32>
    %719 = vector.broadcast %221 : f32 to vector<2x128xf32>
    %720 = arith.mulf %715, %719 : vector<2x128xf32>
    %721 = arith.addf %694, %720 : vector<2x128xf32>
    %722 = vector.broadcast %222 : f32 to vector<2x128xf32>
    %723 = arith.mulf %715, %722 : vector<2x128xf32>
    %724 = arith.addf %697, %723 : vector<2x128xf32>
    %725 = vector.broadcast %223 : f32 to vector<2x128xf32>
    %726 = arith.mulf %715, %725 : vector<2x128xf32>
    %727 = arith.addf %700, %726 : vector<2x128xf32>
    %728 = vector.broadcast %16 : f32 to vector<2x128xf32>
    %729 = arith.mulf %293, %728 : vector<2x128xf32>
    %730 = vector.broadcast %48 : f32 to vector<2x128xf32>
    %731 = arith.mulf %295, %730 : vector<2x128xf32>
    %732 = arith.addf %729, %731 : vector<2x128xf32>
    %733 = vector.broadcast %80 : f32 to vector<2x128xf32>
    %734 = arith.mulf %297, %733 : vector<2x128xf32>
    %735 = arith.addf %732, %734 : vector<2x128xf32>
    %736 = vector.broadcast %112 : f32 to vector<2x128xf32>
    %737 = arith.mulf %299, %736 : vector<2x128xf32>
    %738 = arith.addf %735, %737 : vector<2x128xf32>
    %739 = vector.broadcast %144 : f32 to vector<2x128xf32>
    %740 = arith.addf %738, %739 : vector<2x128xf32>
    %cst_547 = arith.constant 0.000000e+00 : f32
    %741 = vector.broadcast %cst_547 : f32 to vector<2x128xf32>
    %742 = arith.maximumf %740, %741 : vector<2x128xf32>
    %743 = vector.broadcast %224 : f32 to vector<2x128xf32>
    %744 = arith.mulf %742, %743 : vector<2x128xf32>
    %745 = arith.addf %718, %744 : vector<2x128xf32>
    %746 = vector.broadcast %225 : f32 to vector<2x128xf32>
    %747 = arith.mulf %742, %746 : vector<2x128xf32>
    %748 = arith.addf %721, %747 : vector<2x128xf32>
    %749 = vector.broadcast %226 : f32 to vector<2x128xf32>
    %750 = arith.mulf %742, %749 : vector<2x128xf32>
    %751 = arith.addf %724, %750 : vector<2x128xf32>
    %752 = vector.broadcast %227 : f32 to vector<2x128xf32>
    %753 = arith.mulf %742, %752 : vector<2x128xf32>
    %754 = arith.addf %727, %753 : vector<2x128xf32>
    %755 = vector.broadcast %17 : f32 to vector<2x128xf32>
    %756 = arith.mulf %293, %755 : vector<2x128xf32>
    %757 = vector.broadcast %49 : f32 to vector<2x128xf32>
    %758 = arith.mulf %295, %757 : vector<2x128xf32>
    %759 = arith.addf %756, %758 : vector<2x128xf32>
    %760 = vector.broadcast %81 : f32 to vector<2x128xf32>
    %761 = arith.mulf %297, %760 : vector<2x128xf32>
    %762 = arith.addf %759, %761 : vector<2x128xf32>
    %763 = vector.broadcast %113 : f32 to vector<2x128xf32>
    %764 = arith.mulf %299, %763 : vector<2x128xf32>
    %765 = arith.addf %762, %764 : vector<2x128xf32>
    %766 = vector.broadcast %145 : f32 to vector<2x128xf32>
    %767 = arith.addf %765, %766 : vector<2x128xf32>
    %cst_548 = arith.constant 0.000000e+00 : f32
    %768 = vector.broadcast %cst_548 : f32 to vector<2x128xf32>
    %769 = arith.maximumf %767, %768 : vector<2x128xf32>
    %770 = vector.broadcast %228 : f32 to vector<2x128xf32>
    %771 = arith.mulf %769, %770 : vector<2x128xf32>
    %772 = arith.addf %745, %771 : vector<2x128xf32>
    %773 = vector.broadcast %229 : f32 to vector<2x128xf32>
    %774 = arith.mulf %769, %773 : vector<2x128xf32>
    %775 = arith.addf %748, %774 : vector<2x128xf32>
    %776 = vector.broadcast %230 : f32 to vector<2x128xf32>
    %777 = arith.mulf %769, %776 : vector<2x128xf32>
    %778 = arith.addf %751, %777 : vector<2x128xf32>
    %779 = vector.broadcast %231 : f32 to vector<2x128xf32>
    %780 = arith.mulf %769, %779 : vector<2x128xf32>
    %781 = arith.addf %754, %780 : vector<2x128xf32>
    %782 = vector.broadcast %18 : f32 to vector<2x128xf32>
    %783 = arith.mulf %293, %782 : vector<2x128xf32>
    %784 = vector.broadcast %50 : f32 to vector<2x128xf32>
    %785 = arith.mulf %295, %784 : vector<2x128xf32>
    %786 = arith.addf %783, %785 : vector<2x128xf32>
    %787 = vector.broadcast %82 : f32 to vector<2x128xf32>
    %788 = arith.mulf %297, %787 : vector<2x128xf32>
    %789 = arith.addf %786, %788 : vector<2x128xf32>
    %790 = vector.broadcast %114 : f32 to vector<2x128xf32>
    %791 = arith.mulf %299, %790 : vector<2x128xf32>
    %792 = arith.addf %789, %791 : vector<2x128xf32>
    %793 = vector.broadcast %146 : f32 to vector<2x128xf32>
    %794 = arith.addf %792, %793 : vector<2x128xf32>
    %cst_549 = arith.constant 0.000000e+00 : f32
    %795 = vector.broadcast %cst_549 : f32 to vector<2x128xf32>
    %796 = arith.maximumf %794, %795 : vector<2x128xf32>
    %797 = vector.broadcast %232 : f32 to vector<2x128xf32>
    %798 = arith.mulf %796, %797 : vector<2x128xf32>
    %799 = arith.addf %772, %798 : vector<2x128xf32>
    %800 = vector.broadcast %233 : f32 to vector<2x128xf32>
    %801 = arith.mulf %796, %800 : vector<2x128xf32>
    %802 = arith.addf %775, %801 : vector<2x128xf32>
    %803 = vector.broadcast %234 : f32 to vector<2x128xf32>
    %804 = arith.mulf %796, %803 : vector<2x128xf32>
    %805 = arith.addf %778, %804 : vector<2x128xf32>
    %806 = vector.broadcast %235 : f32 to vector<2x128xf32>
    %807 = arith.mulf %796, %806 : vector<2x128xf32>
    %808 = arith.addf %781, %807 : vector<2x128xf32>
    %809 = vector.broadcast %19 : f32 to vector<2x128xf32>
    %810 = arith.mulf %293, %809 : vector<2x128xf32>
    %811 = vector.broadcast %51 : f32 to vector<2x128xf32>
    %812 = arith.mulf %295, %811 : vector<2x128xf32>
    %813 = arith.addf %810, %812 : vector<2x128xf32>
    %814 = vector.broadcast %83 : f32 to vector<2x128xf32>
    %815 = arith.mulf %297, %814 : vector<2x128xf32>
    %816 = arith.addf %813, %815 : vector<2x128xf32>
    %817 = vector.broadcast %115 : f32 to vector<2x128xf32>
    %818 = arith.mulf %299, %817 : vector<2x128xf32>
    %819 = arith.addf %816, %818 : vector<2x128xf32>
    %820 = vector.broadcast %147 : f32 to vector<2x128xf32>
    %821 = arith.addf %819, %820 : vector<2x128xf32>
    %cst_550 = arith.constant 0.000000e+00 : f32
    %822 = vector.broadcast %cst_550 : f32 to vector<2x128xf32>
    %823 = arith.maximumf %821, %822 : vector<2x128xf32>
    %824 = vector.broadcast %236 : f32 to vector<2x128xf32>
    %825 = arith.mulf %823, %824 : vector<2x128xf32>
    %826 = arith.addf %799, %825 : vector<2x128xf32>
    %827 = vector.broadcast %237 : f32 to vector<2x128xf32>
    %828 = arith.mulf %823, %827 : vector<2x128xf32>
    %829 = arith.addf %802, %828 : vector<2x128xf32>
    %830 = vector.broadcast %238 : f32 to vector<2x128xf32>
    %831 = arith.mulf %823, %830 : vector<2x128xf32>
    %832 = arith.addf %805, %831 : vector<2x128xf32>
    %833 = vector.broadcast %239 : f32 to vector<2x128xf32>
    %834 = arith.mulf %823, %833 : vector<2x128xf32>
    %835 = arith.addf %808, %834 : vector<2x128xf32>
    %836 = vector.broadcast %20 : f32 to vector<2x128xf32>
    %837 = arith.mulf %293, %836 : vector<2x128xf32>
    %838 = vector.broadcast %52 : f32 to vector<2x128xf32>
    %839 = arith.mulf %295, %838 : vector<2x128xf32>
    %840 = arith.addf %837, %839 : vector<2x128xf32>
    %841 = vector.broadcast %84 : f32 to vector<2x128xf32>
    %842 = arith.mulf %297, %841 : vector<2x128xf32>
    %843 = arith.addf %840, %842 : vector<2x128xf32>
    %844 = vector.broadcast %116 : f32 to vector<2x128xf32>
    %845 = arith.mulf %299, %844 : vector<2x128xf32>
    %846 = arith.addf %843, %845 : vector<2x128xf32>
    %847 = vector.broadcast %148 : f32 to vector<2x128xf32>
    %848 = arith.addf %846, %847 : vector<2x128xf32>
    %cst_551 = arith.constant 0.000000e+00 : f32
    %849 = vector.broadcast %cst_551 : f32 to vector<2x128xf32>
    %850 = arith.maximumf %848, %849 : vector<2x128xf32>
    %851 = vector.broadcast %240 : f32 to vector<2x128xf32>
    %852 = arith.mulf %850, %851 : vector<2x128xf32>
    %853 = arith.addf %826, %852 : vector<2x128xf32>
    %854 = vector.broadcast %241 : f32 to vector<2x128xf32>
    %855 = arith.mulf %850, %854 : vector<2x128xf32>
    %856 = arith.addf %829, %855 : vector<2x128xf32>
    %857 = vector.broadcast %242 : f32 to vector<2x128xf32>
    %858 = arith.mulf %850, %857 : vector<2x128xf32>
    %859 = arith.addf %832, %858 : vector<2x128xf32>
    %860 = vector.broadcast %243 : f32 to vector<2x128xf32>
    %861 = arith.mulf %850, %860 : vector<2x128xf32>
    %862 = arith.addf %835, %861 : vector<2x128xf32>
    %863 = vector.broadcast %21 : f32 to vector<2x128xf32>
    %864 = arith.mulf %293, %863 : vector<2x128xf32>
    %865 = vector.broadcast %53 : f32 to vector<2x128xf32>
    %866 = arith.mulf %295, %865 : vector<2x128xf32>
    %867 = arith.addf %864, %866 : vector<2x128xf32>
    %868 = vector.broadcast %85 : f32 to vector<2x128xf32>
    %869 = arith.mulf %297, %868 : vector<2x128xf32>
    %870 = arith.addf %867, %869 : vector<2x128xf32>
    %871 = vector.broadcast %117 : f32 to vector<2x128xf32>
    %872 = arith.mulf %299, %871 : vector<2x128xf32>
    %873 = arith.addf %870, %872 : vector<2x128xf32>
    %874 = vector.broadcast %149 : f32 to vector<2x128xf32>
    %875 = arith.addf %873, %874 : vector<2x128xf32>
    %cst_552 = arith.constant 0.000000e+00 : f32
    %876 = vector.broadcast %cst_552 : f32 to vector<2x128xf32>
    %877 = arith.maximumf %875, %876 : vector<2x128xf32>
    %878 = vector.broadcast %244 : f32 to vector<2x128xf32>
    %879 = arith.mulf %877, %878 : vector<2x128xf32>
    %880 = arith.addf %853, %879 : vector<2x128xf32>
    %881 = vector.broadcast %245 : f32 to vector<2x128xf32>
    %882 = arith.mulf %877, %881 : vector<2x128xf32>
    %883 = arith.addf %856, %882 : vector<2x128xf32>
    %884 = vector.broadcast %246 : f32 to vector<2x128xf32>
    %885 = arith.mulf %877, %884 : vector<2x128xf32>
    %886 = arith.addf %859, %885 : vector<2x128xf32>
    %887 = vector.broadcast %247 : f32 to vector<2x128xf32>
    %888 = arith.mulf %877, %887 : vector<2x128xf32>
    %889 = arith.addf %862, %888 : vector<2x128xf32>
    %890 = vector.broadcast %22 : f32 to vector<2x128xf32>
    %891 = arith.mulf %293, %890 : vector<2x128xf32>
    %892 = vector.broadcast %54 : f32 to vector<2x128xf32>
    %893 = arith.mulf %295, %892 : vector<2x128xf32>
    %894 = arith.addf %891, %893 : vector<2x128xf32>
    %895 = vector.broadcast %86 : f32 to vector<2x128xf32>
    %896 = arith.mulf %297, %895 : vector<2x128xf32>
    %897 = arith.addf %894, %896 : vector<2x128xf32>
    %898 = vector.broadcast %118 : f32 to vector<2x128xf32>
    %899 = arith.mulf %299, %898 : vector<2x128xf32>
    %900 = arith.addf %897, %899 : vector<2x128xf32>
    %901 = vector.broadcast %150 : f32 to vector<2x128xf32>
    %902 = arith.addf %900, %901 : vector<2x128xf32>
    %cst_553 = arith.constant 0.000000e+00 : f32
    %903 = vector.broadcast %cst_553 : f32 to vector<2x128xf32>
    %904 = arith.maximumf %902, %903 : vector<2x128xf32>
    %905 = vector.broadcast %248 : f32 to vector<2x128xf32>
    %906 = arith.mulf %904, %905 : vector<2x128xf32>
    %907 = arith.addf %880, %906 : vector<2x128xf32>
    %908 = vector.broadcast %249 : f32 to vector<2x128xf32>
    %909 = arith.mulf %904, %908 : vector<2x128xf32>
    %910 = arith.addf %883, %909 : vector<2x128xf32>
    %911 = vector.broadcast %250 : f32 to vector<2x128xf32>
    %912 = arith.mulf %904, %911 : vector<2x128xf32>
    %913 = arith.addf %886, %912 : vector<2x128xf32>
    %914 = vector.broadcast %251 : f32 to vector<2x128xf32>
    %915 = arith.mulf %904, %914 : vector<2x128xf32>
    %916 = arith.addf %889, %915 : vector<2x128xf32>
    %917 = vector.broadcast %23 : f32 to vector<2x128xf32>
    %918 = arith.mulf %293, %917 : vector<2x128xf32>
    %919 = vector.broadcast %55 : f32 to vector<2x128xf32>
    %920 = arith.mulf %295, %919 : vector<2x128xf32>
    %921 = arith.addf %918, %920 : vector<2x128xf32>
    %922 = vector.broadcast %87 : f32 to vector<2x128xf32>
    %923 = arith.mulf %297, %922 : vector<2x128xf32>
    %924 = arith.addf %921, %923 : vector<2x128xf32>
    %925 = vector.broadcast %119 : f32 to vector<2x128xf32>
    %926 = arith.mulf %299, %925 : vector<2x128xf32>
    %927 = arith.addf %924, %926 : vector<2x128xf32>
    %928 = vector.broadcast %151 : f32 to vector<2x128xf32>
    %929 = arith.addf %927, %928 : vector<2x128xf32>
    %cst_554 = arith.constant 0.000000e+00 : f32
    %930 = vector.broadcast %cst_554 : f32 to vector<2x128xf32>
    %931 = arith.maximumf %929, %930 : vector<2x128xf32>
    %932 = vector.broadcast %252 : f32 to vector<2x128xf32>
    %933 = arith.mulf %931, %932 : vector<2x128xf32>
    %934 = arith.addf %907, %933 : vector<2x128xf32>
    %935 = vector.broadcast %253 : f32 to vector<2x128xf32>
    %936 = arith.mulf %931, %935 : vector<2x128xf32>
    %937 = arith.addf %910, %936 : vector<2x128xf32>
    %938 = vector.broadcast %254 : f32 to vector<2x128xf32>
    %939 = arith.mulf %931, %938 : vector<2x128xf32>
    %940 = arith.addf %913, %939 : vector<2x128xf32>
    %941 = vector.broadcast %255 : f32 to vector<2x128xf32>
    %942 = arith.mulf %931, %941 : vector<2x128xf32>
    %943 = arith.addf %916, %942 : vector<2x128xf32>
    %944 = vector.broadcast %24 : f32 to vector<2x128xf32>
    %945 = arith.mulf %293, %944 : vector<2x128xf32>
    %946 = vector.broadcast %56 : f32 to vector<2x128xf32>
    %947 = arith.mulf %295, %946 : vector<2x128xf32>
    %948 = arith.addf %945, %947 : vector<2x128xf32>
    %949 = vector.broadcast %88 : f32 to vector<2x128xf32>
    %950 = arith.mulf %297, %949 : vector<2x128xf32>
    %951 = arith.addf %948, %950 : vector<2x128xf32>
    %952 = vector.broadcast %120 : f32 to vector<2x128xf32>
    %953 = arith.mulf %299, %952 : vector<2x128xf32>
    %954 = arith.addf %951, %953 : vector<2x128xf32>
    %955 = vector.broadcast %152 : f32 to vector<2x128xf32>
    %956 = arith.addf %954, %955 : vector<2x128xf32>
    %cst_555 = arith.constant 0.000000e+00 : f32
    %957 = vector.broadcast %cst_555 : f32 to vector<2x128xf32>
    %958 = arith.maximumf %956, %957 : vector<2x128xf32>
    %959 = vector.broadcast %256 : f32 to vector<2x128xf32>
    %960 = arith.mulf %958, %959 : vector<2x128xf32>
    %961 = arith.addf %934, %960 : vector<2x128xf32>
    %962 = vector.broadcast %257 : f32 to vector<2x128xf32>
    %963 = arith.mulf %958, %962 : vector<2x128xf32>
    %964 = arith.addf %937, %963 : vector<2x128xf32>
    %965 = vector.broadcast %258 : f32 to vector<2x128xf32>
    %966 = arith.mulf %958, %965 : vector<2x128xf32>
    %967 = arith.addf %940, %966 : vector<2x128xf32>
    %968 = vector.broadcast %259 : f32 to vector<2x128xf32>
    %969 = arith.mulf %958, %968 : vector<2x128xf32>
    %970 = arith.addf %943, %969 : vector<2x128xf32>
    %971 = vector.broadcast %25 : f32 to vector<2x128xf32>
    %972 = arith.mulf %293, %971 : vector<2x128xf32>
    %973 = vector.broadcast %57 : f32 to vector<2x128xf32>
    %974 = arith.mulf %295, %973 : vector<2x128xf32>
    %975 = arith.addf %972, %974 : vector<2x128xf32>
    %976 = vector.broadcast %89 : f32 to vector<2x128xf32>
    %977 = arith.mulf %297, %976 : vector<2x128xf32>
    %978 = arith.addf %975, %977 : vector<2x128xf32>
    %979 = vector.broadcast %121 : f32 to vector<2x128xf32>
    %980 = arith.mulf %299, %979 : vector<2x128xf32>
    %981 = arith.addf %978, %980 : vector<2x128xf32>
    %982 = vector.broadcast %153 : f32 to vector<2x128xf32>
    %983 = arith.addf %981, %982 : vector<2x128xf32>
    %cst_556 = arith.constant 0.000000e+00 : f32
    %984 = vector.broadcast %cst_556 : f32 to vector<2x128xf32>
    %985 = arith.maximumf %983, %984 : vector<2x128xf32>
    %986 = vector.broadcast %260 : f32 to vector<2x128xf32>
    %987 = arith.mulf %985, %986 : vector<2x128xf32>
    %988 = arith.addf %961, %987 : vector<2x128xf32>
    %989 = vector.broadcast %261 : f32 to vector<2x128xf32>
    %990 = arith.mulf %985, %989 : vector<2x128xf32>
    %991 = arith.addf %964, %990 : vector<2x128xf32>
    %992 = vector.broadcast %262 : f32 to vector<2x128xf32>
    %993 = arith.mulf %985, %992 : vector<2x128xf32>
    %994 = arith.addf %967, %993 : vector<2x128xf32>
    %995 = vector.broadcast %263 : f32 to vector<2x128xf32>
    %996 = arith.mulf %985, %995 : vector<2x128xf32>
    %997 = arith.addf %970, %996 : vector<2x128xf32>
    %998 = vector.broadcast %26 : f32 to vector<2x128xf32>
    %999 = arith.mulf %293, %998 : vector<2x128xf32>
    %1000 = vector.broadcast %58 : f32 to vector<2x128xf32>
    %1001 = arith.mulf %295, %1000 : vector<2x128xf32>
    %1002 = arith.addf %999, %1001 : vector<2x128xf32>
    %1003 = vector.broadcast %90 : f32 to vector<2x128xf32>
    %1004 = arith.mulf %297, %1003 : vector<2x128xf32>
    %1005 = arith.addf %1002, %1004 : vector<2x128xf32>
    %1006 = vector.broadcast %122 : f32 to vector<2x128xf32>
    %1007 = arith.mulf %299, %1006 : vector<2x128xf32>
    %1008 = arith.addf %1005, %1007 : vector<2x128xf32>
    %1009 = vector.broadcast %154 : f32 to vector<2x128xf32>
    %1010 = arith.addf %1008, %1009 : vector<2x128xf32>
    %cst_557 = arith.constant 0.000000e+00 : f32
    %1011 = vector.broadcast %cst_557 : f32 to vector<2x128xf32>
    %1012 = arith.maximumf %1010, %1011 : vector<2x128xf32>
    %1013 = vector.broadcast %264 : f32 to vector<2x128xf32>
    %1014 = arith.mulf %1012, %1013 : vector<2x128xf32>
    %1015 = arith.addf %988, %1014 : vector<2x128xf32>
    %1016 = vector.broadcast %265 : f32 to vector<2x128xf32>
    %1017 = arith.mulf %1012, %1016 : vector<2x128xf32>
    %1018 = arith.addf %991, %1017 : vector<2x128xf32>
    %1019 = vector.broadcast %266 : f32 to vector<2x128xf32>
    %1020 = arith.mulf %1012, %1019 : vector<2x128xf32>
    %1021 = arith.addf %994, %1020 : vector<2x128xf32>
    %1022 = vector.broadcast %267 : f32 to vector<2x128xf32>
    %1023 = arith.mulf %1012, %1022 : vector<2x128xf32>
    %1024 = arith.addf %997, %1023 : vector<2x128xf32>
    %1025 = vector.broadcast %27 : f32 to vector<2x128xf32>
    %1026 = arith.mulf %293, %1025 : vector<2x128xf32>
    %1027 = vector.broadcast %59 : f32 to vector<2x128xf32>
    %1028 = arith.mulf %295, %1027 : vector<2x128xf32>
    %1029 = arith.addf %1026, %1028 : vector<2x128xf32>
    %1030 = vector.broadcast %91 : f32 to vector<2x128xf32>
    %1031 = arith.mulf %297, %1030 : vector<2x128xf32>
    %1032 = arith.addf %1029, %1031 : vector<2x128xf32>
    %1033 = vector.broadcast %123 : f32 to vector<2x128xf32>
    %1034 = arith.mulf %299, %1033 : vector<2x128xf32>
    %1035 = arith.addf %1032, %1034 : vector<2x128xf32>
    %1036 = vector.broadcast %155 : f32 to vector<2x128xf32>
    %1037 = arith.addf %1035, %1036 : vector<2x128xf32>
    %cst_558 = arith.constant 0.000000e+00 : f32
    %1038 = vector.broadcast %cst_558 : f32 to vector<2x128xf32>
    %1039 = arith.maximumf %1037, %1038 : vector<2x128xf32>
    %1040 = vector.broadcast %268 : f32 to vector<2x128xf32>
    %1041 = arith.mulf %1039, %1040 : vector<2x128xf32>
    %1042 = arith.addf %1015, %1041 : vector<2x128xf32>
    %1043 = vector.broadcast %269 : f32 to vector<2x128xf32>
    %1044 = arith.mulf %1039, %1043 : vector<2x128xf32>
    %1045 = arith.addf %1018, %1044 : vector<2x128xf32>
    %1046 = vector.broadcast %270 : f32 to vector<2x128xf32>
    %1047 = arith.mulf %1039, %1046 : vector<2x128xf32>
    %1048 = arith.addf %1021, %1047 : vector<2x128xf32>
    %1049 = vector.broadcast %271 : f32 to vector<2x128xf32>
    %1050 = arith.mulf %1039, %1049 : vector<2x128xf32>
    %1051 = arith.addf %1024, %1050 : vector<2x128xf32>
    %1052 = vector.broadcast %28 : f32 to vector<2x128xf32>
    %1053 = arith.mulf %293, %1052 : vector<2x128xf32>
    %1054 = vector.broadcast %60 : f32 to vector<2x128xf32>
    %1055 = arith.mulf %295, %1054 : vector<2x128xf32>
    %1056 = arith.addf %1053, %1055 : vector<2x128xf32>
    %1057 = vector.broadcast %92 : f32 to vector<2x128xf32>
    %1058 = arith.mulf %297, %1057 : vector<2x128xf32>
    %1059 = arith.addf %1056, %1058 : vector<2x128xf32>
    %1060 = vector.broadcast %124 : f32 to vector<2x128xf32>
    %1061 = arith.mulf %299, %1060 : vector<2x128xf32>
    %1062 = arith.addf %1059, %1061 : vector<2x128xf32>
    %1063 = vector.broadcast %156 : f32 to vector<2x128xf32>
    %1064 = arith.addf %1062, %1063 : vector<2x128xf32>
    %cst_559 = arith.constant 0.000000e+00 : f32
    %1065 = vector.broadcast %cst_559 : f32 to vector<2x128xf32>
    %1066 = arith.maximumf %1064, %1065 : vector<2x128xf32>
    %1067 = vector.broadcast %272 : f32 to vector<2x128xf32>
    %1068 = arith.mulf %1066, %1067 : vector<2x128xf32>
    %1069 = arith.addf %1042, %1068 : vector<2x128xf32>
    %1070 = vector.broadcast %273 : f32 to vector<2x128xf32>
    %1071 = arith.mulf %1066, %1070 : vector<2x128xf32>
    %1072 = arith.addf %1045, %1071 : vector<2x128xf32>
    %1073 = vector.broadcast %274 : f32 to vector<2x128xf32>
    %1074 = arith.mulf %1066, %1073 : vector<2x128xf32>
    %1075 = arith.addf %1048, %1074 : vector<2x128xf32>
    %1076 = vector.broadcast %275 : f32 to vector<2x128xf32>
    %1077 = arith.mulf %1066, %1076 : vector<2x128xf32>
    %1078 = arith.addf %1051, %1077 : vector<2x128xf32>
    %1079 = vector.broadcast %29 : f32 to vector<2x128xf32>
    %1080 = arith.mulf %293, %1079 : vector<2x128xf32>
    %1081 = vector.broadcast %61 : f32 to vector<2x128xf32>
    %1082 = arith.mulf %295, %1081 : vector<2x128xf32>
    %1083 = arith.addf %1080, %1082 : vector<2x128xf32>
    %1084 = vector.broadcast %93 : f32 to vector<2x128xf32>
    %1085 = arith.mulf %297, %1084 : vector<2x128xf32>
    %1086 = arith.addf %1083, %1085 : vector<2x128xf32>
    %1087 = vector.broadcast %125 : f32 to vector<2x128xf32>
    %1088 = arith.mulf %299, %1087 : vector<2x128xf32>
    %1089 = arith.addf %1086, %1088 : vector<2x128xf32>
    %1090 = vector.broadcast %157 : f32 to vector<2x128xf32>
    %1091 = arith.addf %1089, %1090 : vector<2x128xf32>
    %cst_560 = arith.constant 0.000000e+00 : f32
    %1092 = vector.broadcast %cst_560 : f32 to vector<2x128xf32>
    %1093 = arith.maximumf %1091, %1092 : vector<2x128xf32>
    %1094 = vector.broadcast %276 : f32 to vector<2x128xf32>
    %1095 = arith.mulf %1093, %1094 : vector<2x128xf32>
    %1096 = arith.addf %1069, %1095 : vector<2x128xf32>
    %1097 = vector.broadcast %277 : f32 to vector<2x128xf32>
    %1098 = arith.mulf %1093, %1097 : vector<2x128xf32>
    %1099 = arith.addf %1072, %1098 : vector<2x128xf32>
    %1100 = vector.broadcast %278 : f32 to vector<2x128xf32>
    %1101 = arith.mulf %1093, %1100 : vector<2x128xf32>
    %1102 = arith.addf %1075, %1101 : vector<2x128xf32>
    %1103 = vector.broadcast %279 : f32 to vector<2x128xf32>
    %1104 = arith.mulf %1093, %1103 : vector<2x128xf32>
    %1105 = arith.addf %1078, %1104 : vector<2x128xf32>
    %1106 = vector.broadcast %30 : f32 to vector<2x128xf32>
    %1107 = arith.mulf %293, %1106 : vector<2x128xf32>
    %1108 = vector.broadcast %62 : f32 to vector<2x128xf32>
    %1109 = arith.mulf %295, %1108 : vector<2x128xf32>
    %1110 = arith.addf %1107, %1109 : vector<2x128xf32>
    %1111 = vector.broadcast %94 : f32 to vector<2x128xf32>
    %1112 = arith.mulf %297, %1111 : vector<2x128xf32>
    %1113 = arith.addf %1110, %1112 : vector<2x128xf32>
    %1114 = vector.broadcast %126 : f32 to vector<2x128xf32>
    %1115 = arith.mulf %299, %1114 : vector<2x128xf32>
    %1116 = arith.addf %1113, %1115 : vector<2x128xf32>
    %1117 = vector.broadcast %158 : f32 to vector<2x128xf32>
    %1118 = arith.addf %1116, %1117 : vector<2x128xf32>
    %cst_561 = arith.constant 0.000000e+00 : f32
    %1119 = vector.broadcast %cst_561 : f32 to vector<2x128xf32>
    %1120 = arith.maximumf %1118, %1119 : vector<2x128xf32>
    %1121 = vector.broadcast %280 : f32 to vector<2x128xf32>
    %1122 = arith.mulf %1120, %1121 : vector<2x128xf32>
    %1123 = arith.addf %1096, %1122 : vector<2x128xf32>
    %1124 = vector.broadcast %281 : f32 to vector<2x128xf32>
    %1125 = arith.mulf %1120, %1124 : vector<2x128xf32>
    %1126 = arith.addf %1099, %1125 : vector<2x128xf32>
    %1127 = vector.broadcast %282 : f32 to vector<2x128xf32>
    %1128 = arith.mulf %1120, %1127 : vector<2x128xf32>
    %1129 = arith.addf %1102, %1128 : vector<2x128xf32>
    %1130 = vector.broadcast %283 : f32 to vector<2x128xf32>
    %1131 = arith.mulf %1120, %1130 : vector<2x128xf32>
    %1132 = arith.addf %1105, %1131 : vector<2x128xf32>
    %1133 = vector.broadcast %31 : f32 to vector<2x128xf32>
    %1134 = arith.mulf %293, %1133 : vector<2x128xf32>
    %1135 = vector.broadcast %63 : f32 to vector<2x128xf32>
    %1136 = arith.mulf %295, %1135 : vector<2x128xf32>
    %1137 = arith.addf %1134, %1136 : vector<2x128xf32>
    %1138 = vector.broadcast %95 : f32 to vector<2x128xf32>
    %1139 = arith.mulf %297, %1138 : vector<2x128xf32>
    %1140 = arith.addf %1137, %1139 : vector<2x128xf32>
    %1141 = vector.broadcast %127 : f32 to vector<2x128xf32>
    %1142 = arith.mulf %299, %1141 : vector<2x128xf32>
    %1143 = arith.addf %1140, %1142 : vector<2x128xf32>
    %1144 = vector.broadcast %159 : f32 to vector<2x128xf32>
    %1145 = arith.addf %1143, %1144 : vector<2x128xf32>
    %cst_562 = arith.constant 0.000000e+00 : f32
    %1146 = vector.broadcast %cst_562 : f32 to vector<2x128xf32>
    %1147 = arith.maximumf %1145, %1146 : vector<2x128xf32>
    %1148 = vector.broadcast %284 : f32 to vector<2x128xf32>
    %1149 = arith.mulf %1147, %1148 : vector<2x128xf32>
    %1150 = arith.addf %1123, %1149 : vector<2x128xf32>
    %1151 = vector.broadcast %285 : f32 to vector<2x128xf32>
    %1152 = arith.mulf %1147, %1151 : vector<2x128xf32>
    %1153 = arith.addf %1126, %1152 : vector<2x128xf32>
    %1154 = vector.broadcast %286 : f32 to vector<2x128xf32>
    %1155 = arith.mulf %1147, %1154 : vector<2x128xf32>
    %1156 = arith.addf %1129, %1155 : vector<2x128xf32>
    %1157 = vector.broadcast %287 : f32 to vector<2x128xf32>
    %1158 = arith.mulf %1147, %1157 : vector<2x128xf32>
    %1159 = arith.addf %1132, %1158 : vector<2x128xf32>
    %1160 = vector.broadcast %288 : f32 to vector<2x128xf32>
    %1161 = arith.addf %1150, %1160 : vector<2x128xf32>
    %c0_563 = arith.constant 0 : index
    %c0_564 = arith.constant 0 : index
    %c0_565 = arith.constant 0 : index
    %c0_566 = arith.constant 0 : index
    %1162 = vector.load %arg7[%c0_563, %c0_564, %c0_565, %c0_566] : memref<1x4x2x128xf32, #tpu.memory_space<vmem>>, vector<1x1x2x128xf32>
    %1163 = vector.shape_cast %1162 : vector<1x1x2x128xf32> to vector<2x128xf32>
    %1164 = vector.shape_cast %1161 : vector<2x128xf32> to vector<1x1x2x128xf32>
    tpu.vector_store %arg7[%c0_563, %c0_564, %c0_565, %c0_566], %1164 {strides = array<i32>} : memref<1x4x2x128xf32, #tpu.memory_space<vmem>>, vector<1x1x2x128xf32>,
    %1165 = vector.broadcast %289 : f32 to vector<2x128xf32>
    %1166 = arith.addf %1153, %1165 : vector<2x128xf32>
    %c0_567 = arith.constant 0 : index
    %c1_568 = arith.constant 1 : index
    %c0_569 = arith.constant 0 : index
    %c0_570 = arith.constant 0 : index
    %1167 = vector.load %arg7[%c0_567, %c1_568, %c0_569, %c0_570] : memref<1x4x2x128xf32, #tpu.memory_space<vmem>>, vector<1x1x2x128xf32>
    %1168 = vector.shape_cast %1167 : vector<1x1x2x128xf32> to vector<2x128xf32>
    %1169 = vector.shape_cast %1166 : vector<2x128xf32> to vector<1x1x2x128xf32>
    tpu.vector_store %arg7[%c0_567, %c1_568, %c0_569, %c0_570], %1169 {strides = array<i32>} : memref<1x4x2x128xf32, #tpu.memory_space<vmem>>, vector<1x1x2x128xf32>,
    %1170 = vector.broadcast %290 : f32 to vector<2x128xf32>
    %1171 = arith.addf %1156, %1170 : vector<2x128xf32>
    %c0_571 = arith.constant 0 : index
    %c2_572 = arith.constant 2 : index
    %c0_573 = arith.constant 0 : index
    %c0_574 = arith.constant 0 : index
    %1172 = vector.load %arg7[%c0_571, %c2_572, %c0_573, %c0_574] : memref<1x4x2x128xf32, #tpu.memory_space<vmem>>, vector<1x1x2x128xf32>
    %1173 = vector.shape_cast %1172 : vector<1x1x2x128xf32> to vector<2x128xf32>
    %1174 = vector.shape_cast %1171 : vector<2x128xf32> to vector<1x1x2x128xf32>
    tpu.vector_store %arg7[%c0_571, %c2_572, %c0_573, %c0_574], %1174 {strides = array<i32>} : memref<1x4x2x128xf32, #tpu.memory_space<vmem>>, vector<1x1x2x128xf32>,
    %1175 = vector.broadcast %291 : f32 to vector<2x128xf32>
    %1176 = arith.addf %1159, %1175 : vector<2x128xf32>
    %c0_575 = arith.constant 0 : index
    %c3_576 = arith.constant 3 : index
    %c0_577 = arith.constant 0 : index
    %c0_578 = arith.constant 0 : index
    %1177 = vector.load %arg7[%c0_575, %c3_576, %c0_577, %c0_578] : memref<1x4x2x128xf32, #tpu.memory_space<vmem>>, vector<1x1x2x128xf32>
    %1178 = vector.shape_cast %1177 : vector<1x1x2x128xf32> to vector<2x128xf32>
    %1179 = vector.shape_cast %1176 : vector<2x128xf32> to vector<1x1x2x128xf32>
    tpu.vector_store %arg7[%c0_575, %c3_576, %c0_577, %c0_578], %1179 {strides = array<i32>} : memref<1x4x2x128xf32, #tpu.memory_space<vmem>>, vector<1x1x2x128xf32>,
    return
  }
  func.func @transform_0(%arg0: i32, %arg1: i32) -> (i32, i32, i32, i32) {
    %c0_i32 = arith.constant 0 : i32
    %c0_i32_0 = arith.constant 0 : i32
    %c0_i32_1 = arith.constant 0 : i32
    return %arg0, %c0_i32, %arg1, %c0_i32_0 : i32, i32, i32, i32
  }
  func.func @transform_1(%arg0: i32, %arg1: i32) -> (i32, i32) {
    %c0_i32 = arith.constant 0 : i32
    %c0_i32_0 = arith.constant 0 : i32
    %c0_i32_1 = arith.constant 0 : i32
    return %c0_i32, %c0_i32_0 : i32, i32
  }
  func.func @transform_2(%arg0: i32, %arg1: i32) -> i32 {
    %c0_i32 = arith.constant 0 : i32
    %c0_i32_0 = arith.constant 0 : i32
    return %c0_i32 : i32
  }
  func.func @transform_3(%arg0: i32, %arg1: i32) -> (i32, i32) {
    %c0_i32 = arith.constant 0 : i32
    %c0_i32_0 = arith.constant 0 : i32
    %c0_i32_1 = arith.constant 0 : i32
    return %c0_i32, %c0_i32_0 : i32, i32
  }
  func.func @transform_4(%arg0: i32, %arg1: i32) -> i32 {
    %c0_i32 = arith.constant 0 : i32
    %c0_i32_0 = arith.constant 0 : i32
    return %c0_i32 : i32
  }
  func.func @transform_5(%arg0: i32, %arg1: i32) -> (i32, i32, i32, i32) {
    %c0_i32 = arith.constant 0 : i32
    %c0_i32_0 = arith.constant 0 : i32
    %c0_i32_1 = arith.constant 0 : i32
    return %arg0, %c0_i32, %arg1, %c0_i32_0 : i32, i32, i32, i32
  }
}

</mosaic_0001>

<bundles_post_ra>
// kernel: _lambda_.1
= control target key start
LH: loop header
LB: loop body
LE: loop exit
PB: predicated region body
PF: predicated region fallthrough
CT: control target
= control target key end

     0   :  { %s3587_s0 = inlined_call_operand.vmem [shape: f32[2,4,2,128], index: 0, kind: input, shape index: {}]   ;;  %s3588_s1 = inlined_call_operand.vmem [shape: f32[4,32], index: 1, kind: input, shape index: {}]   ;;  %s3589_s2 = inlined_call_operand.vmem [shape: f32[32], index: 2, kind: input, shape index: {}]   ;;  %s3590_s3 = inlined_call_operand.vmem [shape: f32[32,4], index: 3, kind: input, shape index: {}]   ;;  %s3591_s4 = inlined_call_operand.vmem [shape: f32[4], index: 4, kind: input, shape index: {}]   ;;  %s3592_s5 = inlined_call_operand.vmem [shape: f32[2,4,2,128], index: 5, kind: output, shape index: {}]  }
   0x1   :  { %3597 = sst [smem:[#allocation12_spill]] %s3587_s0 }
   0x2   :  { %10 = vsyncpa [#allocation3], 0 }
   0x3   :  { %11 = vsyncpa [#allocation5], 0 }
   0x4   :  { %12 = vsyncpa [#allocation8], 0  ;;  %s2095_s18 = smov 0   ;;  %s2097_s19 = smov 0  }
   0x5   :  { %s2099_s20 = smov 0  }
   0x6 LB: > { %s199_s23 = sshll.u32 %s3589_s2, 4  ;;  %s1577_s24 = sadd.s32 4294967295, %s2057_s20   ;;  %s2057_s20 = sphi %s2099_s20, %s18_s20   ;;  %s2053_s19 = sphi %s2097_s19, %s3607_s19   ;;  %s2049_s18 = sphi %s2095_s18, %s3606_s18   ;;  %s200_s23 = int_to_ptr.vmem [resolvable:$true] %s199_s23 }
   0x7   : > { %p1579_p0 = scmp.ge.s32.totalorder %s2057_s20, 1  ;;  %p175_p1 = scmp.lt.s32.totalorder %s2057_s20, 3 }
   0x8   : > { %p2116_p2 = scmp.eq.s32.totalorder %s1577_s24, 0  ;;  %s30_s27 = sadd.s32 1, %s2053_s19 }
   0x9   : > { %p2120_p3 = pnand %p1579_p0, %p175_p1  ;;  %s188_s30 = sshll.u32 %s3588_s1, 4  ;;  %s189_s30 = int_to_ptr.vmem [resolvable:$true] %s188_s30 }
   0xa   : > { %s3598_s25 = scalar_select %p2116_p2, 1, 0 }
   0xb   : > { %s3599_s26 = scalar_select %p2120_p3, 1, 0 }
   0xc   : > { %p1908_p4 = pneg %p2120_p3  ;;  %p2136_p6 = scmp.ge.s32.totalorder %s30_s27, 2 }
   0xd   : > { %s209_s10 = sshll.u32 %s3590_s3, 4  ;;  %s1963_s11 = scalar_lea.vmem %s200_s23, 16  ;;  %s210_s10 = int_to_ptr.vmem [resolvable:$true] %s209_s10 }
   0xe   : > { %p2132_p5 = pnand %p2116_p2, %p1908_p4  ;;  %p1964_p7 = scmp.ne.s32.totalorder %s200_s23, %s1963_s11 }
   0xf   : > { %p1971_p11 = scmp.lt.s32.totalorder %s200_s23, %s200_s23  ;;  %p1972_p12 = scmp.lt.s32.totalorder %s1963_s11, %s1963_s11 }
  0x10   : > { %p1965_p8 = pneg %p2132_p5 }
  0x11   : > { %p1973_p13 = por %p1972_p12, %p1971_p11 }
  0x12   : > { %p1966_p9 = pnand %p1965_p8, %p1964_p7 }
  0x14   : > { %p1967_p10 = pneg %p1966_p9 }
  0x16   : > { %p1974_p0 = pnand %p1973_p13, %p1967_p10 }
  0x18   : > { %1977 = shalt.err (!%p1974_p0)
}
  0x19   : > { %s2059_s12 = smov [#allocation4]   ;;  %s3609_s27 = smov (%p2136_p6, %s30_s27), 0 }
  0x1a   : > { %1914 = dma.vmem_to_smem (!%p2132_p5), %s200_s23, 16, %s2059_s12, [#allocation5]  }
  0x1b   : > { %s1978_s13 = scalar_lea.vmem %s189_s30, 64  ;;  %p1986_p9 = scmp.lt.s32.totalorder %s189_s30, %s189_s30 }
  0x1c   : > { %p1979_p1 = scmp.ne.s32.totalorder %s189_s30, %s1978_s13  ;;  %p1987_p2 = scmp.lt.s32.totalorder %s1978_s13, %s1978_s13 }
  0x1e   : > { %p1981_p4 = pnand %p1979_p1, %p1965_p8  ;;  %p1988_p11 = por %p1987_p2, %p1986_p9 }
  0x20   : > { %p1982_p7 = pneg %p1981_p4 }
  0x22   : > { %p1989_p10 = pnand %p1988_p11, %p1982_p7 }
  0x24   : > { %1992 = shalt.err (!%p1989_p10)
}
  0x25   : > { %s2060_s14 = smov [#allocation2]   ;;  %s1993_s15 = scalar_lea.vmem %s210_s10, 512 }
  0x26   : > { %1911 = dma.vmem_to_smem (!%p2132_p5), %s189_s30, 64, %s2060_s14, [#allocation3]  }
  0x27   : > { %p1994_p6 = scmp.ne.s32.totalorder %s210_s10, %s1993_s15  ;;  %p2001_p0 = scmp.lt.s32.totalorder %s210_s10, %s210_s10 }
  0x28   : > { %p2002_p1 = scmp.lt.s32.totalorder %s1993_s15, %s1993_s15 }
  0x29   : > { %p1996_p12 = pnand %p1994_p6, %p1965_p8 }
  0x2a   : > { %p2003_p4 = por %p2002_p1, %p2001_p0 }
  0x2b   : > { %p1997_p13 = pneg %p1996_p12 }
  0x2d   : > { %p2004_p3 = pnand %p2003_p4, %p1997_p13 }
  0x2f   : > { %2007 = shalt.err (!%p2004_p3)
}
  0x30   : > { %s2061_s16 = smov [#allocation6]   ;;  %s2062_s17 = smov 128  }
  0x31   : > { %s2063_s21 = smov 8   ;;  %s223_s24 = sshll.u32 %s3591_s4, 4  ;;  %s224_s24 = int_to_ptr.vmem [resolvable:$true] %s223_s24 }
  0x32   : > { %1917 = dma.vmem_to_smem (!%p2132_p5), %s210_s10, 512, %s2061_s16, [#allocation5], %s2062_s17, %s2062_s17, %s2063_s21  }
  0x33   : > { %s2008_s28 = scalar_lea.vmem %s224_s24, 16  ;;  %p2016_p11 = scmp.lt.s32.totalorder %s224_s24, %s224_s24 }
  0x34   : > { %p2009_p2 = scmp.ne.s32.totalorder %s224_s24, %s2008_s28  ;;  %p2017_p3 = scmp.lt.s32.totalorder %s2008_s28, %s2008_s28 }
  0x36   : > { %p2011_p7 = pnand %p2009_p2, %p1965_p8  ;;  %p2018_p10 = por %p2017_p3, %p2016_p11 }
  0x38   : > { %p2012_p9 = pneg %p2011_p7 }
  0x3a   : > { %p2019_p6 = pnand %p2018_p10, %p2012_p9 }
  0x3c   : > { %2022 = shalt.err (!%p2019_p6)
}
  0x3d   : > { %s2064_s29 = smov [#allocation7]   ;;  %p3602_p12 = scmp.ne.s32.totalorder %s3599_s26, 0 }
  0x3e   : > { %1920 = dma.vmem_to_smem (!%p2132_p5), %s224_s24, 16, %s2064_s29, [#allocation8]  }
  0x3f   : > { %247 = sbr.rel (%p3602_p12) target bundleno = 303 (0x12f), region = 40  ;;  %p3603_p13 = scmp.ne.s32.totalorder (!%p3602_p12), %s3598_s25, 0 }
  0x46   : > { %2036 = dma.done.wait (%p3603_p13), [#allocation3], 64  }
  0x47   : > { %2038 = vsyncadd (%p3603_p13), [#allocation3], 4294967232 }
  0x48   : > { %2040 = dma.done.wait (%p3603_p13), [#allocation5], 528  }
  0x49   : > { %2042 = vsyncadd (%p3603_p13), [#allocation5], 4294966768 }
  0x4a   : > { %2044 = dma.done.wait (%p3603_p13), [#allocation8], 16  }
  0x4b   : > { %2046 = vsyncadd (%p3603_p13), [#allocation8], 4294967280 }
  0x4c   : > { %265 = sfence }
  0x4d   : > { %p294_p5 = scmp.lt.s32.totalorder %s2049_s18, 1  ;;  %s310_s30 = sld [smem:[#allocation2]] }
  0x4e   : > { %s1594_s6 = sld [smem:[#allocation2 + $0x1]]  ;;  %s1595_s7 = sld [smem:[#allocation2 + $0x2]] }
  0x4f   : > { %s3611_s18 = smov (!%p294_p5, %s2049_s18), 1  ;;  %s1596_s8 = sld [smem:[#allocation2 + $0x3]] }
  0x50   : > { %s3596_s26 = sshll.u32 %s3611_s18, 3  ;;  %s1597_s9 = sld [smem:[#allocation2 + $0x4]] }
  0x51   : > { %s3604_s0 = sld [smem:[#allocation12_spill]]  ;;  %s1598_s12 = sld [smem:[#allocation2 + $0x5]] }
  0x52   : > { %s2198_s13 = sld [smem:[#allocation2 + $0x6]]  ;;  %s2200_s14 = sld [smem:[#allocation2 + $0x7]] }
  0x53   : > { %s2202_s15 = sld [smem:[#allocation2 + $0x8]]  ;;  %s2204_s16 = sld [smem:[#allocation2 + $0x9]]  ;;  %v609_v1 = vstv %s310_s30 }
  0x54   : > { %s2206_s17 = sld [smem:[#allocation2 + $0xa]]  ;;  %s2208_s21 = sld [smem:[#allocation2 + $0xb]]  ;;  %v631_v2 = vstv %s1594_s6  ;;  %v657_v3 = vstv %s1595_s7 }
  0x55   : > { %s2210_s22 = sld [smem:[#allocation2 + $0xc]]  ;;  %s2212_s23 = sld [smem:[#allocation2 + $0xd]]  ;;  %v683_v4 = vstv %s1596_s8 }
  0x56   : > { %s2214_s24 = sld [smem:[#allocation2 + $0xe]]  ;;  %s2216_s28 = sld [smem:[#allocation2 + $0xf]]  ;;  %v709_v5 = vstv %s1597_s9 }
  0x57   : > { %s2196_s25 = scalar_lea.vmem %s3604_s0, %s3596_s26  ;;  %s2218_s29 = sld [smem:[#allocation2 + $0x10]]  ;;  %v735_v6 = vstv %s1598_s12 }
  0x58   : > { %s2220_s10 = sld [smem:[#allocation2 + $0x11]]  ;;  %v2223_v0 = vld [vmem:[%s2196_s25] sm:$0x3]  ;;  %s2225_s11 = sld [smem:[#allocation2 + $0x12]]  ;;  %v761_v13 = vstv %s2198_s13  ;;  %v787_v14 = vstv %s2200_s14  ;;  %v2299_v30 = vld [vmem:[%s2196_s25 + $0x2] sm:$0x3] }
  0x59   : > { %s2227_s26 = sld [smem:[#allocation2 + $0x13]]  ;;  %s2229_s0 = sld [smem:[#allocation2 + $0x14]]  ;;  %v2232_v7 = vmul.f32 %v609_v1, %v2223_v0  ;;  %v2235_v8 = vmul.f32 %v631_v2, %v2223_v0  ;;  %v2238_v9 = vmul.f32 %v657_v3, %v2223_v0  ;;  %v2243_v10 = vmul.f32 %v683_v4, %v2223_v0 }
  0x5a   : > { %s2240_s30 = sld [smem:[#allocation2 + $0x15]]  ;;  %v2246_v11 = vmul.f32 %v709_v5, %v2223_v0  ;;  %v2249_v12 = vmul.f32 %v735_v6, %v2223_v0  ;;  %s2252_s6 = sld [smem:[#allocation2 + $0x80]]  ;;  %v813_v15 = vstv %s2202_s15  ;;  %v839_v16 = vstv %s2204_s16 }
  0x5b   : > { %s2254_s7 = sld [smem:[#allocation2 + $0x81]]  ;;  %v865_v17 = vstv %s2206_s17  ;;  %s2260_s8 = sld [smem:[#allocation2 + $0x82]]  ;;  %v891_v18 = vstv %s2208_s21  ;;  %v917_v19 = vstv %s2210_s22  ;;  %v943_v20 = vstv %s2212_s23 }
  0x5c   : > { %s2262_s9 = sld [smem:[#allocation2 + $0x83]]  ;;  %v969_v21 = vstv %s2214_s24  ;;  %s2268_s12 = sld [smem:[#allocation2 + $0x84]]  ;;  %v2273_v22 = vmul.f32 %v761_v13, %v2223_v0  ;;  %v995_v23 = vstv %s2216_s28  ;;  %v2283_v26 = vmul.f32 %v787_v14, %v2223_v0 }
  0x5d   : > { %s2270_s13 = sld [smem:[#allocation2 + $0x85]]  ;;  %v1021_v24 = vstv %s2218_s29  ;;  %s2278_s14 = sld [smem:[#allocation2 + $0x86]]  ;;  %v2286_v27 = vmul.f32 %v813_v15, %v2223_v0  ;;  %v2289_v28 = vmul.f32 %v839_v16, %v2223_v0  ;;  %v2292_v29 = vmul.f32 %v865_v17, %v2223_v0 }
  0x5e   : > { %v1047_v25 = vstv %s2220_s10  ;;  %s2280_s15 = sld [smem:[#allocation2 + $0x87]]  ;;  %s2294_s16 = sld [smem:[#allocation2 + $0x88]]  ;;  %v2302_v31 = vmul.f32 %v891_v18, %v2223_v0  ;;  %v2305_v32 = vmul.f32 %v917_v19, %v2223_v0  ;;  %v2308_v33 = vmul.f32 %v943_v20, %v2223_v0 }
  0x5f   : > { %s2296_s17 = sld [smem:[#allocation2 + $0x89]]  ;;  %v2311_v34 = vmul.f32 %v969_v21, %v2223_v0  ;;  %s2313_s21 = sld [smem:[#allocation2 + $0x8a]]  ;;  %v2318_v35 = vmul.f32 %v995_v23, %v2223_v0  ;;  %v2321_v36 = vmul.f32 %v1021_v24, %v2223_v0  ;;  %v2324_v37 = vmul.f32 %v1047_v25, %v2223_v0 }
  0x60   : > { %s2315_s22 = sld [smem:[#allocation2 + $0x8b]]  ;;  %v1073_v38 = vstv %s2225_s11  ;;  %s2327_s23 = sld [smem:[#allocation2 + $0x8c]]  ;;  %v611_v39 = vstv %s2252_s6  ;;  %v1099_v41 = vstv %s2227_s26  ;;  %v1125_v42 = vstv %s2229_s0 }
  0x61   : > { %s2329_s24 = sld [smem:[#allocation2 + $0x8d]]  ;;  %v633_v40 = vstv %s2254_s7  ;;  %v612_v43 = vmul.f32 %v2299_v30, %v611_v39  ;;  %v659_v45 = vstv %s2260_s8  ;;  %s2339_s28 = sld [smem:[#allocation2 + $0x8e]]  ;;  %v2346_v49 = vmul.f32 %v1073_v38, %v2223_v0 }
  0x62   : > { %v634_v44 = vmul.f32 %v2299_v30, %v633_v40  ;;  %v685_v46 = vstv %s2262_s9  ;;  %s2341_s29 = sld [smem:[#allocation2 + $0x8f]]  ;;  %v711_v47 = vstv %s2268_s12  ;;  %v1151_v50 = vstv %s2240_s30  ;;  %s2349_s26 = sld [smem:[#allocation2 + $0x90]] }
  0x63   : > { %v737_v48 = vstv %s2270_s13  ;;  %s2351_s0 = sld [smem:[#allocation2 + $0x91]]  ;;  %v660_v51 = vmul.f32 %v2299_v30, %v659_v45  ;;  %v686_v52 = vmul.f32 %v2299_v30, %v685_v46  ;;  %v2356_v53 = vmul.f32 %v1099_v41, %v2223_v0  ;;  %s2361_s10 = sld [smem:[#allocation2 + $0x92]]  ;;  %v2456_v41 = vld [vmem:[%s2196_s25 + $0x4] sm:$0x3] }
  0x64   : > { %v2359_v54 = vmul.f32 %v1125_v42, %v2223_v0  ;;  %s2363_s11 = sld [smem:[#allocation2 + $0x93]]  ;;  %v712_v55 = vmul.f32 %v2299_v30, %v711_v47  ;;  %v738_v56 = vmul.f32 %v2299_v30, %v737_v48  ;;  %v763_v57 = vstv %s2278_s14  ;;  %s2383_s30 = sld [smem:[#allocation2 + $0x94]] }
  0x65   : > { %v789_v58 = vstv %s2280_s15  ;;  %v2370_v59 = vadd.f32 %v612_v43, %v2232_v7  ;;  %v2373_v60 = vadd.f32 %v634_v44, %v2235_v8  ;;  %v764_v61 = vmul.f32 %v2299_v30, %v763_v57  ;;  %s2393_s6 = sld [smem:[#allocation2 + $0x95]]  ;;  %s2409_s7 = sld [smem:[#allocation2 + $0x100]] }
  0x66   : > { %v2377_v62 = vmul.f32 %v1151_v50, %v2223_v0  ;;  %v815_v63 = vstv %s2294_s16  ;;  %v841_v1 = vstv %s2296_s17  ;;  %v867_v2 = vstv %s2313_s21  ;;  %s2411_s8 = sld [smem:[#allocation2 + $0x101]]  ;;  %s2417_s9 = sld [smem:[#allocation2 + $0x102]] }
  0x67   : > { %v893_v3 = vstv %s2315_s22  ;;  %v2386_v4 = vadd.f32 %v660_v51, %v2238_v9  ;;  %v2389_v5 = vadd.f32 %v686_v52, %v2243_v10  ;;  %v790_v6 = vmul.f32 %v2299_v30, %v789_v58  ;;  %s2419_s12 = sld [smem:[#allocation2 + $0x103]]  ;;  %s2429_s13 = sld [smem:[#allocation2 + $0x104]] }
  0x68   : > { %v816_v7 = vmul.f32 %v2299_v30, %v815_v63  ;;  %v2396_v0 = vadd.f32 %v712_v55, %v2246_v11  ;;  %v2399_v8 = vadd.f32 %v738_v56, %v2249_v12  ;;  %v919_v13 = vstv %s2327_s23  ;;  %s2431_s14 = sld [smem:[#allocation2 + $0x105]]  ;;  %s2437_s15 = sld [smem:[#allocation2 + $0x106]] }
  0x69   : > { %v945_v9 = vstv %s2329_s24  ;;  %v2404_v14 = vadd.f32 %v764_v61, %v2273_v22  ;;  %v842_v10 = vmul.f32 %v2299_v30, %v841_v1  ;;  %v868_v15 = vmul.f32 %v2299_v30, %v867_v2  ;;  %s2439_s16 = sld [smem:[#allocation2 + $0x107]]  ;;  %s2451_s17 = sld [smem:[#allocation2 + $0x108]] }
  0x6a   : > { %v894_v16 = vmul.f32 %v2299_v30, %v893_v3  ;;  %v920_v11 = vmul.f32 %v2299_v30, %v919_v13  ;;  %v946_v12 = vmul.f32 %v2299_v30, %v945_v9  ;;  %v971_v17 = vstv %s2339_s28  ;;  %s2453_s21 = sld [smem:[#allocation2 + $0x109]]  ;;  %s2468_s22 = sld [smem:[#allocation2 + $0x10a]] }
  0x6b   : > { %v997_v18 = vstv %s2341_s29  ;;  %v2422_v19 = vadd.f32 %v790_v6, %v2283_v26  ;;  %v2425_v20 = vadd.f32 %v816_v7, %v2286_v27  ;;  %v972_v21 = vmul.f32 %v2299_v30, %v971_v17  ;;  %s2470_s23 = sld [smem:[#allocation2 + $0x10b]]  ;;  %s2478_s24 = sld [smem:[#allocation2 + $0x10c]] }
  0x6c   : > { %v998_v22 = vmul.f32 %v2299_v30, %v997_v18  ;;  %v1023_v23 = vstv %s2349_s26  ;;  %v1049_v24 = vstv %s2351_s0  ;;  %v1075_v25 = vstv %s2361_s10  ;;  %s2480_s28 = sld [smem:[#allocation2 + $0x10d]]  ;;  %s2492_s29 = sld [smem:[#allocation2 + $0x10e]] }
  0x6d   : > { %v1101_v38 = vstv %s2363_s11  ;;  %v2442_v26 = vadd.f32 %v842_v10, %v2289_v28  ;;  %v2445_v27 = vadd.f32 %v868_v15, %v2292_v29  ;;  %v2448_v39 = vadd.f32 %v894_v16, %v2302_v31  ;;  %s2494_s26 = sld [smem:[#allocation2 + $0x10f]]  ;;  %s2504_s0 = sld [smem:[#allocation2 + $0x110]] }
  0x6e   : > { %v1024_v40 = vmul.f32 %v2299_v30, %v1023_v23  ;;  %v2459_v28 = vadd.f32 %v920_v11, %v2305_v32  ;;  %v2462_v29 = vadd.f32 %v946_v12, %v2308_v33  ;;  %v2465_v31 = vadd.f32 %v972_v21, %v2311_v34  ;;  %s2506_s10 = sld [smem:[#allocation2 + $0x111]]  ;;  %s2516_s11 = sld [smem:[#allocation2 + $0x112]] }
  0x6f   : > { %v1050_v42 = vmul.f32 %v2299_v30, %v1049_v24  ;;  %v2473_v43 = vadd.f32 %v998_v22, %v2318_v35  ;;  %v1076_v32 = vmul.f32 %v2299_v30, %v1075_v25  ;;  %v1102_v33 = vmul.f32 %v2299_v30, %v1101_v38 }
  0x70   : > { %v1127_v44 = vstv %s2383_s30  ;;  %v614_v34 = vstv %s2409_s7  ;;  %v636_v45 = vstv %s2411_s8  ;;  %v2485_v46 = vadd.f32 %v1024_v40, %v2321_v36  ;;  %s2518_s30 = sld [smem:[#allocation2 + $0x113]]  ;;  %s2562_s7 = sld [smem:[#allocation2 + $0x180]] }
  0x71   : > { %v1153_v47 = vstv %s2393_s6  ;;  %v615_v35 = vmul.f32 %v2456_v41, %v614_v34  ;;  %v637_v48 = vmul.f32 %v2456_v41, %v636_v45  ;;  %v662_v50 = vstv %s2417_s9  ;;  %s2538_s6 = sld [smem:[#allocation2 + $0x114]]  ;;  %s2564_s8 = sld [smem:[#allocation2 + $0x181]] }
  0x72   : > { %v688_v51 = vstv %s2419_s12  ;;  %v714_v52 = vstv %s2429_s13  ;;  %v740_v55 = vstv %s2431_s14  ;;  %v2499_v56 = vadd.f32 %v1050_v42, %v2324_v37  ;;  %s2570_s9 = sld [smem:[#allocation2 + $0x182]]  ;;  %s2572_s12 = sld [smem:[#allocation2 + $0x183]] }
  0x73   : > { %v2502_v36 = vmul.f32 %v2299_v30, %v1127_v44  ;;  %v663_v57 = vmul.f32 %v2456_v41, %v662_v50  ;;  %v689_v58 = vmul.f32 %v2456_v41, %v688_v51  ;;  %v2511_v61 = vadd.f32 %v1076_v32, %v2346_v49  ;;  %s2582_s13 = sld [smem:[#allocation2 + $0x184]]  ;;  %s2584_s14 = sld [smem:[#allocation2 + $0x185]] }
  0x74   : > { %v2514_v37 = vmul.f32 %v2299_v30, %v1153_v47  ;;  %v715_v63 = vmul.f32 %v2456_v41, %v714_v52  ;;  %v741_v1 = vmul.f32 %v2456_v41, %v740_v55  ;;  %v766_v2 = vstv %s2437_s15  ;;  %s2590_s15 = sld [smem:[#allocation2 + $0x186]]  ;;  %v2609_v47 = vld [vmem:[%s2196_s25 + $0x6] sm:$0x3] }
  0x75   : > { %v792_v3 = vstv %s2439_s16  ;;  %v2525_v6 = vadd.f32 %v615_v35, %v2370_v59  ;;  %v2528_v49 = vadd.f32 %v637_v48, %v2373_v60  ;;  %v767_v30 = vmul.f32 %v2456_v41, %v766_v2  ;;  %s2592_s16 = sld [smem:[#allocation2 + $0x187]] }
  0x76   : > { %v2532_v7 = vadd.f32 %v1102_v33, %v2356_v53  ;;  %v818_v13 = vstv %s2451_s17  ;;  %v844_v9 = vstv %s2453_s21  ;;  %v870_v10 = vstv %s2468_s22  ;;  %s2604_s17 = sld [smem:[#allocation2 + $0x188]]  ;;  %s2606_s21 = sld [smem:[#allocation2 + $0x189]] }
  0x77   : > { %v896_v15 = vstv %s2470_s23  ;;  %v2541_v16 = vadd.f32 %v663_v57, %v2386_v4  ;;  %v2544_v59 = vadd.f32 %v689_v58, %v2389_v5  ;;  %v793_v60 = vmul.f32 %v2456_v41, %v792_v3  ;;  %s2621_s22 = sld [smem:[#allocation2 + $0x18a]]  ;;  %s2623_s23 = sld [smem:[#allocation2 + $0x18b]] }
  0x78   : > { %v819_v11 = vmul.f32 %v2456_v41, %v818_v13  ;;  %v2549_v53 = vadd.f32 %v715_v63, %v2396_v0  ;;  %v2552_v12 = vadd.f32 %v741_v1, %v2399_v8  ;;  %v922_v17 = vstv %s2478_s24  ;;  %s2631_s24 = sld [smem:[#allocation2 + $0x18c]] }
  0x79   : > { %v948_v18 = vstv %s2480_s28  ;;  %v2557_v4 = vadd.f32 %v767_v30, %v2404_v14  ;;  %v845_v21 = vmul.f32 %v2456_v41, %v844_v9  ;;  %v871_v5 = vmul.f32 %v2456_v41, %v870_v10  ;;  %s2633_s28 = sld [smem:[#allocation2 + $0x18d]] }
  0x7a   : > { %v897_v22 = vmul.f32 %v2456_v41, %v896_v15  ;;  %v923_v0 = vmul.f32 %v2456_v41, %v922_v17  ;;  %v949_v8 = vmul.f32 %v2456_v41, %v948_v18  ;;  %v974_v14 = vstv %s2492_s29  ;;  %s2648_s29 = sld [smem:[#allocation2 + $0x18e]] }
  0x7b   : > { %v1000_v23 = vstv %s2494_s26  ;;  %v2575_v24 = vadd.f32 %v793_v60, %v2422_v19  ;;  %v2578_v25 = vadd.f32 %v819_v11, %v2425_v20  ;;  %v975_v38 = vmul.f32 %v2456_v41, %v974_v14  ;;  %s2650_s26 = sld [smem:[#allocation2 + $0x18f]] }
  0x7c   : > { %v1001_v40 = vmul.f32 %v2456_v41, %v1000_v23  ;;  %v1026_v42 = vstv %s2504_s0  ;;  %v1052_v32 = vstv %s2506_s10  ;;  %v1078_v33 = vstv %s2516_s11  ;;  %s2660_s0 = sld [smem:[#allocation2 + $0x190]]  ;;  %s2662_s10 = sld [smem:[#allocation2 + $0x191]] }
  0x7d   : > { %v1104_v44 = vstv %s2518_s30  ;;  %v2595_v19 = vadd.f32 %v845_v21, %v2442_v26  ;;  %v2598_v20 = vadd.f32 %v871_v5, %v2445_v27  ;;  %v2601_v34 = vadd.f32 %v897_v22, %v2448_v39  ;;  %s2672_s11 = sld [smem:[#allocation2 + $0x192]]  ;;  %s2674_s30 = sld [smem:[#allocation2 + $0x193]] }
  0x7e   : > { %v1027_v45 = vmul.f32 %v2456_v41, %v1026_v42  ;;  %v2612_v26 = vadd.f32 %v923_v0, %v2459_v28  ;;  %v2615_v35 = vadd.f32 %v949_v8, %v2462_v29  ;;  %v2618_v27 = vadd.f32 %v975_v38, %v2465_v31 }
  0x7f   : > { %v1053_v39 = vmul.f32 %v2456_v41, %v1052_v32  ;;  %v2626_v48 = vadd.f32 %v1001_v40, %v2473_v43  ;;  %v1079_v28 = vmul.f32 %v2456_v41, %v1078_v33  ;;  %v1105_v29 = vmul.f32 %v2456_v41, %v1104_v44 }
  0x80   : > { %v1130_v50 = vstv %s2538_s6  ;;  %v617_v31 = vstv %s2562_s7  ;;  %v639_v51 = vstv %s2564_s8  ;;  %v2638_v52 = vadd.f32 %v1027_v45, %v2485_v46  ;;  %s2692_s6 = sld [smem:[#allocation2 + $0x194]]  ;;  %s2716_s7 = sld [smem:[#allocation4]] }
  0x81   : > { %v2642_v43 = vadd.f32 %v2502_v36, %v2359_v54  ;;  %v618_v55 = vmul.f32 %v2609_v47, %v617_v31  ;;  %v640_v57 = vmul.f32 %v2609_v47, %v639_v51  ;;  %v665_v58 = vstv %s2570_s9  ;;  %s2718_s8 = sld [smem:[#allocation4 + $0x1]]  ;;  %s2724_s9 = sld [smem:[#allocation4 + $0x2]] }
  0x82   : > { %v691_v63 = vstv %s2572_s12  ;;  %v717_v1 = vstv %s2582_s13  ;;  %v743_v2 = vstv %s2584_s14  ;;  %v2655_v46 = vadd.f32 %v1053_v39, %v2499_v56  ;;  %s2726_s12 = sld [smem:[#allocation4 + $0x3]]  ;;  %s2736_s13 = sld [smem:[#allocation4 + $0x4]] }
  0x83   : > { %v2658_v54 = vmul.f32 %v2456_v41, %v1130_v50  ;;  %v666_v36 = vmul.f32 %v2609_v47, %v665_v58  ;;  %v692_v3 = vmul.f32 %v2609_v47, %v691_v63  ;;  %v2667_v30 = vadd.f32 %v1079_v28, %v2511_v61  ;;  %s2738_s14 = sld [smem:[#allocation4 + $0x5]] }
  0x84   : > { %v2670_v56 = vadd.f32 %v1105_v29, %v2532_v7  ;;  %v718_v41 = vmul.f32 %v2609_v47, %v717_v1  ;;  %v744_v13 = vmul.f32 %v2609_v47, %v743_v2  ;;  %v769_v9 = vstv %s2590_s15  ;;  %s2744_s15 = sld [smem:[#allocation4 + $0x6]] }
  0x85   : > { %v795_v10 = vstv %s2592_s16  ;;  %v2681_v15 = vadd.f32 %v618_v55, %v2525_v6  ;;  %v2684_v61 = vadd.f32 %v640_v57, %v2528_v49  ;;  %v770_v7 = vmul.f32 %v2609_v47, %v769_v9  ;;  %s2746_s16 = sld [smem:[#allocation4 + $0x7]] }
  0x86   : > { %v796_v60 = vmul.f32 %v2609_v47, %v795_v10  ;;  %v821_v11 = vstv %s2604_s17  ;;  %v847_v17 = vstv %s2606_s21  ;;  %v873_v18 = vstv %s2621_s22  ;;  %s2752_s17 = sld [smem:[#allocation4 + $0x8]]  ;;  %s2754_s21 = sld [smem:[#allocation4 + $0x9]] }
  0x87   : > { %v899_v21 = vstv %s2623_s23  ;;  %v667_v5 = vadd.f32 %v666_v36, %v2541_v16  ;;  %v2696_v6 = vadd.f32 %v692_v3, %v2544_v59  ;;  %v822_v49 = vmul.f32 %v2609_v47, %v821_v11  ;;  %s2764_s22 = sld [smem:[#allocation4 + $0xa]]  ;;  %s2766_s23 = sld [smem:[#allocation4 + $0xb]] }
  0x88   : > { %v848_v22 = vmul.f32 %v2609_v47, %v847_v17  ;;  %v2701_v0 = vadd.f32 %v718_v41, %v2549_v53  ;;  %v2704_v8 = vadd.f32 %v744_v13, %v2552_v12  ;;  %v925_v14 = vstv %s2631_s24  ;;  %s2775_s24 = sld [smem:[#allocation4 + $0xc]] }
  0x89   : > { %v951_v23 = vstv %s2633_s28  ;;  %v2709_v38 = vadd.f32 %v770_v7, %v2557_v4  ;;  %v2712_v16 = vadd.f32 %v796_v60, %v2575_v24  ;;  %v874_v59 = vmul.f32 %v2609_v47, %v873_v18  ;;  %s2777_s28 = sld [smem:[#allocation4 + $0xd]] }
  0x8a   : > { %v900_v40 = vmul.f32 %v2609_v47, %v899_v21  ;;  %v926_v53 = vmul.f32 %v2609_v47, %v925_v14  ;;  %v952_v12 = vmul.f32 %v2609_v47, %v951_v23  ;;  %v977_v4 = vstv %s2648_s29  ;;  %s2791_s29 = sld [smem:[#allocation4 + $0xe]] }
  0x8b   : > { %v1003_v42 = vstv %s2650_s26  ;;  %v2729_v24 = vadd.f32 %v822_v49, %v2578_v25  ;;  %v2732_v32 = vadd.f32 %v848_v22, %v2595_v19  ;;  %v978_v33 = vmul.f32 %v2609_v47, %v977_v4  ;;  %s2793_s26 = sld [smem:[#allocation4 + $0xf]] }
  0x8c   : > { %v1004_v44 = vmul.f32 %v2609_v47, %v1003_v42  ;;  %v1029_v45 = vstv %s2660_s0  ;;  %v1055_v39 = vstv %s2662_s10  ;;  %v1081_v28 = vstv %s2672_s11  ;;  %s2800_s0 = sld [smem:[#allocation4 + $0x10]]  ;;  %s2802_s10 = sld [smem:[#allocation4 + $0x11]] }
  0x8d   : > { %v1107_v29 = vstv %s2674_s30  ;;  %v875_v25 = vadd.f32 %v874_v59, %v2598_v20  ;;  %v901_v19 = vadd.f32 %v900_v40, %v2601_v34  ;;  %v1030_v50 = vmul.f32 %v2609_v47, %v1029_v45  ;;  %s2808_s11 = sld [smem:[#allocation4 + $0x12]]  ;;  %s2810_s30 = sld [smem:[#allocation4 + $0x13]] }
  0x8e   : > { %v1056_v31 = vmul.f32 %v2609_v47, %v1055_v39  ;;  %v927_v51 = vadd.f32 %v926_v53, %v2612_v26  ;;  %v953_v55 = vadd.f32 %v952_v12, %v2615_v35  ;;  %v2759_v57 = vadd.f32 %v978_v33, %v2618_v27 }
  0x8f   : > { %v2762_v20 = vadd.f32 %v1004_v44, %v2626_v48  ;;  %v1082_v34 = vmul.f32 %v2609_v47, %v1081_v28  ;;  %v1108_v58 = vmul.f32 %v2609_v47, %v1107_v29  ;;  %v2772_v26 = vadd.f32 %v2658_v54, %v2642_v43 }
  0x90   : > { %v1133_v35 = vstv %s2692_s6  ;;  %v620_v27 = vstv %s2716_s7  ;;  %v642_v48 = vstv %s2718_s8  ;;  %v2782_v63 = vadd.f32 %v1030_v50, %v2638_v52  ;;  %s2823_s6 = sld [smem:[#allocation2 + $0x115]]  ;;  %s2843_s7 = sld [smem:[#allocation6]] }
  0x91   : > { %v2785_v1 = vadd.f32 %v1056_v31, %v2655_v46  ;;  %v621_v2 = vadd.f32 %v620_v27, %v2681_v15  ;;  %v643_v36 = vadd.f32 %v642_v48, %v2684_v61  ;;  %v668_v43 = vstv %s2724_s9  ;;  %s2845_s8 = sld [smem:[#allocation6 + $0x1]]  ;;  %s2851_s9 = sld [smem:[#allocation6 + $0x2]] }
  0x92   : > { %v694_v54 = vstv %s2726_s12  ;;  %v669_v3 = vadd.f32 %v668_v43, %v667_v5  ;;  %v720_v41 = vstv %s2736_s13  ;;  %v746_v13 = vstv %s2738_s14  ;;  %s2853_s12 = sld [smem:[#allocation6 + $0x3]]  ;;  %s2861_s13 = sld [smem:[#allocation6 + $0x80]] }
  0x93   : > { %v2798_v52 = vmul.f32 %v2609_v47, %v1133_v35  ;;  %v695_v46 = vadd.f32 %v694_v54, %v2696_v6  ;;  %v721_v9 = vadd.f32 %v720_v41, %v2701_v0  ;;  %v1083_v10 = vadd.f32 %v1082_v34, %v2667_v30  ;;  %s2863_s14 = sld [smem:[#allocation6 + $0x81]] }
  0x94   : > { %v1109_v15 = vadd.f32 %v1108_v58, %v2670_v56  ;;  %v2812_v47 = vmax.f32 %v621_v2, 0.0  ;;  %v747_v61 = vadd.f32 %v746_v13, %v2704_v8  ;;  %v772_v7 = vstv %s2744_s15  ;;  %s2869_s15 = sld [smem:[#allocation6 + $0x82]] }
  0x95   : > { %v798_v60 = vstv %s2746_s16  ;;  %v2817_v11 = vmax.f32 %v643_v36, 0.0  ;;  %v2819_v17 = vmax.f32 %v669_v3, 0.0  ;;  %v773_v30 = vadd.f32 %v772_v7, %v2709_v38  ;;  %s2871_s16 = sld [smem:[#allocation6 + $0x83]] }
  0x96   : > { %v799_v56 = vadd.f32 %v798_v60, %v2712_v16  ;;  %v824_v18 = vstv %s2752_s17  ;;  %v850_v21 = vstv %s2754_s21  ;;  %v876_v5 = vstv %s2764_s22  ;;  %s2879_s17 = sld [smem:[#allocation6 + $0x100]]  ;;  %s2881_s21 = sld [smem:[#allocation6 + $0x101]] }
  0x97   : > { %v902_v6 = vstv %s2766_s23  ;;  %v2829_v49 = vmax.f32 %v695_v46, 0.0  ;;  %v2831_v22 = vmax.f32 %v721_v9, 0.0  ;;  %v825_v0 = vadd.f32 %v824_v18, %v2729_v24  ;;  %s2888_s22 = sld [smem:[#allocation6 + $0x102]]  ;;  %s2890_s23 = sld [smem:[#allocation6 + $0x103]] }
  0x98   : > { %v851_v8 = vadd.f32 %v850_v21, %v2732_v32  ;;  %v2835_v14 = vmax.f32 %v747_v61, 0.0  ;;  %v877_v23 = vadd.f32 %v876_v5, %v875_v25  ;;  %v928_v38 = vstv %s2775_s24  ;;  %s2902_s24 = sld [smem:[#allocation6 + $0x180]] }
  0x99   : > { %v954_v16 = vstv %s2777_s28  ;;  %v2839_v59 = vmax.f32 %v773_v30, 0.0  ;;  %v2841_v40 = vmax.f32 %v799_v56, 0.0  ;;  %v903_v53 = vadd.f32 %v902_v6, %v901_v19  ;;  %s2904_s28 = sld [smem:[#allocation6 + $0x181]] }
  0x9a   : > { %v929_v12 = vadd.f32 %v928_v38, %v927_v51  ;;  %v2847_v4 = vmax.f32 %v825_v0, 0.0  ;;  %v955_v42 = vadd.f32 %v954_v16, %v953_v55  ;;  %v980_v24 = vstv %s2791_s29  ;;  %s2912_s29 = sld [smem:[#allocation6 + $0x182]] }
  0x9b   : > { %v1006_v32 = vstv %s2793_s26  ;;  %v2855_v33 = vmax.f32 %v851_v8, 0.0  ;;  %v2857_v44 = vmax.f32 %v877_v23, 0.0  ;;  %v981_v45 = vadd.f32 %v980_v24, %v2759_v57  ;;  %s2914_s26 = sld [smem:[#allocation6 + $0x183]] }
  0x9c   : > { %v1007_v39 = vadd.f32 %v1006_v32, %v2762_v20  ;;  %v1032_v28 = vstv %s2800_s0  ;;  %v1058_v29 = vstv %s2802_s10  ;;  %v1084_v25 = vstv %s2808_s11  ;;  %s2920_s0 = sld [smem:[#allocation6 + $0x200]]  ;;  %s2922_s10 = sld [smem:[#allocation6 + $0x201]] }
  0x9d   : > { %v1110_v19 = vstv %s2810_s30  ;;  %v2873_v50 = vmax.f32 %v903_v53, 0.0  ;;  %v2875_v31 = vmax.f32 %v929_v12, 0.0  ;;  %v1033_v51 = vadd.f32 %v1032_v28, %v2782_v63  ;;  %s2932_s11 = sld [smem:[#allocation6 + $0x202]]  ;;  %s2934_s30 = sld [smem:[#allocation6 + $0x203]] }
  0x9e   : > { %v1059_v55 = vadd.f32 %v1058_v29, %v2785_v1  ;;  %v2883_v57 = vmax.f32 %v955_v42, 0.0  ;;  %v2885_v20 = vmax.f32 %v981_v45, 0.0  ;;  %v1085_v34 = vadd.f32 %v1084_v25, %v1083_v10 }
  0x9f   : > { %v1156_v58 = vstv %s2823_s6  ;;  %v2892_v35 = vmax.f32 %v1007_v39, 0.0  ;;  %v2894_v27 = vmax.f32 %v1033_v51, 0.0  ;;  %v2896_v48 = vadd.f32 %v1110_v19, %v1109_v15  ;;  %s3241_s6 = sld [smem:[#allocation2 + $0x17]] }
  0xa0   : > { %v2900_v63 = vadd.f32 %v2798_v52, %v2772_v26  ;;  %v623_v1 = vstv %s2843_s7  ;;  %v625_v2 = vstv %s2845_s8  ;;  %v2908_v36 = vmax.f32 %v1059_v55, 0.0  ;;  %s2940_s7 = sld [smem:[#allocation6 + $0x280]]  ;;  %s2942_s8 = sld [smem:[#allocation6 + $0x281]] }
  0xa1   : > { %v2910_v43 = vmax.f32 %v1085_v34, 0.0  ;;  %v624_v26 = vmul.f32 %v623_v1, %v2812_v47  ;;  %v626_v54 = vmul.f32 %v625_v2, %v2812_v47  ;;  %v627_v3 = vstv %s2851_s9  ;;  %s2946_s9 = sld [smem:[#allocation6 + $0x282]] }
  0xa2   : > { %v629_v41 = vstv %s2853_s12  ;;  %v628_v13 = vmul.f32 %v627_v3, %v2812_v47  ;;  %v645_v46 = vstv %s2861_s13  ;;  %v648_v9 = vstv %s2863_s14  ;;  %s2948_s12 = sld [smem:[#allocation6 + $0x283]]  ;;  %s2954_s13 = sld [smem:[#allocation6 + $0x300]] }
  0xa3   : > { %v630_v52 = vmul.f32 %v629_v41, %v2812_v47  ;;  %v646_v10 = vmul.f32 %v645_v46, %v2817_v11  ;;  %v649_v15 = vmul.f32 %v648_v9, %v2817_v11  ;;  %v651_v61 = vstv %s2869_s15  ;;  %s2956_s14 = sld [smem:[#allocation6 + $0x301]]  ;;  %s2964_s15 = sld [smem:[#allocation6 + $0x302]] }
  0xa4   : > { %v654_v7 = vstv %s2871_s16  ;;  %v652_v60 = vmul.f32 %v651_v61, %v2817_v11  ;;  %v671_v56 = vstv %s2879_s17  ;;  %v674_v47 = vstv %s2881_s21  ;;  %s2966_s16 = sld [smem:[#allocation6 + $0x303]]  ;;  %s2972_s17 = sld [smem:[#allocation6 + $0x380]] }
  0xa5   : > { %v655_v30 = vmul.f32 %v654_v7, %v2817_v11  ;;  %v647_v18 = vadd.f32 %v646_v10, %v624_v26  ;;  %v650_v21 = vadd.f32 %v649_v15, %v626_v54  ;;  %v672_v5 = vmul.f32 %v671_v56, %v2819_v17  ;;  %s2974_s21 = sld [smem:[#allocation6 + $0x381]] }
  0xa6   : > { %v675_v6 = vmul.f32 %v674_v47, %v2819_v17  ;;  %v653_v11 = vadd.f32 %v652_v60, %v628_v13  ;;  %v677_v8 = vstv %s2888_s22  ;;  %v680_v23 = vstv %s2890_s23  ;;  %s2978_s22 = sld [smem:[#allocation6 + $0x382]]  ;;  %s2980_s23 = sld [smem:[#allocation6 + $0x383]] }
  0xa7   : > { %v656_v0 = vadd.f32 %v655_v30, %v630_v52  ;;  %v673_v38 = vadd.f32 %v672_v5, %v647_v18  ;;  %v678_v53 = vmul.f32 %v677_v8, %v2819_v17  ;;  %v681_v12 = vmul.f32 %v680_v23, %v2819_v17 }
  0xa8   : > { %v676_v16 = vadd.f32 %v675_v6, %v650_v21  ;;  %v697_v42 = vstv %s2902_s24  ;;  %v700_v24 = vstv %s2904_s28  ;;  %v703_v32 = vstv %s2912_s29  ;;  %s2986_s24 = sld [smem:[#allocation6 + $0x400]]  ;;  %s2988_s28 = sld [smem:[#allocation6 + $0x401]] }
  0xa9   : > { %v706_v45 = vstv %s2914_s26  ;;  %v679_v39 = vadd.f32 %v678_v53, %v653_v11  ;;  %v682_v28 = vadd.f32 %v681_v12, %v656_v0  ;;  %v698_v29 = vmul.f32 %v697_v42, %v2829_v49  ;;  %s2996_s29 = sld [smem:[#allocation6 + $0x402]]  ;;  %s2998_s26 = sld [smem:[#allocation6 + $0x403]] }
  0xaa   : > { %v701_v25 = vmul.f32 %v700_v24, %v2829_v49  ;;  %v704_v17 = vmul.f32 %v703_v32, %v2829_v49  ;;  %v707_v19 = vmul.f32 %v706_v45, %v2829_v49  ;;  %v723_v51 = vstv %s2920_s0  ;;  %s3004_s0 = sld [smem:[#allocation6 + $0x480]] }
  0xab   : > { %v726_v55 = vstv %s2922_s10  ;;  %v699_v34 = vadd.f32 %v698_v29, %v673_v38  ;;  %v724_v2 = vmul.f32 %v723_v51, %v2831_v22  ;;  %v729_v3 = vstv %s2932_s11  ;;  %s3006_s10 = sld [smem:[#allocation6 + $0x481]]  ;;  %s3010_s11 = sld [smem:[#allocation6 + $0x482]] }
  0xac   : > { %v702_v1 = vadd.f32 %v701_v25, %v676_v16  ;;  %v727_v26 = vmul.f32 %v726_v55, %v2831_v22  ;;  %v705_v49 = vadd.f32 %v704_v17, %v679_v39  ;;  %v708_v54 = vadd.f32 %v707_v19, %v682_v28 }
  0xad   : > { %v732_v41 = vstv %s2934_s30  ;;  %v725_v13 = vadd.f32 %v724_v2, %v699_v34  ;;  %v730_v46 = vmul.f32 %v729_v3, %v2831_v22  ;;  %v749_v10 = vstv %s2940_s7  ;;  %s3012_s30 = sld [smem:[#allocation6 + $0x483]]  ;;  %s3018_s7 = sld [smem:[#allocation6 + $0x500]] }
  0xae   : > { %v728_v52 = vadd.f32 %v727_v26, %v702_v1  ;;  %v733_v9 = vmul.f32 %v732_v41, %v2831_v22  ;;  %v752_v15 = vstv %s2942_s8  ;;  %v755_v61 = vstv %s2946_s9  ;;  %s3020_s8 = sld [smem:[#allocation6 + $0x501]]  ;;  %s3028_s9 = sld [smem:[#allocation6 + $0x502]] }
  0xaf   : > { %v758_v7 = vstv %s2948_s12  ;;  %v731_v60 = vadd.f32 %v730_v46, %v705_v49  ;;  %v750_v56 = vmul.f32 %v749_v10, %v2835_v14  ;;  %v753_v47 = vmul.f32 %v752_v15, %v2835_v14  ;;  %s3030_s12 = sld [smem:[#allocation6 + $0x503]] }
  0xb0   : > { %v734_v30 = vadd.f32 %v733_v9, %v708_v54  ;;  %v756_v22 = vmul.f32 %v755_v61, %v2835_v14  ;;  %v759_v18 = vmul.f32 %v758_v7, %v2835_v14  ;;  %v775_v21 = vstv %s2954_s13  ;;  %s3036_s13 = sld [smem:[#allocation6 + $0x580]] }
  0xb1   : > { %v778_v5 = vstv %s2956_s14  ;;  %v751_v6 = vadd.f32 %v750_v56, %v725_v13  ;;  %v754_v11 = vadd.f32 %v753_v47, %v728_v52  ;;  %v776_v0 = vmul.f32 %v775_v21, %v2839_v59  ;;  %s3038_s14 = sld [smem:[#allocation6 + $0x581]] }
  0xb2   : > { %v779_v8 = vmul.f32 %v778_v5, %v2839_v59  ;;  %v757_v14 = vadd.f32 %v756_v22, %v731_v60  ;;  %v760_v23 = vadd.f32 %v759_v18, %v734_v30  ;;  %v781_v38 = vstv %s2964_s15  ;;  %s3042_s15 = sld [smem:[#allocation6 + $0x582]] }
  0xb3   : > { %v784_v16 = vstv %s2966_s16  ;;  %v777_v53 = vadd.f32 %v776_v0, %v751_v6  ;;  %v782_v42 = vmul.f32 %v781_v38, %v2839_v59  ;;  %v801_v32 = vstv %s2972_s17  ;;  %s3044_s16 = sld [smem:[#allocation6 + $0x583]]  ;;  %s3050_s17 = sld [smem:[#allocation6 + $0x600]] }
  0xb4   : > { %v780_v12 = vadd.f32 %v779_v8, %v754_v11  ;;  %v785_v24 = vmul.f32 %v784_v16, %v2839_v59  ;;  %v804_v45 = vstv %s2974_s21  ;;  %v807_v39 = vstv %s2978_s22  ;;  %s3052_s21 = sld [smem:[#allocation6 + $0x601]]  ;;  %s3060_s22 = sld [smem:[#allocation6 + $0x602]] }
  0xb5   : > { %v810_v28 = vstv %s2980_s23  ;;  %v783_v29 = vadd.f32 %v782_v42, %v757_v14  ;;  %v802_v17 = vmul.f32 %v801_v32, %v2841_v40  ;;  %v805_v19 = vmul.f32 %v804_v45, %v2841_v40  ;;  %s3062_s23 = sld [smem:[#allocation6 + $0x603]] }
  0xb6   : > { %v786_v25 = vadd.f32 %v785_v24, %v760_v23  ;;  %v808_v59 = vmul.f32 %v807_v39, %v2841_v40  ;;  %v811_v51 = vmul.f32 %v810_v28, %v2841_v40  ;;  %v827_v55 = vstv %s2986_s24  ;;  %s3068_s24 = sld [smem:[#allocation6 + $0x680]] }
  0xb7   : > { %v830_v34 = vstv %s2988_s28  ;;  %v803_v1 = vadd.f32 %v802_v17, %v777_v53  ;;  %v806_v2 = vadd.f32 %v805_v19, %v780_v12  ;;  %v828_v26 = vmul.f32 %v827_v55, %v2847_v4  ;;  %s3070_s28 = sld [smem:[#allocation6 + $0x681]] }
  0xb8   : > { %v831_v49 = vmul.f32 %v830_v34, %v2847_v4  ;;  %v809_v40 = vadd.f32 %v808_v59, %v783_v29  ;;  %v812_v54 = vadd.f32 %v811_v51, %v786_v25  ;;  %v833_v3 = vstv %s2996_s29  ;;  %s3074_s29 = sld [smem:[#allocation6 + $0x682]] }
  0xb9   : > { %v836_v41 = vstv %s2998_s26  ;;  %v829_v13 = vadd.f32 %v828_v26, %v803_v1  ;;  %v834_v46 = vmul.f32 %v833_v3, %v2847_v4  ;;  %v853_v10 = vstv %s3004_s0  ;;  %s3076_s26 = sld [smem:[#allocation6 + $0x683]]  ;;  %s3082_s0 = sld [smem:[#allocation6 + $0x700]] }
  0xba   : > { %v832_v52 = vadd.f32 %v831_v49, %v806_v2  ;;  %v837_v9 = vmul.f32 %v836_v41, %v2847_v4  ;;  %v856_v15 = vstv %s3006_s10  ;;  %v859_v61 = vstv %s3010_s11  ;;  %s3084_s10 = sld [smem:[#allocation6 + $0x701]]  ;;  %s3092_s11 = sld [smem:[#allocation6 + $0x702]] }
  0xbb   : > { %v862_v7 = vstv %s3012_s30  ;;  %v835_v60 = vadd.f32 %v834_v46, %v809_v40  ;;  %v854_v56 = vmul.f32 %v853_v10, %v2855_v33  ;;  %v857_v47 = vmul.f32 %v856_v15, %v2855_v33  ;;  %s3094_s30 = sld [smem:[#allocation6 + $0x703]] }
  0xbc   : > { %v838_v30 = vadd.f32 %v837_v9, %v812_v54  ;;  %v860_v4 = vmul.f32 %v859_v61, %v2855_v33  ;;  %v863_v22 = vmul.f32 %v862_v7, %v2855_v33  ;;  %v879_v18 = vstv %s3018_s7  ;;  %s3100_s7 = sld [smem:[#allocation6 + $0x780]] }
  0xbd   : > { %v882_v21 = vstv %s3020_s8  ;;  %v855_v5 = vadd.f32 %v854_v56, %v829_v13  ;;  %v858_v6 = vadd.f32 %v857_v47, %v832_v52  ;;  %v880_v11 = vmul.f32 %v879_v18, %v2857_v44  ;;  %s3102_s8 = sld [smem:[#allocation6 + $0x781]] }
  0xbe   : > { %v883_v0 = vmul.f32 %v882_v21, %v2857_v44  ;;  %v861_v33 = vadd.f32 %v860_v4, %v835_v60  ;;  %v864_v8 = vadd.f32 %v863_v22, %v838_v30  ;;  %v885_v14 = vstv %s3028_s9  ;;  %s3106_s9 = sld [smem:[#allocation6 + $0x782]] }
  0xbf   : > { %v888_v23 = vstv %s3030_s12  ;;  %v881_v38 = vadd.f32 %v880_v11, %v855_v5  ;;  %v886_v53 = vmul.f32 %v885_v14, %v2857_v44  ;;  %v905_v42 = vstv %s3036_s13  ;;  %s3108_s12 = sld [smem:[#allocation6 + $0x783]]  ;;  %s3114_s13 = sld [smem:[#allocation6 + $0x800]] }
  0xc0   : > { %v884_v16 = vadd.f32 %v883_v0, %v858_v6  ;;  %v889_v12 = vmul.f32 %v888_v23, %v2857_v44  ;;  %v908_v24 = vstv %s3038_s14  ;;  %v911_v32 = vstv %s3042_s15  ;;  %s3116_s14 = sld [smem:[#allocation6 + $0x801]]  ;;  %s3124_s15 = sld [smem:[#allocation6 + $0x802]] }
  0xc1   : > { %v914_v45 = vstv %s3044_s16  ;;  %v887_v39 = vadd.f32 %v886_v53, %v861_v33  ;;  %v906_v29 = vmul.f32 %v905_v42, %v2873_v50  ;;  %v909_v25 = vmul.f32 %v908_v24, %v2873_v50  ;;  %s3126_s16 = sld [smem:[#allocation6 + $0x803]] }
  0xc2   : > { %v890_v28 = vadd.f32 %v889_v12, %v864_v8  ;;  %v912_v44 = vmul.f32 %v911_v32, %v2873_v50  ;;  %v915_v17 = vmul.f32 %v914_v45, %v2873_v50  ;;  %v931_v19 = vstv %s3050_s17  ;;  %s3132_s17 = sld [smem:[#allocation6 + $0x880]] }
  0xc3   : > { %v934_v59 = vstv %s3052_s21  ;;  %v907_v51 = vadd.f32 %v906_v29, %v881_v38  ;;  %v910_v55 = vadd.f32 %v909_v25, %v884_v16  ;;  %v932_v34 = vmul.f32 %v931_v19, %v2875_v31  ;;  %s3134_s21 = sld [smem:[#allocation6 + $0x881]] }
  0xc4   : > { %v935_v1 = vmul.f32 %v934_v59, %v2875_v31  ;;  %v913_v50 = vadd.f32 %v912_v44, %v887_v39  ;;  %v916_v2 = vadd.f32 %v915_v17, %v890_v28  ;;  %v937_v26 = vstv %s3060_s22  ;;  %s3138_s22 = sld [smem:[#allocation6 + $0x882]] }
  0xc5   : > { %v940_v49 = vstv %s3062_s23  ;;  %v933_v40 = vadd.f32 %v932_v34, %v907_v51  ;;  %v938_v3 = vmul.f32 %v937_v26, %v2875_v31  ;;  %v957_v13 = vstv %s3068_s24  ;;  %s3140_s23 = sld [smem:[#allocation6 + $0x883]]  ;;  %s3146_s24 = sld [smem:[#allocation6 + $0x900]] }
  0xc6   : > { %v936_v54 = vadd.f32 %v935_v1, %v910_v55  ;;  %v941_v41 = vmul.f32 %v940_v49, %v2875_v31  ;;  %v960_v52 = vstv %s3070_s28  ;;  %v963_v46 = vstv %s3074_s29  ;;  %s3148_s28 = sld [smem:[#allocation6 + $0x901]]  ;;  %s3154_s29 = sld [smem:[#allocation4 + $0x14]] }
  0xc7   : > { %v966_v9 = vstv %s3076_s26  ;;  %v939_v10 = vadd.f32 %v938_v3, %v913_v50  ;;  %v958_v61 = vmul.f32 %v957_v13, %v2883_v57  ;;  %v961_v7 = vmul.f32 %v960_v52, %v2883_v57  ;;  %s3158_s26 = sld [smem:[#allocation6 + $0x902]] }
  0xc8   : > { %v942_v15 = vadd.f32 %v941_v41, %v916_v2  ;;  %v964_v31 = vmul.f32 %v963_v46, %v2883_v57  ;;  %v967_v60 = vmul.f32 %v966_v9, %v2883_v57  ;;  %v983_v30 = vstv %s3082_s0  ;;  %s3160_s0 = sld [smem:[#allocation6 + $0x903]] }
  0xc9   : > { %v986_v56 = vstv %s3084_s10  ;;  %v959_v47 = vadd.f32 %v958_v61, %v933_v40  ;;  %v962_v4 = vadd.f32 %v961_v7, %v936_v54  ;;  %v984_v22 = vmul.f32 %v983_v30, %v2885_v20  ;;  %s3166_s10 = sld [smem:[#allocation6 + $0x980]] }
  0xca   : > { %v987_v18 = vmul.f32 %v986_v56, %v2885_v20  ;;  %v965_v57 = vadd.f32 %v964_v31, %v939_v10  ;;  %v968_v21 = vadd.f32 %v967_v60, %v942_v15  ;;  %v989_v5 = vstv %s3092_s11  ;;  %s3170_s11 = sld [smem:[#allocation6 + $0x981]] }
  0xcb   : > { %v992_v6 = vstv %s3094_s30  ;;  %v985_v11 = vadd.f32 %v984_v22, %v959_v47  ;;  %v990_v33 = vmul.f32 %v989_v5, %v2885_v20  ;;  %v1009_v14 = vstv %s3100_s7  ;;  %s3172_s30 = sld [smem:[#allocation6 + $0x982]]  ;;  %s3176_s7 = sld [smem:[#allocation2 + $0x195]] }
  0xcc   : > { %v988_v0 = vadd.f32 %v987_v18, %v962_v4  ;;  %v993_v8 = vmul.f32 %v992_v6, %v2885_v20  ;;  %v1012_v23 = vstv %s3102_s8  ;;  %v1015_v38 = vstv %s3106_s9  ;;  %s3178_s8 = sld [smem:[#allocation6 + $0x983]]  ;;  %s3186_s9 = sld [smem:[#allocation2 + $0x16]]  ;;  %v3227_v6 = vld [vmem:[%s2196_s25 + $0x4] sm:$0x3] }
  0xcd   : > { %v1018_v16 = vstv %s3108_s12  ;;  %v991_v53 = vadd.f32 %v990_v33, %v965_v57  ;;  %v1010_v42 = vmul.f32 %v1009_v14, %v2892_v35  ;;  %v1013_v24 = vmul.f32 %v1012_v23, %v2892_v35  ;;  %s3190_s12 = sld [smem:[#allocation6 + $0xa00]] }
  0xce   : > { %v994_v12 = vadd.f32 %v993_v8, %v968_v21  ;;  %v1016_v20 = vmul.f32 %v1015_v38, %v2892_v35  ;;  %v1019_v32 = vmul.f32 %v1018_v16, %v2892_v35  ;;  %v1035_v45 = vstv %s3114_s13  ;;  %s3192_s13 = sld [smem:[#allocation6 + $0xa01]] }
  0xcf   : > { %v1038_v39 = vstv %s3116_s14  ;;  %v1011_v28 = vadd.f32 %v1010_v42, %v985_v11  ;;  %v1014_v29 = vadd.f32 %v1013_v24, %v988_v0  ;;  %v1036_v25 = vmul.f32 %v1035_v45, %v2894_v27  ;;  %s3198_s14 = sld [smem:[#allocation6 + $0xa02]] }
  0xd0   : > { %v1039_v44 = vmul.f32 %v1038_v39, %v2894_v27  ;;  %v1017_v17 = vadd.f32 %v1016_v20, %v991_v53  ;;  %v1020_v35 = vadd.f32 %v1019_v32, %v994_v12  ;;  %v1041_v19 = vstv %s3124_s15  ;;  %s3200_s15 = sld [smem:[#allocation6 + $0xa03]]  ;;  %v3252_v20 = vld [vmem:[%s2196_s25 + $0x6] sm:$0x3] }
  0xd1   : > { %v1044_v59 = vstv %s3126_s16  ;;  %v1037_v51 = vadd.f32 %v1036_v25, %v1011_v28  ;;  %v1042_v34 = vmul.f32 %v1041_v19, %v2894_v27  ;;  %v1061_v50 = vstv %s3132_s17  ;;  %s3205_s16 = sld [smem:[#allocation4 + $0x15]]  ;;  %s3212_s17 = sld [smem:[#allocation2 + $0x96]] }
  0xd2   : > { %v1040_v55 = vadd.f32 %v1039_v44, %v1014_v29  ;;  %v1045_v1 = vmul.f32 %v1044_v59, %v2894_v27  ;;  %v1064_v2 = vstv %s3134_s21  ;;  %v1067_v26 = vstv %s3138_s22  ;;  %s3214_s21 = sld [smem:[#allocation6 + $0xa80]]  ;;  %s3221_s22 = sld [smem:[#allocation2 + $0x116]]  ;;  %v3261_v29 = vld [vmem:[%s2196_s25] sm:$0x3] }
  0xd3   : > { %v1070_v49 = vstv %s3140_s23  ;;  %v1043_v40 = vadd.f32 %v1042_v34, %v1017_v17  ;;  %v1062_v3 = vmul.f32 %v1061_v50, %v2908_v36  ;;  %v1065_v41 = vmul.f32 %v1064_v2, %v2908_v36  ;;  %s3223_s23 = sld [smem:[#allocation2 + $0x196]] }
  0xd4   : > { %v1046_v54 = vadd.f32 %v1045_v1, %v1020_v35  ;;  %v1068_v27 = vmul.f32 %v1067_v26, %v2908_v36  ;;  %v1071_v13 = vmul.f32 %v1070_v49, %v2908_v36  ;;  %v1087_v52 = vstv %s3146_s24  ;;  %s3233_s24 = sld [smem:[#allocation6 + $0xa81]] }
  0xd5   : > { %v1090_v46 = vstv %s3148_s28  ;;  %v1063_v9 = vadd.f32 %v1062_v3, %v1037_v51  ;;  %v1088_v10 = vmul.f32 %v1087_v52, %v2910_v43  ;;  %v1112_v15 = vmax.f32 %v2896_v48, 0.0  ;;  %s3235_s28 = sld [smem:[#allocation6 + $0xa82]] }
  0xd6   : > { %v1136_v61 = vstv %s3154_s29  ;;  %v1066_v7 = vadd.f32 %v1065_v41, %v1040_v55  ;;  %v1091_v36 = vmul.f32 %v1090_v46, %v2910_v43  ;;  %v1093_v31 = vstv %s3158_s26  ;;  %s3238_s29 = sld [smem:[#allocation6 + $0xa83]]  ;;  %s3243_s26 = sld [smem:[#allocation2 + $0x97]] }
  0xd7   : > { %v1096_v60 = vstv %s3160_s0  ;;  %v1069_v30 = vadd.f32 %v1068_v27, %v1043_v40  ;;  %v1072_v56 = vadd.f32 %v1071_v13, %v1046_v54  ;;  %v1094_v47 = vmul.f32 %v1093_v31, %v2910_v43  ;;  %s3247_s0 = sld [smem:[#allocation2 + $0x117]]  ;;  %v3283_v54 = vld [vmem:[%s2196_s25 + $0x2] sm:$0x3]  ;;  %s3297_s25 = sld [smem:[#allocation6 + $0xb80]] }
  0xd8   : > { %v1097_v4 = vmul.f32 %v1096_v60, %v2910_v43  ;;  %v1113_v48 = vstv %s3166_s10  ;;  %v1116_v22 = vstv %s3170_s11  ;;  %v1119_v18 = vstv %s3172_s30  ;;  %s3255_s10 = sld [smem:[#allocation4 + $0x16]]  ;;  %s3257_s11 = sld [smem:[#allocation6 + $0xb00]] }
  0xd9   : > { %v1155_v57 = vadd.f32 %v2514_v37, %v2377_v62  ;;  %v1089_v21 = vadd.f32 %v1088_v10, %v1063_v9  ;;  %v1122_v5 = vstv %s3178_s8  ;;  %v1157_v43 = vmul.f32 %v3227_v6, %v1156_v58  ;;  %s3264_s30 = sld [smem:[#allocation6 + $0xb01]]  ;;  %s3268_s8 = sld [smem:[#allocation2 + $0x197]] }
  0xda   : > { %v1159_v11 = vstv %s3176_s7  ;;  %v1092_v62 = vadd.f32 %v1091_v36, %v1066_v7  ;;  %v1114_v37 = vmul.f32 %v1113_v48, %v1112_v15  ;;  %v1117_v0 = vmul.f32 %v1116_v22, %v1112_v15  ;;  %s3266_s7 = sld [smem:[#allocation6 + $0xb02]] }
  0xdb   : > { %v1137_v33 = vadd.f32 %v1136_v61, %v2900_v63  ;;  %v1095_v8 = vadd.f32 %v1094_v47, %v1069_v30  ;;  %v1098_v14 = vadd.f32 %v1097_v4, %v1072_v56  ;;  %v1120_v58 = vmul.f32 %v1119_v18, %v1112_v15 }
  0xdc   : > { %v1177_v23 = vstv %s3186_s9  ;;  %v1123_v38 = vmul.f32 %v1122_v5, %v1112_v15  ;;  %v1139_v53 = vstv %s3190_s12  ;;  %v1142_v12 = vstv %s3192_s13  ;;  %s3271_s9 = sld [smem:[#allocation6 + $0xb03]]  ;;  %s3276_s12 = sld [smem:[#allocation2 + $0x18]] }
  0xdd   : > { %v1138_v16 = vmax.f32 %v1137_v33, 0.0  ;;  %v1145_v63 = vstv %s3198_s14  ;;  %v1148_v42 = vstv %s3200_s15  ;;  %v1158_v24 = vadd.f32 %v1157_v43, %v1155_v57  ;;  %s3278_s13 = sld [smem:[#allocation2 + $0x98]]  ;;  %s3289_s15 = sld [smem:[#allocation4 + $0x17]] }
  0xde   : > { %v1160_v32 = vmul.f32 %v3252_v20, %v1159_v11  ;;  %v1115_v45 = vadd.f32 %v1114_v37, %v1089_v21  ;;  %v1118_v39 = vadd.f32 %v1117_v0, %v1092_v62  ;;  %v1162_v28 = vstv %s3205_s16  ;;  %s3287_s14 = sld [smem:[#allocation2 + $0x118]] }
  0xdf   : > { %v1178_v25 = vmul.f32 %v3261_v29, %v1177_v23  ;;  %v1121_v44 = vadd.f32 %v1120_v58, %v1095_v8  ;;  %v1140_v17 = vmul.f32 %v1139_v53, %v1138_v16  ;;  %v1143_v35 = vmul.f32 %v1142_v12, %v1138_v16  ;;  %s3292_s16 = sld [smem:[#allocation2 + $0x198]] }
  0xe0   : > { %v1161_v19 = vadd.f32 %v1160_v32, %v1158_v24  ;;  %v1124_v59 = vadd.f32 %v1123_v38, %v1098_v14  ;;  %v1146_v51 = vmul.f32 %v1145_v63, %v1138_v16  ;;  %v1149_v55 = vmul.f32 %v1148_v42, %v1138_v16 }
  0xe1   : > { %v1165_v34 = vstv %s3214_s21  ;;  %v1179_v50 = vstv %s3212_s17  ;;  %v1182_v2 = vstv %s3221_s22  ;;  %v1185_v26 = vstv %s3223_s23  ;;  %s3299_s17 = sld [smem:[#allocation6 + $0xb81]]  ;;  %s3301_s21 = sld [smem:[#allocation6 + $0xb82]] }
  0xe2   : > { %v1163_v1 = vadd.f32 %v1162_v28, %v1161_v19  ;;  %v1168_v49 = vstv %s3233_s24  ;;  %v1171_v40 = vstv %s3235_s28  ;;  %v1180_v3 = vmul.f32 %v3283_v54, %v1179_v50  ;;  %s3303_s22 = sld [smem:[#allocation6 + $0xb83]]  ;;  %s3312_s23 = sld [smem:[#allocation4 + $0x18]] }
  0xe3   : > { %v1183_v41 = vmul.f32 %v3227_v6, %v1182_v2  ;;  %v1141_v27 = vadd.f32 %v1140_v17, %v1115_v45  ;;  %v1144_v13 = vadd.f32 %v1143_v35, %v1118_v39  ;;  %v1174_v46 = vstv %s3238_s29  ;;  %s3314_s24 = sld [smem:[#allocation6 + $0xc00]]  ;;  %s3318_s28 = sld [smem:[#allocation2 + $0x19]] }
  0xe4   : > { %v1164_v52 = vmax.f32 %v1163_v1, 0.0  ;;  %v1181_v9 = vadd.f32 %v1180_v3, %v1178_v25  ;;  %v1186_v10 = vmul.f32 %v3252_v20, %v1185_v26  ;;  %v1203_v15 = vstv %s3241_s6  ;;  %s3320_s29 = sld [smem:[#allocation2 + $0x99]] }
  0xe5   : > { %v1205_v61 = vstv %s3243_s26  ;;  %v1147_v7 = vadd.f32 %v1146_v51, %v1121_v44  ;;  %v1150_v36 = vadd.f32 %v1149_v55, %v1124_v59  ;;  %v1204_v56 = vmul.f32 %v3261_v29, %v1203_v15  ;;  %s3324_s6 = sld [smem:[#allocation2 + $0x119]] }
  0xe6   : > { %v1166_v31 = vmul.f32 %v1165_v34, %v1164_v52  ;;  %v1169_v60 = vmul.f32 %v1168_v49, %v1164_v52  ;;  %v1184_v30 = vadd.f32 %v1183_v41, %v1181_v9  ;;  %v1206_v47 = vmul.f32 %v3283_v54, %v1205_v61  ;;  %s3326_s26 = sld [smem:[#allocation6 + $0xc01]] }
  0xe7   : > { %v1208_v4 = vstv %s3247_s0  ;;  %v1188_v48 = vstv %s3255_s10  ;;  %v1191_v22 = vstv %s3257_s11  ;;  %v1194_v18 = vstv %s3264_s30  ;;  %s3332_s0 = sld [smem:[#allocation2 + $0x199]]  ;;  %s3336_s10 = sld [smem:[#allocation6 + $0xc02]] }
  0xe8   : > { %v1197_v57 = vstv %s3266_s7  ;;  %v1187_v21 = vadd.f32 %v1186_v10, %v1184_v30  ;;  %v1207_v5 = vadd.f32 %v1206_v47, %v1204_v56  ;;  %v1209_v43 = vmul.f32 %v3227_v6, %v1208_v4  ;;  %s3340_s11 = sld [smem:[#allocation6 + $0xc03]]  ;;  %s3346_s30 = sld [smem:[#allocation2 + $0x1a]] }
  0xe9   : > { %v1211_v11 = vstv %s3268_s8  ;;  %v1172_v62 = vmul.f32 %v1171_v40, %v1164_v52  ;;  %v1175_v37 = vmul.f32 %v1174_v46, %v1164_v52  ;;  %v1200_v0 = vstv %s3271_s9  ;;  %s3348_s7 = sld [smem:[#allocation2 + $0x9a]] }
  0xea   : > { %v1212_v33 = vmul.f32 %v3252_v20, %v1211_v11  ;;  %v1167_v8 = vadd.f32 %v1166_v31, %v1141_v27  ;;  %v1170_v14 = vadd.f32 %v1169_v60, %v1144_v13  ;;  %v1189_v58 = vadd.f32 %v1188_v48, %v1187_v21  ;;  %s3353_s8 = sld [smem:[#allocation2 + $0x11a]] }
  0xeb   : > { %v1210_v23 = vadd.f32 %v1209_v43, %v1207_v5  ;;  %v1214_v38 = vstv %s3289_s15  ;;  %v1229_v16 = vstv %s3276_s12  ;;  %v1231_v53 = vstv %s3278_s13  ;;  %s3355_s9 = sld [smem:[#allocation2 + $0x19a]]  ;;  %s3358_s12 = sld [smem:[#allocation4 + $0x19]] }
  0xec   : > { %v1234_v12 = vstv %s3287_s14  ;;  %v1190_v63 = vmax.f32 %v1189_v58, 0.0  ;;  %v1230_v24 = vmul.f32 %v3261_v29, %v1229_v16  ;;  %v1232_v32 = vmul.f32 %v3283_v54, %v1231_v53  ;;  %s3360_s13 = sld [smem:[#allocation6 + $0xc80]]  ;;  %s3366_s14 = sld [smem:[#allocation6 + $0xc81]] }
  0xed   : > { %v1213_v42 = vadd.f32 %v1212_v33, %v1210_v23  ;;  %v1173_v45 = vadd.f32 %v1172_v62, %v1147_v7  ;;  %v1176_v39 = vadd.f32 %v1175_v37, %v1150_v36  ;;  %v1235_v28 = vmul.f32 %v3227_v6, %v1234_v12  ;;  %s3368_s15 = sld [smem:[#allocation6 + $0xc82]] }
  0xee   : > { %v1237_v25 = vstv %s3292_s16  ;;  %v1217_v44 = vstv %s3297_s25  ;;  %v1220_v17 = vstv %s3299_s17  ;;  %v1223_v35 = vstv %s3301_s21  ;;  %s3373_s16 = sld [smem:[#allocation2 + $0x1b]]  ;;  %s3380_s21 = sld [smem:[#allocation4 + $0x1a]] }
  0xef   : > { %v1226_v19 = vstv %s3303_s22  ;;  %v1192_v59 = vmul.f32 %v1191_v22, %v1190_v63  ;;  %v1195_v51 = vmul.f32 %v1194_v18, %v1190_v63  ;;  %v1215_v55 = vadd.f32 %v1214_v38, %v1213_v42  ;;  %s3375_s25 = sld [smem:[#allocation6 + $0xc83]] }
  0xf0   : > { %v1233_v34 = vadd.f32 %v1232_v32, %v1230_v24  ;;  %v1198_v1 = vmul.f32 %v1197_v57, %v1190_v63  ;;  %v1238_v50 = vmul.f32 %v3252_v20, %v1237_v25  ;;  %v1240_v2 = vstv %s3312_s23  ;;  %s3378_s17 = sld [smem:[#allocation2 + $0x9b]] }
  0xf1   : > { %v1243_v26 = vstv %s3314_s24  ;;  %v1201_v49 = vmul.f32 %v1200_v0, %v1190_v63  ;;  %v1216_v40 = vmax.f32 %v1215_v55, 0.0  ;;  %v1255_v41 = vstv %s3318_s28  ;;  %s3385_s22 = sld [smem:[#allocation2 + $0x11b]]  ;;  %s3391_s24 = sld [smem:[#allocation6 + $0xd00]] }
  0xf2   : > { %v1236_v3 = vadd.f32 %v1235_v28, %v1233_v34  ;;  %v1246_v27 = vstv %s3326_s26  ;;  %v1256_v13 = vmul.f32 %v3261_v29, %v1255_v41  ;;  %v1257_v52 = vstv %s3320_s29  ;;  %s3387_s23 = sld [smem:[#allocation2 + $0x19b]]  ;;  %s3393_s28 = sld [smem:[#allocation6 + $0xd01]] }
  0xf3   : > { %v1260_v46 = vstv %s3324_s6  ;;  %v1193_v9 = vadd.f32 %v1192_v59, %v1167_v8  ;;  %v1196_v10 = vadd.f32 %v1195_v51, %v1170_v14  ;;  %v1218_v15 = vmul.f32 %v1217_v44, %v1216_v40  ;;  %s3398_s29 = sld [smem:[#allocation4 + $0x1b]]  ;;  %s3402_s6 = sld [smem:[#allocation6 + $0xd02]] }
  0xf4   : > { %v1221_v61 = vmul.f32 %v1220_v17, %v1216_v40  ;;  %v1239_v7 = vadd.f32 %v1238_v50, %v1236_v3  ;;  %v1258_v36 = vmul.f32 %v3283_v54, %v1257_v52  ;;  %v1261_v31 = vmul.f32 %v3227_v6, %v1260_v46  ;;  %s3404_s26 = sld [smem:[#allocation6 + $0xd03]] }
  0xf5   : > { %v1263_v60 = vstv %s3332_s0  ;;  %v1199_v30 = vadd.f32 %v1198_v1, %v1173_v45  ;;  %v1202_v56 = vadd.f32 %v1201_v49, %v1176_v39  ;;  %v1224_v47 = vmul.f32 %v1223_v35, %v1216_v40  ;;  %s3408_s0 = sld [smem:[#allocation2 + $0x1c]] }
  0xf6   : > { %v1249_v4 = vstv %s3336_s10  ;;  %v1227_v48 = vmul.f32 %v1226_v19, %v1216_v40  ;;  %v1241_v22 = vadd.f32 %v1240_v2, %v1239_v7  ;;  %v1252_v18 = vstv %s3340_s11  ;;  %s3410_s10 = sld [smem:[#allocation2 + $0x9c]] }
  0xf7   : > { %v1259_v57 = vadd.f32 %v1258_v36, %v1256_v13  ;;  %v1219_v21 = vadd.f32 %v1218_v15, %v1193_v9  ;;  %v1222_v5 = vadd.f32 %v1221_v61, %v1196_v10  ;;  %v1264_v43 = vmul.f32 %v3252_v20, %v1263_v60  ;;  %s3414_s11 = sld [smem:[#allocation2 + $0x11c]] }
  0xf8   : > { %v1281_v11 = vstv %s3346_s30  ;;  %v1242_v62 = vmax.f32 %v1241_v22, 0.0  ;;  %v1283_v33 = vstv %s3348_s7  ;;  %v1225_v8 = vadd.f32 %v1224_v47, %v1199_v30  ;;  %s3416_s30 = sld [smem:[#allocation6 + $0xd80]]  ;;  %s3424_s7 = sld [smem:[#allocation6 + $0xd81]] }
  0xf9   : > { %v1262_v37 = vadd.f32 %v1261_v31, %v1259_v57  ;;  %v1282_v0 = vmul.f32 %v3261_v29, %v1281_v11  ;;  %v1284_v14 = vmul.f32 %v3283_v54, %v1283_v33  ;;  %v1286_v58 = vstv %s3353_s8  ;;  %s3428_s8 = sld [smem:[#allocation2 + $0x19c]] }
  0xfa   : > { %v1289_v23 = vstv %s3355_s9  ;;  %v1228_v38 = vadd.f32 %v1227_v48, %v1202_v56  ;;  %v1244_v16 = vmul.f32 %v1243_v26, %v1242_v62  ;;  %v1266_v53 = vstv %s3358_s12  ;;  %s3432_s9 = sld [smem:[#allocation6 + $0xd82]]  ;;  %s3434_s12 = sld [smem:[#allocation6 + $0xd83]] }
  0xfb   : > { %v1269_v12 = vstv %s3360_s13  ;;  %v1265_v63 = vadd.f32 %v1264_v43, %v1262_v37  ;;  %v1285_v42 = vadd.f32 %v1284_v14, %v1282_v0  ;;  %v1287_v24 = vmul.f32 %v3227_v6, %v1286_v58  ;;  %s3437_s13 = sld [smem:[#allocation2 + $0x1d]] }
  0xfc   : > { %v1290_v32 = vmul.f32 %v3252_v20, %v1289_v23  ;;  %v1247_v45 = vmul.f32 %v1246_v27, %v1242_v62  ;;  %v1250_v39 = vmul.f32 %v1249_v4, %v1242_v62  ;;  %v1272_v28 = vstv %s3366_s14  ;;  %s3443_s14 = sld [smem:[#allocation2 + $0x9d]] }
  0xfd   : > { %v1275_v25 = vstv %s3368_s15  ;;  %v1253_v44 = vmul.f32 %v1252_v18, %v1242_v62  ;;  %v1267_v17 = vadd.f32 %v1266_v53, %v1265_v63  ;;  %v1278_v35 = vstv %s3375_s25  ;;  %s3445_s15 = sld [smem:[#allocation2 + $0x11d]] }
  0xfe   : > { %v1288_v19 = vadd.f32 %v1287_v24, %v1285_v42  ;;  %v1245_v59 = vadd.f32 %v1244_v16, %v1219_v21  ;;  %v1292_v51 = vstv %s3380_s21  ;;  %v1307_v55 = vstv %s3373_s16  ;;  %s3447_s16 = sld [smem:[#allocation4 + $0x1c]]  ;;  %s3453_s25 = sld [smem:[#allocation2 + $0x19d]] }
  0xff   : > { %v1309_v34 = vstv %s3378_s17  ;;  %v1268_v1 = vmax.f32 %v1267_v17, 0.0  ;;  %v1308_v2 = vmul.f32 %v3261_v29, %v1307_v55  ;;  %v1248_v49 = vadd.f32 %v1247_v45, %v1222_v5  ;;  %s3455_s17 = sld [smem:[#allocation6 + $0xe00]]  ;;  %s3457_s21 = sld [smem:[#allocation6 + $0xe01]] }
 0x100   : > { %v1291_v50 = vadd.f32 %v1290_v32, %v1288_v19  ;;  %v1310_v26 = vmul.f32 %v3283_v54, %v1309_v34  ;;  %v1251_v40 = vadd.f32 %v1250_v39, %v1225_v8  ;;  %v1312_v3 = vstv %s3385_s22  ;;  %s3459_s22 = sld [smem:[#allocation6 + $0xe02]] }
 0x101   : > { %v1315_v41 = vstv %s3387_s23  ;;  %v1254_v27 = vadd.f32 %v1253_v44, %v1228_v38  ;;  %v1270_v13 = vmul.f32 %v1269_v12, %v1268_v1  ;;  %v1295_v52 = vstv %s3391_s24  ;;  %s3464_s23 = sld [smem:[#allocation6 + $0xe03]]  ;;  %s3467_s24 = sld [smem:[#allocation2 + $0x1e]] }
 0x102   : > { %v1298_v46 = vstv %s3393_s28  ;;  %v1273_v9 = vmul.f32 %v1272_v28, %v1268_v1  ;;  %v1293_v10 = vadd.f32 %v1292_v51, %v1291_v50  ;;  %v1311_v15 = vadd.f32 %v1310_v26, %v1308_v2  ;;  %s3470_s28 = sld [smem:[#allocation2 + $0x9e]] }
 0x103   : > { %v1313_v61 = vmul.f32 %v3227_v6, %v1312_v3  ;;  %v1301_v7 = vstv %s3402_s6  ;;  %v1304_v36 = vstv %s3404_s26  ;;  %v1316_v31 = vmul.f32 %v3252_v20, %v1315_v41  ;;  %s3477_s6 = sld [smem:[#allocation2 + $0x19e]]  ;;  %s3480_s26 = sld [smem:[#allocation4 + $0x1d]] }
 0x104   : > { %v1318_v60 = vstv %s3398_s29  ;;  %v1276_v30 = vmul.f32 %v1275_v25, %v1268_v1  ;;  %v1279_v56 = vmul.f32 %v1278_v35, %v1268_v1  ;;  %v1294_v47 = vmax.f32 %v1293_v10, 0.0  ;;  %s3475_s29 = sld [smem:[#allocation2 + $0x11e]] }
 0x105   : > { %v1314_v4 = vadd.f32 %v1313_v61, %v1311_v15  ;;  %v1321_v48 = vstv %s3416_s30  ;;  %v1333_v22 = vstv %s3408_s0  ;;  %v1335_v18 = vstv %s3410_s10  ;;  %s3482_s0 = sld [smem:[#allocation6 + $0xe80]]  ;;  %s3488_s10 = sld [smem:[#allocation6 + $0xe81]] }
 0x106   : > { %v1338_v57 = vstv %s3414_s11  ;;  %v1271_v21 = vadd.f32 %v1270_v13, %v1245_v59  ;;  %v1274_v5 = vadd.f32 %v1273_v9, %v1248_v49  ;;  %v1296_v43 = vmul.f32 %v1295_v52, %v1294_v47  ;;  %s3490_s11 = sld [smem:[#allocation6 + $0xe82]]  ;;  %s3495_s30 = sld [smem:[#allocation2 + $0x1f]] }
 0x107   : > { %v1299_v11 = vmul.f32 %v1298_v46, %v1294_v47  ;;  %v1317_v62 = vadd.f32 %v1316_v31, %v1314_v4  ;;  %v1334_v37 = vmul.f32 %v3261_v29, %v1333_v22  ;;  %v1336_v0 = vmul.f32 %v3283_v54, %v1335_v18 }
 0x108   : > { %v1339_v33 = vmul.f32 %v3227_v6, %v1338_v57  ;;  %v1277_v8 = vadd.f32 %v1276_v30, %v1251_v40  ;;  %v1280_v14 = vadd.f32 %v1279_v56, %v1254_v27  ;;  %v1302_v58 = vmul.f32 %v1301_v7, %v1294_v47 }
 0x109   : > { %v1324_v23 = vstv %s3424_s7  ;;  %v1305_v38 = vmul.f32 %v1304_v36, %v1294_v47  ;;  %v1319_v16 = vadd.f32 %v1318_v60, %v1317_v62  ;;  %v1337_v53 = vadd.f32 %v1336_v0, %v1334_v37  ;;  %s3497_s7 = sld [smem:[#allocation6 + $0xe83]] }
 0x10a   : > { %v1341_v12 = vstv %s3428_s8  ;;  %v1297_v63 = vadd.f32 %v1296_v43, %v1271_v21  ;;  %v1327_v42 = vstv %s3432_s9  ;;  %v1330_v24 = vstv %s3434_s12  ;;  %s3502_s8 = sld [smem:[#allocation2 + $0x9f]]  ;;  %s3504_s9 = sld [smem:[#allocation4 + $0x1e]] }
 0x10b   : > { %v1342_v32 = vmul.f32 %v3252_v20, %v1341_v12  ;;  %v1300_v45 = vadd.f32 %v1299_v11, %v1274_v5  ;;  %v1320_v39 = vmax.f32 %v1319_v16, 0.0  ;;  %v1340_v28 = vadd.f32 %v1339_v33, %v1337_v53  ;;  %s3509_s12 = sld [smem:[#allocation2 + $0x11f]] }
 0x10c   : > { %v1359_v25 = vstv %s3437_s13  ;;  %v1303_v44 = vadd.f32 %v1302_v58, %v1277_v8  ;;  %v1361_v35 = vstv %s3443_s14  ;;  %v1364_v19 = vstv %s3445_s15  ;;  %s3511_s13 = sld [smem:[#allocation2 + $0x19f]]  ;;  %s3520_s14 = sld [smem:[#allocation6 + $0xf00]] }
 0x10d   : > { %v1360_v17 = vmul.f32 %v3261_v29, %v1359_v25  ;;  %v1306_v59 = vadd.f32 %v1305_v38, %v1280_v14  ;;  %v1322_v51 = vmul.f32 %v1321_v48, %v1320_v39  ;;  %v1325_v55 = vmul.f32 %v1324_v23, %v1320_v39  ;;  %s3522_s15 = sld [smem:[#allocation6 + $0xf01]] }
 0x10e   : > { %v1344_v34 = vstv %s3447_s16  ;;  %v1343_v1 = vadd.f32 %v1342_v32, %v1340_v28  ;;  %v1362_v50 = vmul.f32 %v3283_v54, %v1361_v35  ;;  %v1365_v2 = vmul.f32 %v3227_v6, %v1364_v19  ;;  %s3526_s16 = sld [smem:[#allocation6 + $0xf02]] }
 0x10f   : > { %v1367_v26 = vstv %s3453_s25  ;;  %v1328_v49 = vmul.f32 %v1327_v42, %v1320_v39  ;;  %v1347_v40 = vstv %s3455_s17  ;;  %v1350_v3 = vstv %s3457_s21  ;;  %s3528_s25 = sld [smem:[#allocation6 + $0xf03]]  ;;  %s3532_s17 = sld [smem:[#allocation4 + $0x1f]] }
 0x110   : > { %v1353_v41 = vstv %s3459_s22  ;;  %v1331_v27 = vmul.f32 %v1330_v24, %v1320_v39  ;;  %v1345_v13 = vadd.f32 %v1344_v34, %v1343_v1  ;;  %v1356_v52 = vstv %s3464_s23  ;;  %s3542_s21 = sld [smem:[#allocation6 + $0xf80]]  ;;  %s3544_s22 = sld [smem:[#allocation6 + $0xf81]] }
 0x111   : > { %v1363_v46 = vadd.f32 %v1362_v50, %v1360_v17  ;;  %v1323_v9 = vadd.f32 %v1322_v51, %v1297_v63  ;;  %v1326_v10 = vadd.f32 %v1325_v55, %v1300_v45  ;;  %v1368_v15 = vmul.f32 %v3252_v20, %v1367_v26  ;;  %s3546_s23 = sld [smem:[#allocation6 + $0xf82]] }
 0x112   : > { %v1385_v61 = vstv %s3467_s24  ;;  %v1346_v7 = vmax.f32 %v1345_v13, 0.0  ;;  %v1387_v60 = vstv %s3470_s28  ;;  %v1329_v30 = vadd.f32 %v1328_v49, %v1303_v44  ;;  %s3548_s24 = sld [smem:[#allocation6 + $0xf83]]  ;;  %s3556_s28 = sld [smem:[#allocation7]] }
 0x113   : > { %v1366_v36 = vadd.f32 %v1365_v2, %v1363_v46  ;;  %v1386_v31 = vmul.f32 %v3261_v29, %v1385_v61  ;;  %v1388_v56 = vmul.f32 %v3283_v54, %v1387_v60  ;;  %v1390_v47 = vstv %s3475_s29  ;;  %s3558_s29 = sld [smem:[#allocation7 + $0x1]] }
 0x114   : > { %v1393_v4 = vstv %s3477_s6  ;;  %v1332_v48 = vadd.f32 %v1331_v27, %v1306_v59  ;;  %v1348_v22 = vmul.f32 %v1347_v40, %v1346_v7  ;;  %v1370_v18 = vstv %s3480_s26  ;;  %s3561_s6 = sld [smem:[#allocation7 + $0x2]]  ;;  %s3563_s26 = sld [smem:[#allocation7 + $0x3]] }
 0x115   : > { %v1373_v57 = vstv %s3482_s0  ;;  %v1369_v21 = vadd.f32 %v1368_v15, %v1366_v36  ;;  %v1389_v5 = vadd.f32 %v1388_v56, %v1386_v31  ;;  %v1391_v43 = vmul.f32 %v3227_v6, %v1390_v47  ;;  %s3605_s0 = sshll.u32 %s3611_s18, 3 }
 0x116   : > { %v1394_v11 = vmul.f32 %v3252_v20, %v1393_v4  ;;  %v1351_v62 = vmul.f32 %v1350_v3, %v1346_v7  ;;  %v1354_v37 = vmul.f32 %v1353_v41, %v1346_v7  ;;  %v1376_v0 = vstv %s3488_s10 }
 0x117   : > { %v1379_v33 = vstv %s3490_s11  ;;  %v1357_v8 = vmul.f32 %v1356_v52, %v1346_v7  ;;  %v1371_v14 = vadd.f32 %v1370_v18, %v1369_v21  ;;  %v1382_v58 = vstv %s3497_s7 }
 0x118   : > { %v1392_v23 = vadd.f32 %v1391_v43, %v1389_v5  ;;  %v1349_v38 = vadd.f32 %v1348_v22, %v1323_v9  ;;  %v1396_v16 = vstv %s3504_s9  ;;  %v1411_v53 = vstv %s3495_s30  ;;  %s309_s30 = scalar_lea.vmem %s3592_s5, %s3605_s0 }
 0x119   : > { %v1413_v12 = vstv %s3502_s8  ;;  %v1372_v63 = vmax.f32 %v1371_v14, 0.0  ;;  %v1412_v24 = vmul.f32 %v3261_v29, %v1411_v53  ;;  %v1352_v45 = vadd.f32 %v1351_v62, %v1326_v10 }
 0x11a   : > { %v1395_v42 = vadd.f32 %v1394_v11, %v1392_v23  ;;  %v1414_v32 = vmul.f32 %v3283_v54, %v1413_v12  ;;  %v1355_v39 = vadd.f32 %v1354_v37, %v1329_v30  ;;  %v1416_v28 = vstv %s3509_s12 }
 0x11b   : > { %v1419_v25 = vstv %s3511_s13  ;;  %v1358_v44 = vadd.f32 %v1357_v8, %v1332_v48  ;;  %v1374_v17 = vmul.f32 %v1373_v57, %v1372_v63  ;;  %v1377_v35 = vmul.f32 %v1376_v0, %v1372_v63 }
 0x11c   : > { %v1380_v19 = vmul.f32 %v1379_v33, %v1372_v63  ;;  %v1383_v29 = vmul.f32 %v1382_v58, %v1372_v63  ;;  %v1397_v54 = vadd.f32 %v1396_v16, %v1395_v42  ;;  %v1415_v59 = vadd.f32 %v1414_v32, %v1412_v24 }
 0x11d   : > { %v1417_v51 = vmul.f32 %v3227_v6, %v1416_v28  ;;  %v1399_v55 = vstv %s3520_s14  ;;  %v1402_v34 = vstv %s3522_s15  ;;  %v1420_v1 = vmul.f32 %v3252_v20, %v1419_v25 }
 0x11e   : > { %v1398_v50 = vmax.f32 %v1397_v54, 0.0  ;;  %v1405_v2 = vstv %s3526_s16  ;;  %v1408_v26 = vstv %s3528_s25  ;;  %v1375_v40 = vadd.f32 %v1374_v17, %v1349_v38 }
 0x11f   : > { %v1418_v49 = vadd.f32 %v1417_v51, %v1415_v59  ;;  %v1422_v3 = vstv %s3532_s17  ;;  %v1378_v6 = vadd.f32 %v1377_v35, %v1352_v45  ;;  %v1381_v20 = vadd.f32 %v1380_v19, %v1355_v39 }
 0x120   : > { %v1384_v41 = vadd.f32 %v1383_v29, %v1358_v44  ;;  %v1400_v27 = vmul.f32 %v1399_v55, %v1398_v50  ;;  %v1403_v13 = vmul.f32 %v1402_v34, %v1398_v50  ;;  %v1406_v52 = vmul.f32 %v1405_v2, %v1398_v50 }
 0x121   : > { %v1409_v46 = vmul.f32 %v1408_v26, %v1398_v50  ;;  %v1421_v9 = vadd.f32 %v1420_v1, %v1418_v49  ;;  %v1425_v15 = vstv %s3542_s21  ;;  %v1428_v7 = vstv %s3544_s22 }
 0x122   : > { %v1401_v61 = vadd.f32 %v1400_v27, %v1375_v40  ;;  %v1431_v36 = vstv %s3546_s23  ;;  %v1434_v31 = vstv %s3548_s24  ;;  %v1404_v60 = vadd.f32 %v1403_v13, %v1378_v6 }
 0x123   : > { %v1423_v10 = vadd.f32 %v1422_v3, %v1421_v9  ;;  %v1407_v30 = vadd.f32 %v1406_v52, %v1381_v20  ;;  %v1410_v56 = vadd.f32 %v1409_v46, %v1384_v41  ;;  %v1437_v57 = vstv %s3556_s28 }
 0x124   : > { %v1440_v21 = vstv %s3558_s29  ;;  %v1444_v5 = vstv %s3561_s6  ;;  %v1448_v43 = vstv %s3563_s26 }
 0x125   : > { %v1424_v47 = vmax.f32 %v1423_v10, 0.0 }
 0x127   : > { %v1426_v4 = vmul.f32 %v1425_v15, %v1424_v47  ;;  %v1429_v48 = vmul.f32 %v1428_v7, %v1424_v47  ;;  %v1432_v22 = vmul.f32 %v1431_v36, %v1424_v47  ;;  %v1435_v18 = vmul.f32 %v1434_v31, %v1424_v47 }
 0x129   : > { %v1427_v11 = vadd.f32 %v1426_v4, %v1401_v61  ;;  %v1430_v62 = vadd.f32 %v1429_v48, %v1404_v60  ;;  %v1433_v37 = vadd.f32 %v1432_v22, %v1407_v30  ;;  %v1436_v0 = vadd.f32 %v1435_v18, %v1410_v56 }
 0x12b   : > { %v1438_v33 = vadd.f32 %v1437_v57, %v1427_v11  ;;  %v1441_v8 = vadd.f32 %v1440_v21, %v1430_v62  ;;  %v1445_v14 = vadd.f32 %v1444_v5, %v1433_v37  ;;  %v1449_v58 = vadd.f32 %v1448_v43, %v1436_v0 }
 0x12d   : > { %1439 = vst [vmem:[%s309_s30] sm:$0x3] %v1438_v33  ;;  %1885 = vst [vmem:[%s309_s30 + $0x2] sm:$0x3] %v1441_v8 }
 0x12e   : > { %1886 = vst [vmem:[%s309_s30 + $0x4] sm:$0x3] %v1445_v14  ;;  %1887 = vst [vmem:[%s309_s30 + $0x6] sm:$0x3] %v1449_v58 }
 0x12f PF: > { %s18_s20 = sadd.s32 1, %s2057_s20   ;;  %s3606_s18 = smov %s2053_s19 }
 0x130   : > { %p15_p8 = scmp.ge.s32.totalorder %s18_s20, 4   ;;  %s3607_s19 = smov %s3609_s27 }
 0x132   :  { %17 = sbr.rel (!%p15_p8) target bundleno = 6 (0x6), region = 93 }
 0x139   :  { %1479 = vsyncpa [#allocation3], 1 }
 0x13a   :  { %1481 = vsyncpa [#allocation3 + $0x1], 1 }
 0x13b   :  { %1482 = vsyncpa [#allocation5], 1 }
 0x13c   :  { %1483 = vsyncpa [#allocation8], 1 }

</bundles_post_ra>
